<compile_context>
chip_gen: v7x
topology: tpu7x:2x2x1
jax: 0.10.0
libtpu: 0.0.40
codegen_flags: <defaults>
</compile_context>

<pallas_src>
import functools

import jax
import jax.numpy as jnp
from jax.experimental import pallas as pl
from jax.experimental.pallas import tpu as pltpu

SOS_TOKEN = 0


# ----------------------------------------------------------------------------
# Pallas kernel: full T-step greedy decode in one kernel invocation.
# ----------------------------------------------------------------------------
def _decoder_kernel(
    keys_ref,   # (B, S, H)   encoder outputs (attention values/keys)
    ukb_ref,    # (B, S, H)   precomputed U(keys) + bu   (loop-invariant)
    h0_ref,     # (B, H)      initial hidden state
    wh_ref,     # (H, 4H)     fused h-path weights [wq_t | whh_t]
    bh_ref,     # (1, 4H)     fused h-path biases  [bq   | bhh ]
    vw_ref,     # (1, H)      attention V as a row vector
    bv_ref,     # (1, 1)      attention V bias
    embW_ref,   # (V, 3H)     embedding folded into GRU ih top half: emb @ wih_top
    wihc_ref,   # (H, 3H)     GRU ih bottom half (context path)
    bih_ref,    # (1, 3H)     GRU ih bias
    wfc_ref,    # (H, V)      output projection (pre-transposed)
    bfc_ref,    # (1, V)      output projection bias
    logp_ref,   # out: (T, B, V)  log-probs, time-major
    attn_ref,   # out: (T, B, S)  attention weights, time-major
    hout_ref,   # out: (B, H)     final hidden state
):
    B, S, H = keys_ref.shape
    V = embW_ref.shape[0]
    T = logp_ref.shape[0]

    # Load all loop-invariant operands once.
    keys = keys_ref[...]                    # (B, S, H)
    ukb = ukb_ref[...]                      # (B, S, H)
    wh = wh_ref[...]                        # (H, 4H)
    bh = bh_ref[...]                        # (1, 4H)
    vw = vw_ref[...]                        # (1, H)
    bv = bv_ref[0, 0]
    embW = embW_ref[...]                    # (V, 3H)
    wihc = wihc_ref[...]                    # (H, 3H)
    bih = bih_ref[...]                      # (1, 3H)
    wfc = wfc_ref[...]                      # (H, V)
    bfc = bfc_ref[...]                      # (1, V)

    col = jax.lax.broadcasted_iota(jnp.int32, (B, V), 1)   # hoisted out of loop

    h0 = h0_ref[...]                                        # (B, H)
    onehot0 = (col == SOS_TOKEN).astype(jnp.float32)        # (B, V) SOS one-hot

    def step(t, carry):
        h, onehot = carry                                   # (B,H), (B,V)

        # ---- fused h-path matmul: [q | gh] = h @ [wq_t | whh_t] + [bq | bhh]
        hq = jnp.dot(h, wh, preferred_element_type=jnp.float32) + bh   # (B, 4H)
        q = hq[:, 0:H]                                      # (B, H)
        gh = hq[:, H:]                                      # (B, 3H)

        # ---- additive attention: softmax_S( V . tanh(Wq + Uk) ) -------------
        act = jnp.tanh(q[:, None, :] + ukb)                 # (B, S, H)
        # rank-1 contraction over H: VPU multiply + lane reduce (no MXU)
        scores = jnp.sum(act * vw, axis=-1) + bv            # (B, S)
        smax = jnp.max(scores, axis=-1, keepdims=True)
        e = jnp.exp(scores - smax)
        w = e * pl.reciprocal(jnp.sum(e, axis=-1, keepdims=True), approx=True)  # (B, S)
        # context: broadcast-multiply + sublane reduce (no M=1 batched matmul)
        context = jnp.sum(w[:, :, None] * keys, axis=1)     # (B, H)

        # ---- GRU cell (PyTorch gate order r, z, n), concat removed ----------
        gi = (jnp.dot(onehot, embW, preferred_element_type=jnp.float32)
              + jnp.dot(context, wihc, preferred_element_type=jnp.float32)
              + bih)                                        # (B, 3H)
        r = jax.nn.sigmoid(gi[:, 0:H] + gh[:, 0:H])
        z = jax.nn.sigmoid(gi[:, H:2 * H] + gh[:, H:2 * H])
        n = jnp.tanh(gi[:, 2 * H:] + r * gh[:, 2 * H:])
        h_new = (1.0 - z) * n + z * h                       # (B, H)

        # ---- output projection + log_softmax ---------------------------------
        logits = jnp.dot(h_new, wfc, preferred_element_type=jnp.float32) + bfc  # (B, V)
        lmax = jnp.max(logits, axis=-1, keepdims=True)
        lse = jnp.log(jnp.sum(jnp.exp(logits - lmax), axis=-1, keepdims=True)) + lmax
        logp = logits - lse

        logp_ref[t] = logp
        attn_ref[t] = w

        # greedy next token = first index of max (matches torch.topk(1) tie-break)
        is_max = logits >= lmax
        idx = jnp.min(jnp.where(is_max, col, V), axis=-1, keepdims=True)   # (B, 1)
        onehot_new = (col == idx).astype(jnp.float32)
        return h_new, onehot_new

    h_final, _ = jax.lax.fori_loop(0, T, step, (h0, onehot0), unroll=True)
    hout_ref[...] = h_final


# ----------------------------------------------------------------------------
# Wrapper
# ----------------------------------------------------------------------------
@functools.partial(jax.jit, static_argnames=("max_length",))
def attention_decoder_forward(params, encoder_outputs, encoder_hidden, max_length):
    """Greedy decode (target_tensor=None path of AttentionDecoder.forward)."""
    enc = encoder_outputs.astype(jnp.float32)
    B, S, H = enc.shape
    V = params["emb"].shape[0]
    T = max_length
    h0 = encoder_hidden[0].astype(jnp.float32)              # (B, H)

    # ---- loop-invariant precomputation (hoisted out of the decode loop) ----
    ukb = jnp.einsum("bsh,hg->bsg", enc, params["uk_t"],
                     preferred_element_type=jnp.float32) + params["bu"][0]     # (B,S,H)
    wh = jnp.concatenate([params["wq_t"], params["whh_t"]], axis=1)            # (H, 4H)
    bh = jnp.concatenate([params["bq"], params["bhh"]], axis=1)                # (1, 4H)
    embW = jnp.dot(params["emb"], params["wih_t"][:H, :],
                   preferred_element_type=jnp.float32)                         # (V, 3H)
    wihc = params["wih_t"][H:, :]                                              # (H, 3H)
    vw = params["vw_t"].T                                                      # (1, H)

    inputs = (
        enc, ukb, h0,
        wh, bh,
        vw, params["bv"],
        embW, wihc, params["bih"],
        params["wfc_t"], params["bfc"],
    )

    def full_spec(arr):
        nd = arr.ndim
        return pl.BlockSpec(arr.shape, lambda i, _nd=nd: (0,) * _nd)

    in_specs = [full_spec(a) for a in inputs]

    out_shape = (
        jax.ShapeDtypeStruct((T, B, V), jnp.float32),   # log-probs, time-major
        jax.ShapeDtypeStruct((T, B, S), jnp.float32),   # attention weights, time-major
        jax.ShapeDtypeStruct((B, H), jnp.float32),      # final hidden
    )
    out_specs = (
        pl.BlockSpec((T, B, V), lambda i: (0, 0, 0)),
        pl.BlockSpec((T, B, S), lambda i: (0, 0, 0)),
        pl.BlockSpec((B, H), lambda i: (0, 0)),
    )

    grid_spec = pltpu.PrefetchScalarGridSpec(
        num_scalar_prefetch=0,
        grid=(1,),                      # whole decode loop runs inside the kernel
        in_specs=in_specs,
        out_specs=out_specs,
    )

    logp_tm, attn_tm, h_final = pl.pallas_call(
        _decoder_kernel,
        out_shape=out_shape,
        grid_spec=grid_spec,
        compiler_params=pltpu.CompilerParams(
            dimension_semantics=("arbitrary",),
        ),
    )(*inputs)

    decoder_outputs = jnp.transpose(logp_tm, (1, 0, 2))      # (B, T, V)
    attention_outputs = jnp.transpose(attn_tm, (1, 0, 2))    # (B, T, S)
    decoder_hidden = h_final[None, :, :]                     # (1, B, H)
    return decoder_outputs, decoder_hidden, attention_outputs


# ----------------------------------------------------------------------------
# Deterministic parameter init (shapes from AttentionDecoder.__init__)
# ----------------------------------------------------------------------------
def init_params(key, hidden_size, output_size):
    H, V = hidden_size, output_size
    ks = jax.random.split(key, 12)

    def unif(k, shape, fan_in):
        s = 1.0 / jnp.sqrt(jnp.float32(fan_in))
        return jax.random.uniform(k, shape, jnp.float32, -s, s)

    return {
        "emb":   jax.random.normal(ks[0], (V, H), jnp.float32) * 0.1,
        # attention.W / U / V (stored pre-transposed: y = x @ w_t + b)
        "wq_t":  unif(ks[1], (H, H), H),
        "bq":    unif(ks[2], (1, H), H),
        "uk_t":  unif(ks[3], (H, H), H),
        "bu":    unif(ks[4], (1, H), H),
        "vw_t":  unif(ks[5], (H, 1), H),
        "bv":    unif(ks[6], (1, 1), H),
        # GRU(2H -> H), gate order [r, z, n]
        "wih_t": unif(ks[7], (2 * H, 3 * H), H),
        "bih":   unif(ks[8], (1, 3 * H), H),
        "whh_t": unif(ks[9], (H, 3 * H), H),
        "bhh":   unif(ks[10], (1, 3 * H), H),
        # fc(H -> V)
        "wfc_t": unif(ks[11], (H, V), H),
        "bfc":   jnp.zeros((1, V), jnp.float32),
    }


# ----------------------------------------------------------------------------
# Pure-JAX reference (mirrors the PyTorch forward, target_tensor=None)
# ----------------------------------------------------------------------------
def reference_forward(params, enc, encoder_hidden, T):
    B, S, H = enc.shape
    h = encoder_hidden[0]
    tok = jnp.full((B,), SOS_TOKEN, jnp.int32)
    logps, attns = [], []
    for _ in range(T):
        emb = params["emb"][tok]                                             # (B, H)
        q = h @ params["wq_t"] + params["bq"][0]
        uk = jnp.einsum("bsh,hg->bsg", enc, params["uk_t"]) + params["bu"][0]
        sc = jnp.tanh(q[:, None, :] + uk) @ params["vw_t"][:, 0] + params["bv"][0, 0]
        w = jax.nn.softmax(sc, axis=-1)                                      # (B, S)
        ctx = jnp.einsum("bs,bsh->bh", w, enc)
        x = jnp.concatenate([emb, ctx], axis=-1)
        gi = x @ params["wih_t"] + params["bih"][0]
        gh = h @ params["whh_t"] + params["bhh"][0]
        r = jax.nn.sigmoid(gi[:, :H] + gh[:, :H])
        z = jax.nn.sigmoid(gi[:, H:2 * H] + gh[:, H:2 * H])
        n = jnp.tanh(gi[:, 2 * H:] + r * gh[:, 2 * H:])
        h = (1.0 - z) * n + z * h
        logits = h @ params["wfc_t"] + params["bfc"][0]
        logps.append(jax.nn.log_softmax(logits, axis=-1)[:, None, :])
        attns.append(w[:, None, :])
        tok = jnp.argmax(logits, axis=-1)
    return jnp.concatenate(logps, 1), h[None], jnp.concatenate(attns, 1)


if __name__ == "__main__":
    B, S, H, V, T = 2, 8, 32, 16, 8   # batch, enc seq len, hidden, vocab, max_length

    key = jax.random.PRNGKey(0)
    kp, ke, kh = jax.random.split(key, 3)
    params = init_params(kp, H, V)
    encoder_outputs = jax.random.normal(ke, (B, S, H), jnp.float32)
    encoder_hidden = jax.random.normal(kh, (1, B, H), jnp.float32)

    dec_out, dec_hidden, attn_out = attention_decoder_forward(
        params, encoder_outputs, encoder_hidden, max_length=T)
    jax.block_until_ready((dec_out, dec_hidden, attn_out))

    assert dec_out.shape == (B, T, V)
    assert dec_hidden.shape == (1, B, H)
    assert attn_out.shape == (B, T, S)

    ref_out, ref_hidden, ref_attn = reference_forward(params, encoder_outputs, encoder_hidden, T)
    assert jnp.allclose(dec_out, ref_out, atol=5e-3, rtol=5e-3)
    assert jnp.allclose(dec_hidden, ref_hidden, atol=5e-3, rtol=5e-3)
    assert jnp.allclose(attn_out, ref_attn, atol=5e-3, rtol=5e-3)

    print("KERNEL_OK")
</pallas_src>

<mosaic_0001>
module attributes {stable_mosaic.version = 11 : i64} {
  func.func @_decoder_kernel(%arg0: i32, %arg1: memref<2x8x32xf32, #tpu.memory_space<vmem>>, %arg2: memref<2x8x32xf32, #tpu.memory_space<vmem>>, %arg3: memref<2x32xf32, #tpu.memory_space<vmem>>, %arg4: memref<32x128xf32, #tpu.memory_space<vmem>>, %arg5: memref<1x128xf32, #tpu.memory_space<vmem>>, %arg6: memref<1x32xf32, #tpu.memory_space<vmem>>, %arg7: memref<1x1xf32, #tpu.memory_space<vmem>>, %arg8: memref<16x96xf32, #tpu.memory_space<vmem>>, %arg9: memref<32x96xf32, #tpu.memory_space<vmem>>, %arg10: memref<1x96xf32, #tpu.memory_space<vmem>>, %arg11: memref<32x16xf32, #tpu.memory_space<vmem>>, %arg12: memref<1x16xf32, #tpu.memory_space<vmem>>, %arg13: memref<8x2x16xf32, #tpu.memory_space<vmem>>, %arg14: memref<8x2x8xf32, #tpu.memory_space<vmem>>, %arg15: memref<2x32xf32, #tpu.memory_space<vmem>>) attributes {dimension_semantics = [#tpu.dimension_semantics<arbitrary>], iteration_bounds = array<i64: 1>, scalar_prefetch = 0 : i64, scratch_operands = 0 : i64, tpu.core_type = #tpu.core_type<tc>, window_params = [{pipeline_mode = #tpu.pipeline_mode<synchronous>, transform_indices = @transform_0, window_bounds = array<i64: 2, 8, 32>}, {pipeline_mode = #tpu.pipeline_mode<synchronous>, transform_indices = @transform_1, window_bounds = array<i64: 2, 8, 32>}, {pipeline_mode = #tpu.pipeline_mode<synchronous>, transform_indices = @transform_2, window_bounds = array<i64: 2, 32>}, {pipeline_mode = #tpu.pipeline_mode<synchronous>, transform_indices = @transform_3, window_bounds = array<i64: 32, 128>}, {pipeline_mode = #tpu.pipeline_mode<synchronous>, transform_indices = @transform_4, window_bounds = array<i64: 1, 128>}, {pipeline_mode = #tpu.pipeline_mode<synchronous>, transform_indices = @transform_5, window_bounds = array<i64: 1, 32>}, {pipeline_mode = #tpu.pipeline_mode<synchronous>, transform_indices = @transform_6, window_bounds = array<i64: 1, 1>}, {pipeline_mode = #tpu.pipeline_mode<synchronous>, transform_indices = @transform_7, window_bounds = array<i64: 16, 96>}, {pipeline_mode = #tpu.pipeline_mode<synchronous>, transform_indices = @transform_8, window_bounds = array<i64: 32, 96>}, {pipeline_mode = #tpu.pipeline_mode<synchronous>, transform_indices = @transform_9, window_bounds = array<i64: 1, 96>}, {pipeline_mode = #tpu.pipeline_mode<synchronous>, transform_indices = @transform_10, window_bounds = array<i64: 32, 16>}, {pipeline_mode = #tpu.pipeline_mode<synchronous>, transform_indices = @transform_11, window_bounds = array<i64: 1, 16>}, {pipeline_mode = #tpu.pipeline_mode<synchronous>, transform_indices = @transform_12, window_bounds = array<i64: 8, 2, 16>}, {pipeline_mode = #tpu.pipeline_mode<synchronous>, transform_indices = @transform_13, window_bounds = array<i64: 8, 2, 8>}, {pipeline_mode = #tpu.pipeline_mode<synchronous>, transform_indices = @transform_14, window_bounds = array<i64: 2, 32>}]} {
    %c0 = arith.constant 0 : index
    %c0_0 = arith.constant 0 : index
    %c0_1 = arith.constant 0 : index
    %0 = vector.load %arg1[%c0, %c0_0, %c0_1] : memref<2x8x32xf32, #tpu.memory_space<vmem>>, vector<2x8x32xf32>
    %c0_2 = arith.constant 0 : index
    %c0_3 = arith.constant 0 : index
    %c0_4 = arith.constant 0 : index
    %1 = vector.load %arg2[%c0_2, %c0_3, %c0_4] : memref<2x8x32xf32, #tpu.memory_space<vmem>>, vector<2x8x32xf32>
    %c0_5 = arith.constant 0 : index
    %c0_6 = arith.constant 0 : index
    %2 = vector.load %arg4[%c0_5, %c0_6] : memref<32x128xf32, #tpu.memory_space<vmem>>, vector<32x128xf32>
    %c0_7 = arith.constant 0 : index
    %c0_8 = arith.constant 0 : index
    %3 = vector.load %arg5[%c0_7, %c0_8] : memref<1x128xf32, #tpu.memory_space<vmem>>, vector<1x128xf32>
    %c0_9 = arith.constant 0 : index
    %c0_10 = arith.constant 0 : index
    %4 = vector.load %arg6[%c0_9, %c0_10] : memref<1x32xf32, #tpu.memory_space<vmem>>, vector<1x32xf32>
    %c0_11 = arith.constant 0 : index
    %c0_12 = arith.constant 0 : index
    %5 = vector.load %arg7[%c0_11, %c0_12] : memref<1x1xf32, #tpu.memory_space<vmem>>, vector<1x1xf32>
    %6 = vector.extract %5[0, 0] : f32 from vector<1x1xf32>
    %c0_13 = arith.constant 0 : index
    %c0_14 = arith.constant 0 : index
    %7 = vector.load %arg8[%c0_13, %c0_14] : memref<16x96xf32, #tpu.memory_space<vmem>>, vector<16x96xf32>
    %c0_15 = arith.constant 0 : index
    %c0_16 = arith.constant 0 : index
    %8 = vector.load %arg9[%c0_15, %c0_16] : memref<32x96xf32, #tpu.memory_space<vmem>>, vector<32x96xf32>
    %c0_17 = arith.constant 0 : index
    %c0_18 = arith.constant 0 : index
    %9 = vector.load %arg10[%c0_17, %c0_18] : memref<1x96xf32, #tpu.memory_space<vmem>>, vector<1x96xf32>
    %c0_19 = arith.constant 0 : index
    %c0_20 = arith.constant 0 : index
    %10 = vector.load %arg11[%c0_19, %c0_20] : memref<32x16xf32, #tpu.memory_space<vmem>>, vector<32x16xf32>
    %c0_21 = arith.constant 0 : index
    %c0_22 = arith.constant 0 : index
    %11 = vector.load %arg12[%c0_21, %c0_22] : memref<1x16xf32, #tpu.memory_space<vmem>>, vector<1x16xf32>
    %12 = tpu.iota {dimensions = array<i32: 1>} : vector<2x16xi32>
    %c0_23 = arith.constant 0 : index
    %c0_24 = arith.constant 0 : index
    %13 = vector.load %arg3[%c0_23, %c0_24] : memref<2x32xf32, #tpu.memory_space<vmem>>, vector<2x32xf32>
    %c0_i32 = arith.constant 0 : i32
    %14 = vector.broadcast %c0_i32 : i32 to vector<2x16xi32>
    %15 = arith.cmpi eq, %12, %14 : vector<2x16xi32>
    %16 = arith.extui %15 : vector<2x16xi1> to vector<2x16xi32>
    %17 = arith.sitofp %16 : vector<2x16xi32> to vector<2x16xf32>
    %c0_i32_25 = arith.constant 0 : i32
    %cst = arith.constant dense<0.000000e+00> : vector<2x128xf32>
    %18 = tpu.matmul %13, %2, %cst {dimension_numbers = #tpu.dot_dimension_numbers<[1], [0], [0], [1], [0, 0, 1, 1], [], []>} : vector<2x32xf32>, vector<32x128xf32>, vector<2x128xf32> -> vector<2x128xf32>
    %19 = vector.broadcast %3 : vector<1x128xf32> to vector<2x128xf32>
    %20 = arith.addf %18, %19 : vector<2x128xf32>
    %21 = vector.extract_strided_slice %20 {offsets = [0, 0], sizes = [2, 32], strides = [1, 1]} : vector<2x128xf32> to vector<2x32xf32>
    %22 = vector.extract_strided_slice %20 {offsets = [0, 32], sizes = [2, 96], strides = [1, 1]} : vector<2x128xf32> to vector<2x96xf32>
    %23 = vector.shape_cast %21 : vector<2x32xf32> to vector<2x1x32xf32>
    %24 = vector.broadcast %23 : vector<2x1x32xf32> to vector<2x8x32xf32>
    %25 = arith.addf %24, %1 : vector<2x8x32xf32>
    %26 = math.tanh %25 : vector<2x8x32xf32>
    %27 = vector.shape_cast %4 : vector<1x32xf32> to vector<1x1x32xf32>
    %28 = vector.broadcast %27 : vector<1x1x32xf32> to vector<2x8x32xf32>
    %29 = arith.mulf %26, %28 : vector<2x8x32xf32>
    %cst_26 = arith.constant dense<0.000000e+00> : vector<2x8xf32>
    %30 = vector.multi_reduction <add>, %29, %cst_26 [2] : vector<2x8x32xf32> to vector<2x8xf32>
    %31 = vector.broadcast %6 : f32 to vector<2x8xf32>
    %32 = arith.addf %30, %31 : vector<2x8xf32>
    %cst_27 = arith.constant dense<0xFF800000> : vector<2xf32>
    %33 = vector.multi_reduction <maximumf>, %32, %cst_27 [1] : vector<2x8xf32> to vector<2xf32>
    %34 = vector.shape_cast %33 : vector<2xf32> to vector<2x1xf32>
    %35 = vector.broadcast %34 : vector<2x1xf32> to vector<2x8xf32>
    %36 = arith.subf %32, %35 : vector<2x8xf32>
    %37 = math.exp %36 : vector<2x8xf32>
    %cst_28 = arith.constant dense<0.000000e+00> : vector<2xf32>
    %38 = vector.multi_reduction <add>, %37, %cst_28 [1] : vector<2x8xf32> to vector<2xf32>
    %39 = vector.shape_cast %38 : vector<2xf32> to vector<2x1xf32>
    %40 = tpu.reciprocal %39 {approx = true} : vector<2x1xf32> -> vector<2x1xf32>
    %41 = vector.broadcast %40 : vector<2x1xf32> to vector<2x8xf32>
    %42 = arith.mulf %37, %41 : vector<2x8xf32>
    %43 = vector.shape_cast %42 : vector<2x8xf32> to vector<2x8x1xf32>
    %44 = vector.broadcast %43 : vector<2x8x1xf32> to vector<2x8x32xf32>
    %45 = arith.mulf %44, %0 : vector<2x8x32xf32>
    %cst_29 = arith.constant dense<0.000000e+00> : vector<2x32xf32>
    %46 = vector.multi_reduction <add>, %45, %cst_29 [1] : vector<2x8x32xf32> to vector<2x32xf32>
    %cst_30 = arith.constant dense<0.000000e+00> : vector<2x96xf32>
    %47 = tpu.matmul %17, %7, %cst_30 {dimension_numbers = #tpu.dot_dimension_numbers<[1], [0], [0], [1], [0, 0, 1, 1], [], []>} : vector<2x16xf32>, vector<16x96xf32>, vector<2x96xf32> -> vector<2x96xf32>
    %cst_31 = arith.constant dense<0.000000e+00> : vector<2x96xf32>
    %48 = tpu.matmul %46, %8, %cst_31 {dimension_numbers = #tpu.dot_dimension_numbers<[1], [0], [0], [1], [0, 0, 1, 1], [], []>} : vector<2x32xf32>, vector<32x96xf32>, vector<2x96xf32> -> vector<2x96xf32>
    %49 = arith.addf %47, %48 : vector<2x96xf32>
    %50 = vector.broadcast %9 : vector<1x96xf32> to vector<2x96xf32>
    %51 = arith.addf %49, %50 : vector<2x96xf32>
    %52 = vector.extract_strided_slice %51 {offsets = [0, 0], sizes = [2, 32], strides = [1, 1]} : vector<2x96xf32> to vector<2x32xf32>
    %53 = vector.extract_strided_slice %22 {offsets = [0, 0], sizes = [2, 32], strides = [1, 1]} : vector<2x96xf32> to vector<2x32xf32>
    %54 = arith.addf %52, %53 : vector<2x32xf32>
    %55 = arith.negf %54 : vector<2x32xf32>
    %56 = math.exp %55 : vector<2x32xf32>
    %cst_32 = arith.constant 1.000000e+00 : f32
    %57 = vector.broadcast %cst_32 : f32 to vector<2x32xf32>
    %58 = arith.addf %57, %56 : vector<2x32xf32>
    %59 = arith.divf %57, %58 : vector<2x32xf32>
    %60 = vector.extract_strided_slice %51 {offsets = [0, 32], sizes = [2, 32], strides = [1, 1]} : vector<2x96xf32> to vector<2x32xf32>
    %61 = vector.extract_strided_slice %22 {offsets = [0, 32], sizes = [2, 32], strides = [1, 1]} : vector<2x96xf32> to vector<2x32xf32>
    %62 = arith.addf %60, %61 : vector<2x32xf32>
    %63 = arith.negf %62 : vector<2x32xf32>
    %64 = math.exp %63 : vector<2x32xf32>
    %cst_33 = arith.constant 1.000000e+00 : f32
    %65 = vector.broadcast %cst_33 : f32 to vector<2x32xf32>
    %66 = arith.addf %65, %64 : vector<2x32xf32>
    %67 = arith.divf %65, %66 : vector<2x32xf32>
    %68 = vector.extract_strided_slice %51 {offsets = [0, 64], sizes = [2, 32], strides = [1, 1]} : vector<2x96xf32> to vector<2x32xf32>
    %69 = vector.extract_strided_slice %22 {offsets = [0, 64], sizes = [2, 32], strides = [1, 1]} : vector<2x96xf32> to vector<2x32xf32>
    %70 = arith.mulf %59, %69 : vector<2x32xf32>
    %71 = arith.addf %68, %70 : vector<2x32xf32>
    %72 = math.tanh %71 : vector<2x32xf32>
    %cst_34 = arith.constant 1.000000e+00 : f32
    %73 = vector.broadcast %cst_34 : f32 to vector<2x32xf32>
    %74 = arith.subf %73, %67 : vector<2x32xf32>
    %75 = arith.mulf %74, %72 : vector<2x32xf32>
    %76 = arith.mulf %67, %13 : vector<2x32xf32>
    %77 = arith.addf %75, %76 : vector<2x32xf32>
    %cst_35 = arith.constant dense<0.000000e+00> : vector<2x16xf32>
    %78 = tpu.matmul %77, %10, %cst_35 {dimension_numbers = #tpu.dot_dimension_numbers<[1], [0], [0], [1], [0, 0, 1, 1], [], []>} : vector<2x32xf32>, vector<32x16xf32>, vector<2x16xf32> -> vector<2x16xf32>
    %79 = vector.broadcast %11 : vector<1x16xf32> to vector<2x16xf32>
    %80 = arith.addf %78, %79 : vector<2x16xf32>
    %cst_36 = arith.constant dense<0xFF800000> : vector<2xf32>
    %81 = vector.multi_reduction <maximumf>, %80, %cst_36 [1] : vector<2x16xf32> to vector<2xf32>
    %82 = vector.shape_cast %81 : vector<2xf32> to vector<2x1xf32>
    %83 = vector.broadcast %82 : vector<2x1xf32> to vector<2x16xf32>
    %84 = arith.subf %80, %83 : vector<2x16xf32>
    %85 = math.exp %84 : vector<2x16xf32>
    %cst_37 = arith.constant dense<0.000000e+00> : vector<2xf32>
    %86 = vector.multi_reduction <add>, %85, %cst_37 [1] : vector<2x16xf32> to vector<2xf32>
    %87 = vector.shape_cast %86 : vector<2xf32> to vector<2x1xf32>
    %88 = math.log %87 : vector<2x1xf32>
    %89 = arith.addf %88, %82 : vector<2x1xf32>
    %90 = vector.broadcast %89 : vector<2x1xf32> to vector<2x16xf32>
    %91 = arith.subf %80, %90 : vector<2x16xf32>
    %92 = arith.index_cast %c0_i32_25 : i32 to index
    %c0_38 = arith.constant 0 : index
    %c0_39 = arith.constant 0 : index
    %93 = vector.load %arg13[%92, %c0_38, %c0_39] : memref<8x2x16xf32, #tpu.memory_space<vmem>>, vector<1x2x16xf32>
    %94 = vector.shape_cast %93 : vector<1x2x16xf32> to vector<2x16xf32>
    %95 = vector.shape_cast %91 : vector<2x16xf32> to vector<1x2x16xf32>
    tpu.vector_store %arg13[%92, %c0_38, %c0_39], %95 {strides = array<i32>} : memref<8x2x16xf32, #tpu.memory_space<vmem>>, vector<1x2x16xf32>,
    %96 = arith.index_cast %c0_i32_25 : i32 to index
    %c0_40 = arith.constant 0 : index
    %c0_41 = arith.constant 0 : index
    %97 = vector.load %arg14[%96, %c0_40, %c0_41] : memref<8x2x8xf32, #tpu.memory_space<vmem>>, vector<1x2x8xf32>
    %98 = vector.shape_cast %97 : vector<1x2x8xf32> to vector<2x8xf32>
    %99 = vector.shape_cast %42 : vector<2x8xf32> to vector<1x2x8xf32>
    tpu.vector_store %arg14[%96, %c0_40, %c0_41], %99 {strides = array<i32>} : memref<8x2x8xf32, #tpu.memory_space<vmem>>, vector<1x2x8xf32>,
    %100 = vector.broadcast %82 : vector<2x1xf32> to vector<2x16xf32>
    %101 = arith.cmpf oge, %80, %100 : vector<2x16xf32>
    %c16_i32 = arith.constant 16 : i32
    %102 = vector.broadcast %c16_i32 : i32 to vector<2x16xi32>
    %103 = arith.select %101, %12, %102 : vector<2x16xi1>, vector<2x16xi32>
    %cst_42 = arith.constant dense<2147483647> : vector<2xi32>
    %104 = vector.multi_reduction <minsi>, %103, %cst_42 [1] : vector<2x16xi32> to vector<2xi32>
    %105 = vector.shape_cast %104 : vector<2xi32> to vector<2x1xi32>
    %106 = vector.broadcast %105 : vector<2x1xi32> to vector<2x16xi32>
    %107 = arith.cmpi eq, %12, %106 : vector<2x16xi32>
    %108 = arith.extui %107 : vector<2x16xi1> to vector<2x16xi32>
    %109 = arith.sitofp %108 : vector<2x16xi32> to vector<2x16xf32>
    %c1_i32 = arith.constant 1 : i32
    %cst_43 = arith.constant dense<0.000000e+00> : vector<2x128xf32>
    %110 = tpu.matmul %77, %2, %cst_43 {dimension_numbers = #tpu.dot_dimension_numbers<[1], [0], [0], [1], [0, 0, 1, 1], [], []>} : vector<2x32xf32>, vector<32x128xf32>, vector<2x128xf32> -> vector<2x128xf32>
    %111 = vector.broadcast %3 : vector<1x128xf32> to vector<2x128xf32>
    %112 = arith.addf %110, %111 : vector<2x128xf32>
    %113 = vector.extract_strided_slice %112 {offsets = [0, 0], sizes = [2, 32], strides = [1, 1]} : vector<2x128xf32> to vector<2x32xf32>
    %114 = vector.extract_strided_slice %112 {offsets = [0, 32], sizes = [2, 96], strides = [1, 1]} : vector<2x128xf32> to vector<2x96xf32>
    %115 = vector.shape_cast %113 : vector<2x32xf32> to vector<2x1x32xf32>
    %116 = vector.broadcast %115 : vector<2x1x32xf32> to vector<2x8x32xf32>
    %117 = arith.addf %116, %1 : vector<2x8x32xf32>
    %118 = math.tanh %117 : vector<2x8x32xf32>
    %119 = vector.shape_cast %4 : vector<1x32xf32> to vector<1x1x32xf32>
    %120 = vector.broadcast %119 : vector<1x1x32xf32> to vector<2x8x32xf32>
    %121 = arith.mulf %118, %120 : vector<2x8x32xf32>
    %cst_44 = arith.constant dense<0.000000e+00> : vector<2x8xf32>
    %122 = vector.multi_reduction <add>, %121, %cst_44 [2] : vector<2x8x32xf32> to vector<2x8xf32>
    %123 = vector.broadcast %6 : f32 to vector<2x8xf32>
    %124 = arith.addf %122, %123 : vector<2x8xf32>
    %cst_45 = arith.constant dense<0xFF800000> : vector<2xf32>
    %125 = vector.multi_reduction <maximumf>, %124, %cst_45 [1] : vector<2x8xf32> to vector<2xf32>
    %126 = vector.shape_cast %125 : vector<2xf32> to vector<2x1xf32>
    %127 = vector.broadcast %126 : vector<2x1xf32> to vector<2x8xf32>
    %128 = arith.subf %124, %127 : vector<2x8xf32>
    %129 = math.exp %128 : vector<2x8xf32>
    %cst_46 = arith.constant dense<0.000000e+00> : vector<2xf32>
    %130 = vector.multi_reduction <add>, %129, %cst_46 [1] : vector<2x8xf32> to vector<2xf32>
    %131 = vector.shape_cast %130 : vector<2xf32> to vector<2x1xf32>
    %132 = tpu.reciprocal %131 {approx = true} : vector<2x1xf32> -> vector<2x1xf32>
    %133 = vector.broadcast %132 : vector<2x1xf32> to vector<2x8xf32>
    %134 = arith.mulf %129, %133 : vector<2x8xf32>
    %135 = vector.shape_cast %134 : vector<2x8xf32> to vector<2x8x1xf32>
    %136 = vector.broadcast %135 : vector<2x8x1xf32> to vector<2x8x32xf32>
    %137 = arith.mulf %136, %0 : vector<2x8x32xf32>
    %cst_47 = arith.constant dense<0.000000e+00> : vector<2x32xf32>
    %138 = vector.multi_reduction <add>, %137, %cst_47 [1] : vector<2x8x32xf32> to vector<2x32xf32>
    %cst_48 = arith.constant dense<0.000000e+00> : vector<2x96xf32>
    %139 = tpu.matmul %109, %7, %cst_48 {dimension_numbers = #tpu.dot_dimension_numbers<[1], [0], [0], [1], [0, 0, 1, 1], [], []>} : vector<2x16xf32>, vector<16x96xf32>, vector<2x96xf32> -> vector<2x96xf32>
    %cst_49 = arith.constant dense<0.000000e+00> : vector<2x96xf32>
    %140 = tpu.matmul %138, %8, %cst_49 {dimension_numbers = #tpu.dot_dimension_numbers<[1], [0], [0], [1], [0, 0, 1, 1], [], []>} : vector<2x32xf32>, vector<32x96xf32>, vector<2x96xf32> -> vector<2x96xf32>
    %141 = arith.addf %139, %140 : vector<2x96xf32>
    %142 = vector.broadcast %9 : vector<1x96xf32> to vector<2x96xf32>
    %143 = arith.addf %141, %142 : vector<2x96xf32>
    %144 = vector.extract_strided_slice %143 {offsets = [0, 0], sizes = [2, 32], strides = [1, 1]} : vector<2x96xf32> to vector<2x32xf32>
    %145 = vector.extract_strided_slice %114 {offsets = [0, 0], sizes = [2, 32], strides = [1, 1]} : vector<2x96xf32> to vector<2x32xf32>
    %146 = arith.addf %144, %145 : vector<2x32xf32>
    %147 = arith.negf %146 : vector<2x32xf32>
    %148 = math.exp %147 : vector<2x32xf32>
    %cst_50 = arith.constant 1.000000e+00 : f32
    %149 = vector.broadcast %cst_50 : f32 to vector<2x32xf32>
    %150 = arith.addf %149, %148 : vector<2x32xf32>
    %151 = arith.divf %149, %150 : vector<2x32xf32>
    %152 = vector.extract_strided_slice %143 {offsets = [0, 32], sizes = [2, 32], strides = [1, 1]} : vector<2x96xf32> to vector<2x32xf32>
    %153 = vector.extract_strided_slice %114 {offsets = [0, 32], sizes = [2, 32], strides = [1, 1]} : vector<2x96xf32> to vector<2x32xf32>
    %154 = arith.addf %152, %153 : vector<2x32xf32>
    %155 = arith.negf %154 : vector<2x32xf32>
    %156 = math.exp %155 : vector<2x32xf32>
    %cst_51 = arith.constant 1.000000e+00 : f32
    %157 = vector.broadcast %cst_51 : f32 to vector<2x32xf32>
    %158 = arith.addf %157, %156 : vector<2x32xf32>
    %159 = arith.divf %157, %158 : vector<2x32xf32>
    %160 = vector.extract_strided_slice %143 {offsets = [0, 64], sizes = [2, 32], strides = [1, 1]} : vector<2x96xf32> to vector<2x32xf32>
    %161 = vector.extract_strided_slice %114 {offsets = [0, 64], sizes = [2, 32], strides = [1, 1]} : vector<2x96xf32> to vector<2x32xf32>
    %162 = arith.mulf %151, %161 : vector<2x32xf32>
    %163 = arith.addf %160, %162 : vector<2x32xf32>
    %164 = math.tanh %163 : vector<2x32xf32>
    %cst_52 = arith.constant 1.000000e+00 : f32
    %165 = vector.broadcast %cst_52 : f32 to vector<2x32xf32>
    %166 = arith.subf %165, %159 : vector<2x32xf32>
    %167 = arith.mulf %166, %164 : vector<2x32xf32>
    %168 = arith.mulf %159, %77 : vector<2x32xf32>
    %169 = arith.addf %167, %168 : vector<2x32xf32>
    %cst_53 = arith.constant dense<0.000000e+00> : vector<2x16xf32>
    %170 = tpu.matmul %169, %10, %cst_53 {dimension_numbers = #tpu.dot_dimension_numbers<[1], [0], [0], [1], [0, 0, 1, 1], [], []>} : vector<2x32xf32>, vector<32x16xf32>, vector<2x16xf32> -> vector<2x16xf32>
    %171 = vector.broadcast %11 : vector<1x16xf32> to vector<2x16xf32>
    %172 = arith.addf %170, %171 : vector<2x16xf32>
    %cst_54 = arith.constant dense<0xFF800000> : vector<2xf32>
    %173 = vector.multi_reduction <maximumf>, %172, %cst_54 [1] : vector<2x16xf32> to vector<2xf32>
    %174 = vector.shape_cast %173 : vector<2xf32> to vector<2x1xf32>
    %175 = vector.broadcast %174 : vector<2x1xf32> to vector<2x16xf32>
    %176 = arith.subf %172, %175 : vector<2x16xf32>
    %177 = math.exp %176 : vector<2x16xf32>
    %cst_55 = arith.constant dense<0.000000e+00> : vector<2xf32>
    %178 = vector.multi_reduction <add>, %177, %cst_55 [1] : vector<2x16xf32> to vector<2xf32>
    %179 = vector.shape_cast %178 : vector<2xf32> to vector<2x1xf32>
    %180 = math.log %179 : vector<2x1xf32>
    %181 = arith.addf %180, %174 : vector<2x1xf32>
    %182 = vector.broadcast %181 : vector<2x1xf32> to vector<2x16xf32>
    %183 = arith.subf %172, %182 : vector<2x16xf32>
    %184 = arith.index_cast %c1_i32 : i32 to index
    %c0_56 = arith.constant 0 : index
    %c0_57 = arith.constant 0 : index
    %185 = vector.load %arg13[%184, %c0_56, %c0_57] : memref<8x2x16xf32, #tpu.memory_space<vmem>>, vector<1x2x16xf32>
    %186 = vector.shape_cast %185 : vector<1x2x16xf32> to vector<2x16xf32>
    %187 = vector.shape_cast %183 : vector<2x16xf32> to vector<1x2x16xf32>
    tpu.vector_store %arg13[%184, %c0_56, %c0_57], %187 {strides = array<i32>} : memref<8x2x16xf32, #tpu.memory_space<vmem>>, vector<1x2x16xf32>,
    %188 = arith.index_cast %c1_i32 : i32 to index
    %c0_58 = arith.constant 0 : index
    %c0_59 = arith.constant 0 : index
    %189 = vector.load %arg14[%188, %c0_58, %c0_59] : memref<8x2x8xf32, #tpu.memory_space<vmem>>, vector<1x2x8xf32>
    %190 = vector.shape_cast %189 : vector<1x2x8xf32> to vector<2x8xf32>
    %191 = vector.shape_cast %134 : vector<2x8xf32> to vector<1x2x8xf32>
    tpu.vector_store %arg14[%188, %c0_58, %c0_59], %191 {strides = array<i32>} : memref<8x2x8xf32, #tpu.memory_space<vmem>>, vector<1x2x8xf32>,
    %192 = vector.broadcast %174 : vector<2x1xf32> to vector<2x16xf32>
    %193 = arith.cmpf oge, %172, %192 : vector<2x16xf32>
    %c16_i32_60 = arith.constant 16 : i32
    %194 = vector.broadcast %c16_i32_60 : i32 to vector<2x16xi32>
    %195 = arith.select %193, %12, %194 : vector<2x16xi1>, vector<2x16xi32>
    %cst_61 = arith.constant dense<2147483647> : vector<2xi32>
    %196 = vector.multi_reduction <minsi>, %195, %cst_61 [1] : vector<2x16xi32> to vector<2xi32>
    %197 = vector.shape_cast %196 : vector<2xi32> to vector<2x1xi32>
    %198 = vector.broadcast %197 : vector<2x1xi32> to vector<2x16xi32>
    %199 = arith.cmpi eq, %12, %198 : vector<2x16xi32>
    %200 = arith.extui %199 : vector<2x16xi1> to vector<2x16xi32>
    %201 = arith.sitofp %200 : vector<2x16xi32> to vector<2x16xf32>
    %c2_i32 = arith.constant 2 : i32
    %cst_62 = arith.constant dense<0.000000e+00> : vector<2x128xf32>
    %202 = tpu.matmul %169, %2, %cst_62 {dimension_numbers = #tpu.dot_dimension_numbers<[1], [0], [0], [1], [0, 0, 1, 1], [], []>} : vector<2x32xf32>, vector<32x128xf32>, vector<2x128xf32> -> vector<2x128xf32>
    %203 = vector.broadcast %3 : vector<1x128xf32> to vector<2x128xf32>
    %204 = arith.addf %202, %203 : vector<2x128xf32>
    %205 = vector.extract_strided_slice %204 {offsets = [0, 0], sizes = [2, 32], strides = [1, 1]} : vector<2x128xf32> to vector<2x32xf32>
    %206 = vector.extract_strided_slice %204 {offsets = [0, 32], sizes = [2, 96], strides = [1, 1]} : vector<2x128xf32> to vector<2x96xf32>
    %207 = vector.shape_cast %205 : vector<2x32xf32> to vector<2x1x32xf32>
    %208 = vector.broadcast %207 : vector<2x1x32xf32> to vector<2x8x32xf32>
    %209 = arith.addf %208, %1 : vector<2x8x32xf32>
    %210 = math.tanh %209 : vector<2x8x32xf32>
    %211 = vector.shape_cast %4 : vector<1x32xf32> to vector<1x1x32xf32>
    %212 = vector.broadcast %211 : vector<1x1x32xf32> to vector<2x8x32xf32>
    %213 = arith.mulf %210, %212 : vector<2x8x32xf32>
    %cst_63 = arith.constant dense<0.000000e+00> : vector<2x8xf32>
    %214 = vector.multi_reduction <add>, %213, %cst_63 [2] : vector<2x8x32xf32> to vector<2x8xf32>
    %215 = vector.broadcast %6 : f32 to vector<2x8xf32>
    %216 = arith.addf %214, %215 : vector<2x8xf32>
    %cst_64 = arith.constant dense<0xFF800000> : vector<2xf32>
    %217 = vector.multi_reduction <maximumf>, %216, %cst_64 [1] : vector<2x8xf32> to vector<2xf32>
    %218 = vector.shape_cast %217 : vector<2xf32> to vector<2x1xf32>
    %219 = vector.broadcast %218 : vector<2x1xf32> to vector<2x8xf32>
    %220 = arith.subf %216, %219 : vector<2x8xf32>
    %221 = math.exp %220 : vector<2x8xf32>
    %cst_65 = arith.constant dense<0.000000e+00> : vector<2xf32>
    %222 = vector.multi_reduction <add>, %221, %cst_65 [1] : vector<2x8xf32> to vector<2xf32>
    %223 = vector.shape_cast %222 : vector<2xf32> to vector<2x1xf32>
    %224 = tpu.reciprocal %223 {approx = true} : vector<2x1xf32> -> vector<2x1xf32>
    %225 = vector.broadcast %224 : vector<2x1xf32> to vector<2x8xf32>
    %226 = arith.mulf %221, %225 : vector<2x8xf32>
    %227 = vector.shape_cast %226 : vector<2x8xf32> to vector<2x8x1xf32>
    %228 = vector.broadcast %227 : vector<2x8x1xf32> to vector<2x8x32xf32>
    %229 = arith.mulf %228, %0 : vector<2x8x32xf32>
    %cst_66 = arith.constant dense<0.000000e+00> : vector<2x32xf32>
    %230 = vector.multi_reduction <add>, %229, %cst_66 [1] : vector<2x8x32xf32> to vector<2x32xf32>
    %cst_67 = arith.constant dense<0.000000e+00> : vector<2x96xf32>
    %231 = tpu.matmul %201, %7, %cst_67 {dimension_numbers = #tpu.dot_dimension_numbers<[1], [0], [0], [1], [0, 0, 1, 1], [], []>} : vector<2x16xf32>, vector<16x96xf32>, vector<2x96xf32> -> vector<2x96xf32>
    %cst_68 = arith.constant dense<0.000000e+00> : vector<2x96xf32>
    %232 = tpu.matmul %230, %8, %cst_68 {dimension_numbers = #tpu.dot_dimension_numbers<[1], [0], [0], [1], [0, 0, 1, 1], [], []>} : vector<2x32xf32>, vector<32x96xf32>, vector<2x96xf32> -> vector<2x96xf32>
    %233 = arith.addf %231, %232 : vector<2x96xf32>
    %234 = vector.broadcast %9 : vector<1x96xf32> to vector<2x96xf32>
    %235 = arith.addf %233, %234 : vector<2x96xf32>
    %236 = vector.extract_strided_slice %235 {offsets = [0, 0], sizes = [2, 32], strides = [1, 1]} : vector<2x96xf32> to vector<2x32xf32>
    %237 = vector.extract_strided_slice %206 {offsets = [0, 0], sizes = [2, 32], strides = [1, 1]} : vector<2x96xf32> to vector<2x32xf32>
    %238 = arith.addf %236, %237 : vector<2x32xf32>
    %239 = arith.negf %238 : vector<2x32xf32>
    %240 = math.exp %239 : vector<2x32xf32>
    %cst_69 = arith.constant 1.000000e+00 : f32
    %241 = vector.broadcast %cst_69 : f32 to vector<2x32xf32>
    %242 = arith.addf %241, %240 : vector<2x32xf32>
    %243 = arith.divf %241, %242 : vector<2x32xf32>
    %244 = vector.extract_strided_slice %235 {offsets = [0, 32], sizes = [2, 32], strides = [1, 1]} : vector<2x96xf32> to vector<2x32xf32>
    %245 = vector.extract_strided_slice %206 {offsets = [0, 32], sizes = [2, 32], strides = [1, 1]} : vector<2x96xf32> to vector<2x32xf32>
    %246 = arith.addf %244, %245 : vector<2x32xf32>
    %247 = arith.negf %246 : vector<2x32xf32>
    %248 = math.exp %247 : vector<2x32xf32>
    %cst_70 = arith.constant 1.000000e+00 : f32
    %249 = vector.broadcast %cst_70 : f32 to vector<2x32xf32>
    %250 = arith.addf %249, %248 : vector<2x32xf32>
    %251 = arith.divf %249, %250 : vector<2x32xf32>
    %252 = vector.extract_strided_slice %235 {offsets = [0, 64], sizes = [2, 32], strides = [1, 1]} : vector<2x96xf32> to vector<2x32xf32>
    %253 = vector.extract_strided_slice %206 {offsets = [0, 64], sizes = [2, 32], strides = [1, 1]} : vector<2x96xf32> to vector<2x32xf32>
    %254 = arith.mulf %243, %253 : vector<2x32xf32>
    %255 = arith.addf %252, %254 : vector<2x32xf32>
    %256 = math.tanh %255 : vector<2x32xf32>
    %cst_71 = arith.constant 1.000000e+00 : f32
    %257 = vector.broadcast %cst_71 : f32 to vector<2x32xf32>
    %258 = arith.subf %257, %251 : vector<2x32xf32>
    %259 = arith.mulf %258, %256 : vector<2x32xf32>
    %260 = arith.mulf %251, %169 : vector<2x32xf32>
    %261 = arith.addf %259, %260 : vector<2x32xf32>
    %cst_72 = arith.constant dense<0.000000e+00> : vector<2x16xf32>
    %262 = tpu.matmul %261, %10, %cst_72 {dimension_numbers = #tpu.dot_dimension_numbers<[1], [0], [0], [1], [0, 0, 1, 1], [], []>} : vector<2x32xf32>, vector<32x16xf32>, vector<2x16xf32> -> vector<2x16xf32>
    %263 = vector.broadcast %11 : vector<1x16xf32> to vector<2x16xf32>
    %264 = arith.addf %262, %263 : vector<2x16xf32>
    %cst_73 = arith.constant dense<0xFF800000> : vector<2xf32>
    %265 = vector.multi_reduction <maximumf>, %264, %cst_73 [1] : vector<2x16xf32> to vector<2xf32>
    %266 = vector.shape_cast %265 : vector<2xf32> to vector<2x1xf32>
    %267 = vector.broadcast %266 : vector<2x1xf32> to vector<2x16xf32>
    %268 = arith.subf %264, %267 : vector<2x16xf32>
    %269 = math.exp %268 : vector<2x16xf32>
    %cst_74 = arith.constant dense<0.000000e+00> : vector<2xf32>
    %270 = vector.multi_reduction <add>, %269, %cst_74 [1] : vector<2x16xf32> to vector<2xf32>
    %271 = vector.shape_cast %270 : vector<2xf32> to vector<2x1xf32>
    %272 = math.log %271 : vector<2x1xf32>
    %273 = arith.addf %272, %266 : vector<2x1xf32>
    %274 = vector.broadcast %273 : vector<2x1xf32> to vector<2x16xf32>
    %275 = arith.subf %264, %274 : vector<2x16xf32>
    %276 = arith.index_cast %c2_i32 : i32 to index
    %c0_75 = arith.constant 0 : index
    %c0_76 = arith.constant 0 : index
    %277 = vector.load %arg13[%276, %c0_75, %c0_76] : memref<8x2x16xf32, #tpu.memory_space<vmem>>, vector<1x2x16xf32>
    %278 = vector.shape_cast %277 : vector<1x2x16xf32> to vector<2x16xf32>
    %279 = vector.shape_cast %275 : vector<2x16xf32> to vector<1x2x16xf32>
    tpu.vector_store %arg13[%276, %c0_75, %c0_76], %279 {strides = array<i32>} : memref<8x2x16xf32, #tpu.memory_space<vmem>>, vector<1x2x16xf32>,
    %280 = arith.index_cast %c2_i32 : i32 to index
    %c0_77 = arith.constant 0 : index
    %c0_78 = arith.constant 0 : index
    %281 = vector.load %arg14[%280, %c0_77, %c0_78] : memref<8x2x8xf32, #tpu.memory_space<vmem>>, vector<1x2x8xf32>
    %282 = vector.shape_cast %281 : vector<1x2x8xf32> to vector<2x8xf32>
    %283 = vector.shape_cast %226 : vector<2x8xf32> to vector<1x2x8xf32>
    tpu.vector_store %arg14[%280, %c0_77, %c0_78], %283 {strides = array<i32>} : memref<8x2x8xf32, #tpu.memory_space<vmem>>, vector<1x2x8xf32>,
    %284 = vector.broadcast %266 : vector<2x1xf32> to vector<2x16xf32>
    %285 = arith.cmpf oge, %264, %284 : vector<2x16xf32>
    %c16_i32_79 = arith.constant 16 : i32
    %286 = vector.broadcast %c16_i32_79 : i32 to vector<2x16xi32>
    %287 = arith.select %285, %12, %286 : vector<2x16xi1>, vector<2x16xi32>
    %cst_80 = arith.constant dense<2147483647> : vector<2xi32>
    %288 = vector.multi_reduction <minsi>, %287, %cst_80 [1] : vector<2x16xi32> to vector<2xi32>
    %289 = vector.shape_cast %288 : vector<2xi32> to vector<2x1xi32>
    %290 = vector.broadcast %289 : vector<2x1xi32> to vector<2x16xi32>
    %291 = arith.cmpi eq, %12, %290 : vector<2x16xi32>
    %292 = arith.extui %291 : vector<2x16xi1> to vector<2x16xi32>
    %293 = arith.sitofp %292 : vector<2x16xi32> to vector<2x16xf32>
    %c3_i32 = arith.constant 3 : i32
    %cst_81 = arith.constant dense<0.000000e+00> : vector<2x128xf32>
    %294 = tpu.matmul %261, %2, %cst_81 {dimension_numbers = #tpu.dot_dimension_numbers<[1], [0], [0], [1], [0, 0, 1, 1], [], []>} : vector<2x32xf32>, vector<32x128xf32>, vector<2x128xf32> -> vector<2x128xf32>
    %295 = vector.broadcast %3 : vector<1x128xf32> to vector<2x128xf32>
    %296 = arith.addf %294, %295 : vector<2x128xf32>
    %297 = vector.extract_strided_slice %296 {offsets = [0, 0], sizes = [2, 32], strides = [1, 1]} : vector<2x128xf32> to vector<2x32xf32>
    %298 = vector.extract_strided_slice %296 {offsets = [0, 32], sizes = [2, 96], strides = [1, 1]} : vector<2x128xf32> to vector<2x96xf32>
    %299 = vector.shape_cast %297 : vector<2x32xf32> to vector<2x1x32xf32>
    %300 = vector.broadcast %299 : vector<2x1x32xf32> to vector<2x8x32xf32>
    %301 = arith.addf %300, %1 : vector<2x8x32xf32>
    %302 = math.tanh %301 : vector<2x8x32xf32>
    %303 = vector.shape_cast %4 : vector<1x32xf32> to vector<1x1x32xf32>
    %304 = vector.broadcast %303 : vector<1x1x32xf32> to vector<2x8x32xf32>
    %305 = arith.mulf %302, %304 : vector<2x8x32xf32>
    %cst_82 = arith.constant dense<0.000000e+00> : vector<2x8xf32>
    %306 = vector.multi_reduction <add>, %305, %cst_82 [2] : vector<2x8x32xf32> to vector<2x8xf32>
    %307 = vector.broadcast %6 : f32 to vector<2x8xf32>
    %308 = arith.addf %306, %307 : vector<2x8xf32>
    %cst_83 = arith.constant dense<0xFF800000> : vector<2xf32>
    %309 = vector.multi_reduction <maximumf>, %308, %cst_83 [1] : vector<2x8xf32> to vector<2xf32>
    %310 = vector.shape_cast %309 : vector<2xf32> to vector<2x1xf32>
    %311 = vector.broadcast %310 : vector<2x1xf32> to vector<2x8xf32>
    %312 = arith.subf %308, %311 : vector<2x8xf32>
    %313 = math.exp %312 : vector<2x8xf32>
    %cst_84 = arith.constant dense<0.000000e+00> : vector<2xf32>
    %314 = vector.multi_reduction <add>, %313, %cst_84 [1] : vector<2x8xf32> to vector<2xf32>
    %315 = vector.shape_cast %314 : vector<2xf32> to vector<2x1xf32>
    %316 = tpu.reciprocal %315 {approx = true} : vector<2x1xf32> -> vector<2x1xf32>
    %317 = vector.broadcast %316 : vector<2x1xf32> to vector<2x8xf32>
    %318 = arith.mulf %313, %317 : vector<2x8xf32>
    %319 = vector.shape_cast %318 : vector<2x8xf32> to vector<2x8x1xf32>
    %320 = vector.broadcast %319 : vector<2x8x1xf32> to vector<2x8x32xf32>
    %321 = arith.mulf %320, %0 : vector<2x8x32xf32>
    %cst_85 = arith.constant dense<0.000000e+00> : vector<2x32xf32>
    %322 = vector.multi_reduction <add>, %321, %cst_85 [1] : vector<2x8x32xf32> to vector<2x32xf32>
    %cst_86 = arith.constant dense<0.000000e+00> : vector<2x96xf32>
    %323 = tpu.matmul %293, %7, %cst_86 {dimension_numbers = #tpu.dot_dimension_numbers<[1], [0], [0], [1], [0, 0, 1, 1], [], []>} : vector<2x16xf32>, vector<16x96xf32>, vector<2x96xf32> -> vector<2x96xf32>
    %cst_87 = arith.constant dense<0.000000e+00> : vector<2x96xf32>
    %324 = tpu.matmul %322, %8, %cst_87 {dimension_numbers = #tpu.dot_dimension_numbers<[1], [0], [0], [1], [0, 0, 1, 1], [], []>} : vector<2x32xf32>, vector<32x96xf32>, vector<2x96xf32> -> vector<2x96xf32>
    %325 = arith.addf %323, %324 : vector<2x96xf32>
    %326 = vector.broadcast %9 : vector<1x96xf32> to vector<2x96xf32>
    %327 = arith.addf %325, %326 : vector<2x96xf32>
    %328 = vector.extract_strided_slice %327 {offsets = [0, 0], sizes = [2, 32], strides = [1, 1]} : vector<2x96xf32> to vector<2x32xf32>
    %329 = vector.extract_strided_slice %298 {offsets = [0, 0], sizes = [2, 32], strides = [1, 1]} : vector<2x96xf32> to vector<2x32xf32>
    %330 = arith.addf %328, %329 : vector<2x32xf32>
    %331 = arith.negf %330 : vector<2x32xf32>
    %332 = math.exp %331 : vector<2x32xf32>
    %cst_88 = arith.constant 1.000000e+00 : f32
    %333 = vector.broadcast %cst_88 : f32 to vector<2x32xf32>
    %334 = arith.addf %333, %332 : vector<2x32xf32>
    %335 = arith.divf %333, %334 : vector<2x32xf32>
    %336 = vector.extract_strided_slice %327 {offsets = [0, 32], sizes = [2, 32], strides = [1, 1]} : vector<2x96xf32> to vector<2x32xf32>
    %337 = vector.extract_strided_slice %298 {offsets = [0, 32], sizes = [2, 32], strides = [1, 1]} : vector<2x96xf32> to vector<2x32xf32>
    %338 = arith.addf %336, %337 : vector<2x32xf32>
    %339 = arith.negf %338 : vector<2x32xf32>
    %340 = math.exp %339 : vector<2x32xf32>
    %cst_89 = arith.constant 1.000000e+00 : f32
    %341 = vector.broadcast %cst_89 : f32 to vector<2x32xf32>
    %342 = arith.addf %341, %340 : vector<2x32xf32>
    %343 = arith.divf %341, %342 : vector<2x32xf32>
    %344 = vector.extract_strided_slice %327 {offsets = [0, 64], sizes = [2, 32], strides = [1, 1]} : vector<2x96xf32> to vector<2x32xf32>
    %345 = vector.extract_strided_slice %298 {offsets = [0, 64], sizes = [2, 32], strides = [1, 1]} : vector<2x96xf32> to vector<2x32xf32>
    %346 = arith.mulf %335, %345 : vector<2x32xf32>
    %347 = arith.addf %344, %346 : vector<2x32xf32>
    %348 = math.tanh %347 : vector<2x32xf32>
    %cst_90 = arith.constant 1.000000e+00 : f32
    %349 = vector.broadcast %cst_90 : f32 to vector<2x32xf32>
    %350 = arith.subf %349, %343 : vector<2x32xf32>
    %351 = arith.mulf %350, %348 : vector<2x32xf32>
    %352 = arith.mulf %343, %261 : vector<2x32xf32>
    %353 = arith.addf %351, %352 : vector<2x32xf32>
    %cst_91 = arith.constant dense<0.000000e+00> : vector<2x16xf32>
    %354 = tpu.matmul %353, %10, %cst_91 {dimension_numbers = #tpu.dot_dimension_numbers<[1], [0], [0], [1], [0, 0, 1, 1], [], []>} : vector<2x32xf32>, vector<32x16xf32>, vector<2x16xf32> -> vector<2x16xf32>
    %355 = vector.broadcast %11 : vector<1x16xf32> to vector<2x16xf32>
    %356 = arith.addf %354, %355 : vector<2x16xf32>
    %cst_92 = arith.constant dense<0xFF800000> : vector<2xf32>
    %357 = vector.multi_reduction <maximumf>, %356, %cst_92 [1] : vector<2x16xf32> to vector<2xf32>
    %358 = vector.shape_cast %357 : vector<2xf32> to vector<2x1xf32>
    %359 = vector.broadcast %358 : vector<2x1xf32> to vector<2x16xf32>
    %360 = arith.subf %356, %359 : vector<2x16xf32>
    %361 = math.exp %360 : vector<2x16xf32>
    %cst_93 = arith.constant dense<0.000000e+00> : vector<2xf32>
    %362 = vector.multi_reduction <add>, %361, %cst_93 [1] : vector<2x16xf32> to vector<2xf32>
    %363 = vector.shape_cast %362 : vector<2xf32> to vector<2x1xf32>
    %364 = math.log %363 : vector<2x1xf32>
    %365 = arith.addf %364, %358 : vector<2x1xf32>
    %366 = vector.broadcast %365 : vector<2x1xf32> to vector<2x16xf32>
    %367 = arith.subf %356, %366 : vector<2x16xf32>
    %368 = arith.index_cast %c3_i32 : i32 to index
    %c0_94 = arith.constant 0 : index
    %c0_95 = arith.constant 0 : index
    %369 = vector.load %arg13[%368, %c0_94, %c0_95] : memref<8x2x16xf32, #tpu.memory_space<vmem>>, vector<1x2x16xf32>
    %370 = vector.shape_cast %369 : vector<1x2x16xf32> to vector<2x16xf32>
    %371 = vector.shape_cast %367 : vector<2x16xf32> to vector<1x2x16xf32>
    tpu.vector_store %arg13[%368, %c0_94, %c0_95], %371 {strides = array<i32>} : memref<8x2x16xf32, #tpu.memory_space<vmem>>, vector<1x2x16xf32>,
    %372 = arith.index_cast %c3_i32 : i32 to index
    %c0_96 = arith.constant 0 : index
    %c0_97 = arith.constant 0 : index
    %373 = vector.load %arg14[%372, %c0_96, %c0_97] : memref<8x2x8xf32, #tpu.memory_space<vmem>>, vector<1x2x8xf32>
    %374 = vector.shape_cast %373 : vector<1x2x8xf32> to vector<2x8xf32>
    %375 = vector.shape_cast %318 : vector<2x8xf32> to vector<1x2x8xf32>
    tpu.vector_store %arg14[%372, %c0_96, %c0_97], %375 {strides = array<i32>} : memref<8x2x8xf32, #tpu.memory_space<vmem>>, vector<1x2x8xf32>,
    %376 = vector.broadcast %358 : vector<2x1xf32> to vector<2x16xf32>
    %377 = arith.cmpf oge, %356, %376 : vector<2x16xf32>
    %c16_i32_98 = arith.constant 16 : i32
    %378 = vector.broadcast %c16_i32_98 : i32 to vector<2x16xi32>
    %379 = arith.select %377, %12, %378 : vector<2x16xi1>, vector<2x16xi32>
    %cst_99 = arith.constant dense<2147483647> : vector<2xi32>
    %380 = vector.multi_reduction <minsi>, %379, %cst_99 [1] : vector<2x16xi32> to vector<2xi32>
    %381 = vector.shape_cast %380 : vector<2xi32> to vector<2x1xi32>
    %382 = vector.broadcast %381 : vector<2x1xi32> to vector<2x16xi32>
    %383 = arith.cmpi eq, %12, %382 : vector<2x16xi32>
    %384 = arith.extui %383 : vector<2x16xi1> to vector<2x16xi32>
    %385 = arith.sitofp %384 : vector<2x16xi32> to vector<2x16xf32>
    %c4_i32 = arith.constant 4 : i32
    %cst_100 = arith.constant dense<0.000000e+00> : vector<2x128xf32>
    %386 = tpu.matmul %353, %2, %cst_100 {dimension_numbers = #tpu.dot_dimension_numbers<[1], [0], [0], [1], [0, 0, 1, 1], [], []>} : vector<2x32xf32>, vector<32x128xf32>, vector<2x128xf32> -> vector<2x128xf32>
    %387 = vector.broadcast %3 : vector<1x128xf32> to vector<2x128xf32>
    %388 = arith.addf %386, %387 : vector<2x128xf32>
    %389 = vector.extract_strided_slice %388 {offsets = [0, 0], sizes = [2, 32], strides = [1, 1]} : vector<2x128xf32> to vector<2x32xf32>
    %390 = vector.extract_strided_slice %388 {offsets = [0, 32], sizes = [2, 96], strides = [1, 1]} : vector<2x128xf32> to vector<2x96xf32>
    %391 = vector.shape_cast %389 : vector<2x32xf32> to vector<2x1x32xf32>
    %392 = vector.broadcast %391 : vector<2x1x32xf32> to vector<2x8x32xf32>
    %393 = arith.addf %392, %1 : vector<2x8x32xf32>
    %394 = math.tanh %393 : vector<2x8x32xf32>
    %395 = vector.shape_cast %4 : vector<1x32xf32> to vector<1x1x32xf32>
    %396 = vector.broadcast %395 : vector<1x1x32xf32> to vector<2x8x32xf32>
    %397 = arith.mulf %394, %396 : vector<2x8x32xf32>
    %cst_101 = arith.constant dense<0.000000e+00> : vector<2x8xf32>
    %398 = vector.multi_reduction <add>, %397, %cst_101 [2] : vector<2x8x32xf32> to vector<2x8xf32>
    %399 = vector.broadcast %6 : f32 to vector<2x8xf32>
    %400 = arith.addf %398, %399 : vector<2x8xf32>
    %cst_102 = arith.constant dense<0xFF800000> : vector<2xf32>
    %401 = vector.multi_reduction <maximumf>, %400, %cst_102 [1] : vector<2x8xf32> to vector<2xf32>
    %402 = vector.shape_cast %401 : vector<2xf32> to vector<2x1xf32>
    %403 = vector.broadcast %402 : vector<2x1xf32> to vector<2x8xf32>
    %404 = arith.subf %400, %403 : vector<2x8xf32>
    %405 = math.exp %404 : vector<2x8xf32>
    %cst_103 = arith.constant dense<0.000000e+00> : vector<2xf32>
    %406 = vector.multi_reduction <add>, %405, %cst_103 [1] : vector<2x8xf32> to vector<2xf32>
    %407 = vector.shape_cast %406 : vector<2xf32> to vector<2x1xf32>
    %408 = tpu.reciprocal %407 {approx = true} : vector<2x1xf32> -> vector<2x1xf32>
    %409 = vector.broadcast %408 : vector<2x1xf32> to vector<2x8xf32>
    %410 = arith.mulf %405, %409 : vector<2x8xf32>
    %411 = vector.shape_cast %410 : vector<2x8xf32> to vector<2x8x1xf32>
    %412 = vector.broadcast %411 : vector<2x8x1xf32> to vector<2x8x32xf32>
    %413 = arith.mulf %412, %0 : vector<2x8x32xf32>
    %cst_104 = arith.constant dense<0.000000e+00> : vector<2x32xf32>
    %414 = vector.multi_reduction <add>, %413, %cst_104 [1] : vector<2x8x32xf32> to vector<2x32xf32>
    %cst_105 = arith.constant dense<0.000000e+00> : vector<2x96xf32>
    %415 = tpu.matmul %385, %7, %cst_105 {dimension_numbers = #tpu.dot_dimension_numbers<[1], [0], [0], [1], [0, 0, 1, 1], [], []>} : vector<2x16xf32>, vector<16x96xf32>, vector<2x96xf32> -> vector<2x96xf32>
    %cst_106 = arith.constant dense<0.000000e+00> : vector<2x96xf32>
    %416 = tpu.matmul %414, %8, %cst_106 {dimension_numbers = #tpu.dot_dimension_numbers<[1], [0], [0], [1], [0, 0, 1, 1], [], []>} : vector<2x32xf32>, vector<32x96xf32>, vector<2x96xf32> -> vector<2x96xf32>
    %417 = arith.addf %415, %416 : vector<2x96xf32>
    %418 = vector.broadcast %9 : vector<1x96xf32> to vector<2x96xf32>
    %419 = arith.addf %417, %418 : vector<2x96xf32>
    %420 = vector.extract_strided_slice %419 {offsets = [0, 0], sizes = [2, 32], strides = [1, 1]} : vector<2x96xf32> to vector<2x32xf32>
    %421 = vector.extract_strided_slice %390 {offsets = [0, 0], sizes = [2, 32], strides = [1, 1]} : vector<2x96xf32> to vector<2x32xf32>
    %422 = arith.addf %420, %421 : vector<2x32xf32>
    %423 = arith.negf %422 : vector<2x32xf32>
    %424 = math.exp %423 : vector<2x32xf32>
    %cst_107 = arith.constant 1.000000e+00 : f32
    %425 = vector.broadcast %cst_107 : f32 to vector<2x32xf32>
    %426 = arith.addf %425, %424 : vector<2x32xf32>
    %427 = arith.divf %425, %426 : vector<2x32xf32>
    %428 = vector.extract_strided_slice %419 {offsets = [0, 32], sizes = [2, 32], strides = [1, 1]} : vector<2x96xf32> to vector<2x32xf32>
    %429 = vector.extract_strided_slice %390 {offsets = [0, 32], sizes = [2, 32], strides = [1, 1]} : vector<2x96xf32> to vector<2x32xf32>
    %430 = arith.addf %428, %429 : vector<2x32xf32>
    %431 = arith.negf %430 : vector<2x32xf32>
    %432 = math.exp %431 : vector<2x32xf32>
    %cst_108 = arith.constant 1.000000e+00 : f32
    %433 = vector.broadcast %cst_108 : f32 to vector<2x32xf32>
    %434 = arith.addf %433, %432 : vector<2x32xf32>
    %435 = arith.divf %433, %434 : vector<2x32xf32>
    %436 = vector.extract_strided_slice %419 {offsets = [0, 64], sizes = [2, 32], strides = [1, 1]} : vector<2x96xf32> to vector<2x32xf32>
    %437 = vector.extract_strided_slice %390 {offsets = [0, 64], sizes = [2, 32], strides = [1, 1]} : vector<2x96xf32> to vector<2x32xf32>
    %438 = arith.mulf %427, %437 : vector<2x32xf32>
    %439 = arith.addf %436, %438 : vector<2x32xf32>
    %440 = math.tanh %439 : vector<2x32xf32>
    %cst_109 = arith.constant 1.000000e+00 : f32
    %441 = vector.broadcast %cst_109 : f32 to vector<2x32xf32>
    %442 = arith.subf %441, %435 : vector<2x32xf32>
    %443 = arith.mulf %442, %440 : vector<2x32xf32>
    %444 = arith.mulf %435, %353 : vector<2x32xf32>
    %445 = arith.addf %443, %444 : vector<2x32xf32>
    %cst_110 = arith.constant dense<0.000000e+00> : vector<2x16xf32>
    %446 = tpu.matmul %445, %10, %cst_110 {dimension_numbers = #tpu.dot_dimension_numbers<[1], [0], [0], [1], [0, 0, 1, 1], [], []>} : vector<2x32xf32>, vector<32x16xf32>, vector<2x16xf32> -> vector<2x16xf32>
    %447 = vector.broadcast %11 : vector<1x16xf32> to vector<2x16xf32>
    %448 = arith.addf %446, %447 : vector<2x16xf32>
    %cst_111 = arith.constant dense<0xFF800000> : vector<2xf32>
    %449 = vector.multi_reduction <maximumf>, %448, %cst_111 [1] : vector<2x16xf32> to vector<2xf32>
    %450 = vector.shape_cast %449 : vector<2xf32> to vector<2x1xf32>
    %451 = vector.broadcast %450 : vector<2x1xf32> to vector<2x16xf32>
    %452 = arith.subf %448, %451 : vector<2x16xf32>
    %453 = math.exp %452 : vector<2x16xf32>
    %cst_112 = arith.constant dense<0.000000e+00> : vector<2xf32>
    %454 = vector.multi_reduction <add>, %453, %cst_112 [1] : vector<2x16xf32> to vector<2xf32>
    %455 = vector.shape_cast %454 : vector<2xf32> to vector<2x1xf32>
    %456 = math.log %455 : vector<2x1xf32>
    %457 = arith.addf %456, %450 : vector<2x1xf32>
    %458 = vector.broadcast %457 : vector<2x1xf32> to vector<2x16xf32>
    %459 = arith.subf %448, %458 : vector<2x16xf32>
    %460 = arith.index_cast %c4_i32 : i32 to index
    %c0_113 = arith.constant 0 : index
    %c0_114 = arith.constant 0 : index
    %461 = vector.load %arg13[%460, %c0_113, %c0_114] : memref<8x2x16xf32, #tpu.memory_space<vmem>>, vector<1x2x16xf32>
    %462 = vector.shape_cast %461 : vector<1x2x16xf32> to vector<2x16xf32>
    %463 = vector.shape_cast %459 : vector<2x16xf32> to vector<1x2x16xf32>
    tpu.vector_store %arg13[%460, %c0_113, %c0_114], %463 {strides = array<i32>} : memref<8x2x16xf32, #tpu.memory_space<vmem>>, vector<1x2x16xf32>,
    %464 = arith.index_cast %c4_i32 : i32 to index
    %c0_115 = arith.constant 0 : index
    %c0_116 = arith.constant 0 : index
    %465 = vector.load %arg14[%464, %c0_115, %c0_116] : memref<8x2x8xf32, #tpu.memory_space<vmem>>, vector<1x2x8xf32>
    %466 = vector.shape_cast %465 : vector<1x2x8xf32> to vector<2x8xf32>
    %467 = vector.shape_cast %410 : vector<2x8xf32> to vector<1x2x8xf32>
    tpu.vector_store %arg14[%464, %c0_115, %c0_116], %467 {strides = array<i32>} : memref<8x2x8xf32, #tpu.memory_space<vmem>>, vector<1x2x8xf32>,
    %468 = vector.broadcast %450 : vector<2x1xf32> to vector<2x16xf32>
    %469 = arith.cmpf oge, %448, %468 : vector<2x16xf32>
    %c16_i32_117 = arith.constant 16 : i32
    %470 = vector.broadcast %c16_i32_117 : i32 to vector<2x16xi32>
    %471 = arith.select %469, %12, %470 : vector<2x16xi1>, vector<2x16xi32>
    %cst_118 = arith.constant dense<2147483647> : vector<2xi32>
    %472 = vector.multi_reduction <minsi>, %471, %cst_118 [1] : vector<2x16xi32> to vector<2xi32>
    %473 = vector.shape_cast %472 : vector<2xi32> to vector<2x1xi32>
    %474 = vector.broadcast %473 : vector<2x1xi32> to vector<2x16xi32>
    %475 = arith.cmpi eq, %12, %474 : vector<2x16xi32>
    %476 = arith.extui %475 : vector<2x16xi1> to vector<2x16xi32>
    %477 = arith.sitofp %476 : vector<2x16xi32> to vector<2x16xf32>
    %c5_i32 = arith.constant 5 : i32
    %cst_119 = arith.constant dense<0.000000e+00> : vector<2x128xf32>
    %478 = tpu.matmul %445, %2, %cst_119 {dimension_numbers = #tpu.dot_dimension_numbers<[1], [0], [0], [1], [0, 0, 1, 1], [], []>} : vector<2x32xf32>, vector<32x128xf32>, vector<2x128xf32> -> vector<2x128xf32>
    %479 = vector.broadcast %3 : vector<1x128xf32> to vector<2x128xf32>
    %480 = arith.addf %478, %479 : vector<2x128xf32>
    %481 = vector.extract_strided_slice %480 {offsets = [0, 0], sizes = [2, 32], strides = [1, 1]} : vector<2x128xf32> to vector<2x32xf32>
    %482 = vector.extract_strided_slice %480 {offsets = [0, 32], sizes = [2, 96], strides = [1, 1]} : vector<2x128xf32> to vector<2x96xf32>
    %483 = vector.shape_cast %481 : vector<2x32xf32> to vector<2x1x32xf32>
    %484 = vector.broadcast %483 : vector<2x1x32xf32> to vector<2x8x32xf32>
    %485 = arith.addf %484, %1 : vector<2x8x32xf32>
    %486 = math.tanh %485 : vector<2x8x32xf32>
    %487 = vector.shape_cast %4 : vector<1x32xf32> to vector<1x1x32xf32>
    %488 = vector.broadcast %487 : vector<1x1x32xf32> to vector<2x8x32xf32>
    %489 = arith.mulf %486, %488 : vector<2x8x32xf32>
    %cst_120 = arith.constant dense<0.000000e+00> : vector<2x8xf32>
    %490 = vector.multi_reduction <add>, %489, %cst_120 [2] : vector<2x8x32xf32> to vector<2x8xf32>
    %491 = vector.broadcast %6 : f32 to vector<2x8xf32>
    %492 = arith.addf %490, %491 : vector<2x8xf32>
    %cst_121 = arith.constant dense<0xFF800000> : vector<2xf32>
    %493 = vector.multi_reduction <maximumf>, %492, %cst_121 [1] : vector<2x8xf32> to vector<2xf32>
    %494 = vector.shape_cast %493 : vector<2xf32> to vector<2x1xf32>
    %495 = vector.broadcast %494 : vector<2x1xf32> to vector<2x8xf32>
    %496 = arith.subf %492, %495 : vector<2x8xf32>
    %497 = math.exp %496 : vector<2x8xf32>
    %cst_122 = arith.constant dense<0.000000e+00> : vector<2xf32>
    %498 = vector.multi_reduction <add>, %497, %cst_122 [1] : vector<2x8xf32> to vector<2xf32>
    %499 = vector.shape_cast %498 : vector<2xf32> to vector<2x1xf32>
    %500 = tpu.reciprocal %499 {approx = true} : vector<2x1xf32> -> vector<2x1xf32>
    %501 = vector.broadcast %500 : vector<2x1xf32> to vector<2x8xf32>
    %502 = arith.mulf %497, %501 : vector<2x8xf32>
    %503 = vector.shape_cast %502 : vector<2x8xf32> to vector<2x8x1xf32>
    %504 = vector.broadcast %503 : vector<2x8x1xf32> to vector<2x8x32xf32>
    %505 = arith.mulf %504, %0 : vector<2x8x32xf32>
    %cst_123 = arith.constant dense<0.000000e+00> : vector<2x32xf32>
    %506 = vector.multi_reduction <add>, %505, %cst_123 [1] : vector<2x8x32xf32> to vector<2x32xf32>
    %cst_124 = arith.constant dense<0.000000e+00> : vector<2x96xf32>
    %507 = tpu.matmul %477, %7, %cst_124 {dimension_numbers = #tpu.dot_dimension_numbers<[1], [0], [0], [1], [0, 0, 1, 1], [], []>} : vector<2x16xf32>, vector<16x96xf32>, vector<2x96xf32> -> vector<2x96xf32>
    %cst_125 = arith.constant dense<0.000000e+00> : vector<2x96xf32>
    %508 = tpu.matmul %506, %8, %cst_125 {dimension_numbers = #tpu.dot_dimension_numbers<[1], [0], [0], [1], [0, 0, 1, 1], [], []>} : vector<2x32xf32>, vector<32x96xf32>, vector<2x96xf32> -> vector<2x96xf32>
    %509 = arith.addf %507, %508 : vector<2x96xf32>
    %510 = vector.broadcast %9 : vector<1x96xf32> to vector<2x96xf32>
    %511 = arith.addf %509, %510 : vector<2x96xf32>
    %512 = vector.extract_strided_slice %511 {offsets = [0, 0], sizes = [2, 32], strides = [1, 1]} : vector<2x96xf32> to vector<2x32xf32>
    %513 = vector.extract_strided_slice %482 {offsets = [0, 0], sizes = [2, 32], strides = [1, 1]} : vector<2x96xf32> to vector<2x32xf32>
    %514 = arith.addf %512, %513 : vector<2x32xf32>
    %515 = arith.negf %514 : vector<2x32xf32>
    %516 = math.exp %515 : vector<2x32xf32>
    %cst_126 = arith.constant 1.000000e+00 : f32
    %517 = vector.broadcast %cst_126 : f32 to vector<2x32xf32>
    %518 = arith.addf %517, %516 : vector<2x32xf32>
    %519 = arith.divf %517, %518 : vector<2x32xf32>
    %520 = vector.extract_strided_slice %511 {offsets = [0, 32], sizes = [2, 32], strides = [1, 1]} : vector<2x96xf32> to vector<2x32xf32>
    %521 = vector.extract_strided_slice %482 {offsets = [0, 32], sizes = [2, 32], strides = [1, 1]} : vector<2x96xf32> to vector<2x32xf32>
    %522 = arith.addf %520, %521 : vector<2x32xf32>
    %523 = arith.negf %522 : vector<2x32xf32>
    %524 = math.exp %523 : vector<2x32xf32>
    %cst_127 = arith.constant 1.000000e+00 : f32
    %525 = vector.broadcast %cst_127 : f32 to vector<2x32xf32>
    %526 = arith.addf %525, %524 : vector<2x32xf32>
    %527 = arith.divf %525, %526 : vector<2x32xf32>
    %528 = vector.extract_strided_slice %511 {offsets = [0, 64], sizes = [2, 32], strides = [1, 1]} : vector<2x96xf32> to vector<2x32xf32>
    %529 = vector.extract_strided_slice %482 {offsets = [0, 64], sizes = [2, 32], strides = [1, 1]} : vector<2x96xf32> to vector<2x32xf32>
    %530 = arith.mulf %519, %529 : vector<2x32xf32>
    %531 = arith.addf %528, %530 : vector<2x32xf32>
    %532 = math.tanh %531 : vector<2x32xf32>
    %cst_128 = arith.constant 1.000000e+00 : f32
    %533 = vector.broadcast %cst_128 : f32 to vector<2x32xf32>
    %534 = arith.subf %533, %527 : vector<2x32xf32>
    %535 = arith.mulf %534, %532 : vector<2x32xf32>
    %536 = arith.mulf %527, %445 : vector<2x32xf32>
    %537 = arith.addf %535, %536 : vector<2x32xf32>
    %cst_129 = arith.constant dense<0.000000e+00> : vector<2x16xf32>
    %538 = tpu.matmul %537, %10, %cst_129 {dimension_numbers = #tpu.dot_dimension_numbers<[1], [0], [0], [1], [0, 0, 1, 1], [], []>} : vector<2x32xf32>, vector<32x16xf32>, vector<2x16xf32> -> vector<2x16xf32>
    %539 = vector.broadcast %11 : vector<1x16xf32> to vector<2x16xf32>
    %540 = arith.addf %538, %539 : vector<2x16xf32>
    %cst_130 = arith.constant dense<0xFF800000> : vector<2xf32>
    %541 = vector.multi_reduction <maximumf>, %540, %cst_130 [1] : vector<2x16xf32> to vector<2xf32>
    %542 = vector.shape_cast %541 : vector<2xf32> to vector<2x1xf32>
    %543 = vector.broadcast %542 : vector<2x1xf32> to vector<2x16xf32>
    %544 = arith.subf %540, %543 : vector<2x16xf32>
    %545 = math.exp %544 : vector<2x16xf32>
    %cst_131 = arith.constant dense<0.000000e+00> : vector<2xf32>
    %546 = vector.multi_reduction <add>, %545, %cst_131 [1] : vector<2x16xf32> to vector<2xf32>
    %547 = vector.shape_cast %546 : vector<2xf32> to vector<2x1xf32>
    %548 = math.log %547 : vector<2x1xf32>
    %549 = arith.addf %548, %542 : vector<2x1xf32>
    %550 = vector.broadcast %549 : vector<2x1xf32> to vector<2x16xf32>
    %551 = arith.subf %540, %550 : vector<2x16xf32>
    %552 = arith.index_cast %c5_i32 : i32 to index
    %c0_132 = arith.constant 0 : index
    %c0_133 = arith.constant 0 : index
    %553 = vector.load %arg13[%552, %c0_132, %c0_133] : memref<8x2x16xf32, #tpu.memory_space<vmem>>, vector<1x2x16xf32>
    %554 = vector.shape_cast %553 : vector<1x2x16xf32> to vector<2x16xf32>
    %555 = vector.shape_cast %551 : vector<2x16xf32> to vector<1x2x16xf32>
    tpu.vector_store %arg13[%552, %c0_132, %c0_133], %555 {strides = array<i32>} : memref<8x2x16xf32, #tpu.memory_space<vmem>>, vector<1x2x16xf32>,
    %556 = arith.index_cast %c5_i32 : i32 to index
    %c0_134 = arith.constant 0 : index
    %c0_135 = arith.constant 0 : index
    %557 = vector.load %arg14[%556, %c0_134, %c0_135] : memref<8x2x8xf32, #tpu.memory_space<vmem>>, vector<1x2x8xf32>
    %558 = vector.shape_cast %557 : vector<1x2x8xf32> to vector<2x8xf32>
    %559 = vector.shape_cast %502 : vector<2x8xf32> to vector<1x2x8xf32>
    tpu.vector_store %arg14[%556, %c0_134, %c0_135], %559 {strides = array<i32>} : memref<8x2x8xf32, #tpu.memory_space<vmem>>, vector<1x2x8xf32>,
    %560 = vector.broadcast %542 : vector<2x1xf32> to vector<2x16xf32>
    %561 = arith.cmpf oge, %540, %560 : vector<2x16xf32>
    %c16_i32_136 = arith.constant 16 : i32
    %562 = vector.broadcast %c16_i32_136 : i32 to vector<2x16xi32>
    %563 = arith.select %561, %12, %562 : vector<2x16xi1>, vector<2x16xi32>
    %cst_137 = arith.constant dense<2147483647> : vector<2xi32>
    %564 = vector.multi_reduction <minsi>, %563, %cst_137 [1] : vector<2x16xi32> to vector<2xi32>
    %565 = vector.shape_cast %564 : vector<2xi32> to vector<2x1xi32>
    %566 = vector.broadcast %565 : vector<2x1xi32> to vector<2x16xi32>
    %567 = arith.cmpi eq, %12, %566 : vector<2x16xi32>
    %568 = arith.extui %567 : vector<2x16xi1> to vector<2x16xi32>
    %569 = arith.sitofp %568 : vector<2x16xi32> to vector<2x16xf32>
    %c6_i32 = arith.constant 6 : i32
    %cst_138 = arith.constant dense<0.000000e+00> : vector<2x128xf32>
    %570 = tpu.matmul %537, %2, %cst_138 {dimension_numbers = #tpu.dot_dimension_numbers<[1], [0], [0], [1], [0, 0, 1, 1], [], []>} : vector<2x32xf32>, vector<32x128xf32>, vector<2x128xf32> -> vector<2x128xf32>
    %571 = vector.broadcast %3 : vector<1x128xf32> to vector<2x128xf32>
    %572 = arith.addf %570, %571 : vector<2x128xf32>
    %573 = vector.extract_strided_slice %572 {offsets = [0, 0], sizes = [2, 32], strides = [1, 1]} : vector<2x128xf32> to vector<2x32xf32>
    %574 = vector.extract_strided_slice %572 {offsets = [0, 32], sizes = [2, 96], strides = [1, 1]} : vector<2x128xf32> to vector<2x96xf32>
    %575 = vector.shape_cast %573 : vector<2x32xf32> to vector<2x1x32xf32>
    %576 = vector.broadcast %575 : vector<2x1x32xf32> to vector<2x8x32xf32>
    %577 = arith.addf %576, %1 : vector<2x8x32xf32>
    %578 = math.tanh %577 : vector<2x8x32xf32>
    %579 = vector.shape_cast %4 : vector<1x32xf32> to vector<1x1x32xf32>
    %580 = vector.broadcast %579 : vector<1x1x32xf32> to vector<2x8x32xf32>
    %581 = arith.mulf %578, %580 : vector<2x8x32xf32>
    %cst_139 = arith.constant dense<0.000000e+00> : vector<2x8xf32>
    %582 = vector.multi_reduction <add>, %581, %cst_139 [2] : vector<2x8x32xf32> to vector<2x8xf32>
    %583 = vector.broadcast %6 : f32 to vector<2x8xf32>
    %584 = arith.addf %582, %583 : vector<2x8xf32>
    %cst_140 = arith.constant dense<0xFF800000> : vector<2xf32>
    %585 = vector.multi_reduction <maximumf>, %584, %cst_140 [1] : vector<2x8xf32> to vector<2xf32>
    %586 = vector.shape_cast %585 : vector<2xf32> to vector<2x1xf32>
    %587 = vector.broadcast %586 : vector<2x1xf32> to vector<2x8xf32>
    %588 = arith.subf %584, %587 : vector<2x8xf32>
    %589 = math.exp %588 : vector<2x8xf32>
    %cst_141 = arith.constant dense<0.000000e+00> : vector<2xf32>
    %590 = vector.multi_reduction <add>, %589, %cst_141 [1] : vector<2x8xf32> to vector<2xf32>
    %591 = vector.shape_cast %590 : vector<2xf32> to vector<2x1xf32>
    %592 = tpu.reciprocal %591 {approx = true} : vector<2x1xf32> -> vector<2x1xf32>
    %593 = vector.broadcast %592 : vector<2x1xf32> to vector<2x8xf32>
    %594 = arith.mulf %589, %593 : vector<2x8xf32>
    %595 = vector.shape_cast %594 : vector<2x8xf32> to vector<2x8x1xf32>
    %596 = vector.broadcast %595 : vector<2x8x1xf32> to vector<2x8x32xf32>
    %597 = arith.mulf %596, %0 : vector<2x8x32xf32>
    %cst_142 = arith.constant dense<0.000000e+00> : vector<2x32xf32>
    %598 = vector.multi_reduction <add>, %597, %cst_142 [1] : vector<2x8x32xf32> to vector<2x32xf32>
    %cst_143 = arith.constant dense<0.000000e+00> : vector<2x96xf32>
    %599 = tpu.matmul %569, %7, %cst_143 {dimension_numbers = #tpu.dot_dimension_numbers<[1], [0], [0], [1], [0, 0, 1, 1], [], []>} : vector<2x16xf32>, vector<16x96xf32>, vector<2x96xf32> -> vector<2x96xf32>
    %cst_144 = arith.constant dense<0.000000e+00> : vector<2x96xf32>
    %600 = tpu.matmul %598, %8, %cst_144 {dimension_numbers = #tpu.dot_dimension_numbers<[1], [0], [0], [1], [0, 0, 1, 1], [], []>} : vector<2x32xf32>, vector<32x96xf32>, vector<2x96xf32> -> vector<2x96xf32>
    %601 = arith.addf %599, %600 : vector<2x96xf32>
    %602 = vector.broadcast %9 : vector<1x96xf32> to vector<2x96xf32>
    %603 = arith.addf %601, %602 : vector<2x96xf32>
    %604 = vector.extract_strided_slice %603 {offsets = [0, 0], sizes = [2, 32], strides = [1, 1]} : vector<2x96xf32> to vector<2x32xf32>
    %605 = vector.extract_strided_slice %574 {offsets = [0, 0], sizes = [2, 32], strides = [1, 1]} : vector<2x96xf32> to vector<2x32xf32>
    %606 = arith.addf %604, %605 : vector<2x32xf32>
    %607 = arith.negf %606 : vector<2x32xf32>
    %608 = math.exp %607 : vector<2x32xf32>
    %cst_145 = arith.constant 1.000000e+00 : f32
    %609 = vector.broadcast %cst_145 : f32 to vector<2x32xf32>
    %610 = arith.addf %609, %608 : vector<2x32xf32>
    %611 = arith.divf %609, %610 : vector<2x32xf32>
    %612 = vector.extract_strided_slice %603 {offsets = [0, 32], sizes = [2, 32], strides = [1, 1]} : vector<2x96xf32> to vector<2x32xf32>
    %613 = vector.extract_strided_slice %574 {offsets = [0, 32], sizes = [2, 32], strides = [1, 1]} : vector<2x96xf32> to vector<2x32xf32>
    %614 = arith.addf %612, %613 : vector<2x32xf32>
    %615 = arith.negf %614 : vector<2x32xf32>
    %616 = math.exp %615 : vector<2x32xf32>
    %cst_146 = arith.constant 1.000000e+00 : f32
    %617 = vector.broadcast %cst_146 : f32 to vector<2x32xf32>
    %618 = arith.addf %617, %616 : vector<2x32xf32>
    %619 = arith.divf %617, %618 : vector<2x32xf32>
    %620 = vector.extract_strided_slice %603 {offsets = [0, 64], sizes = [2, 32], strides = [1, 1]} : vector<2x96xf32> to vector<2x32xf32>
    %621 = vector.extract_strided_slice %574 {offsets = [0, 64], sizes = [2, 32], strides = [1, 1]} : vector<2x96xf32> to vector<2x32xf32>
    %622 = arith.mulf %611, %621 : vector<2x32xf32>
    %623 = arith.addf %620, %622 : vector<2x32xf32>
    %624 = math.tanh %623 : vector<2x32xf32>
    %cst_147 = arith.constant 1.000000e+00 : f32
    %625 = vector.broadcast %cst_147 : f32 to vector<2x32xf32>
    %626 = arith.subf %625, %619 : vector<2x32xf32>
    %627 = arith.mulf %626, %624 : vector<2x32xf32>
    %628 = arith.mulf %619, %537 : vector<2x32xf32>
    %629 = arith.addf %627, %628 : vector<2x32xf32>
    %cst_148 = arith.constant dense<0.000000e+00> : vector<2x16xf32>
    %630 = tpu.matmul %629, %10, %cst_148 {dimension_numbers = #tpu.dot_dimension_numbers<[1], [0], [0], [1], [0, 0, 1, 1], [], []>} : vector<2x32xf32>, vector<32x16xf32>, vector<2x16xf32> -> vector<2x16xf32>
    %631 = vector.broadcast %11 : vector<1x16xf32> to vector<2x16xf32>
    %632 = arith.addf %630, %631 : vector<2x16xf32>
    %cst_149 = arith.constant dense<0xFF800000> : vector<2xf32>
    %633 = vector.multi_reduction <maximumf>, %632, %cst_149 [1] : vector<2x16xf32> to vector<2xf32>
    %634 = vector.shape_cast %633 : vector<2xf32> to vector<2x1xf32>
    %635 = vector.broadcast %634 : vector<2x1xf32> to vector<2x16xf32>
    %636 = arith.subf %632, %635 : vector<2x16xf32>
    %637 = math.exp %636 : vector<2x16xf32>
    %cst_150 = arith.constant dense<0.000000e+00> : vector<2xf32>
    %638 = vector.multi_reduction <add>, %637, %cst_150 [1] : vector<2x16xf32> to vector<2xf32>
    %639 = vector.shape_cast %638 : vector<2xf32> to vector<2x1xf32>
    %640 = math.log %639 : vector<2x1xf32>
    %641 = arith.addf %640, %634 : vector<2x1xf32>
    %642 = vector.broadcast %641 : vector<2x1xf32> to vector<2x16xf32>
    %643 = arith.subf %632, %642 : vector<2x16xf32>
    %644 = arith.index_cast %c6_i32 : i32 to index
    %c0_151 = arith.constant 0 : index
    %c0_152 = arith.constant 0 : index
    %645 = vector.load %arg13[%644, %c0_151, %c0_152] : memref<8x2x16xf32, #tpu.memory_space<vmem>>, vector<1x2x16xf32>
    %646 = vector.shape_cast %645 : vector<1x2x16xf32> to vector<2x16xf32>
    %647 = vector.shape_cast %643 : vector<2x16xf32> to vector<1x2x16xf32>
    tpu.vector_store %arg13[%644, %c0_151, %c0_152], %647 {strides = array<i32>} : memref<8x2x16xf32, #tpu.memory_space<vmem>>, vector<1x2x16xf32>,
    %648 = arith.index_cast %c6_i32 : i32 to index
    %c0_153 = arith.constant 0 : index
    %c0_154 = arith.constant 0 : index
    %649 = vector.load %arg14[%648, %c0_153, %c0_154] : memref<8x2x8xf32, #tpu.memory_space<vmem>>, vector<1x2x8xf32>
    %650 = vector.shape_cast %649 : vector<1x2x8xf32> to vector<2x8xf32>
    %651 = vector.shape_cast %594 : vector<2x8xf32> to vector<1x2x8xf32>
    tpu.vector_store %arg14[%648, %c0_153, %c0_154], %651 {strides = array<i32>} : memref<8x2x8xf32, #tpu.memory_space<vmem>>, vector<1x2x8xf32>,
    %652 = vector.broadcast %634 : vector<2x1xf32> to vector<2x16xf32>
    %653 = arith.cmpf oge, %632, %652 : vector<2x16xf32>
    %c16_i32_155 = arith.constant 16 : i32
    %654 = vector.broadcast %c16_i32_155 : i32 to vector<2x16xi32>
    %655 = arith.select %653, %12, %654 : vector<2x16xi1>, vector<2x16xi32>
    %cst_156 = arith.constant dense<2147483647> : vector<2xi32>
    %656 = vector.multi_reduction <minsi>, %655, %cst_156 [1] : vector<2x16xi32> to vector<2xi32>
    %657 = vector.shape_cast %656 : vector<2xi32> to vector<2x1xi32>
    %658 = vector.broadcast %657 : vector<2x1xi32> to vector<2x16xi32>
    %659 = arith.cmpi eq, %12, %658 : vector<2x16xi32>
    %660 = arith.extui %659 : vector<2x16xi1> to vector<2x16xi32>
    %661 = arith.sitofp %660 : vector<2x16xi32> to vector<2x16xf32>
    %c7_i32 = arith.constant 7 : i32
    %cst_157 = arith.constant dense<0.000000e+00> : vector<2x128xf32>
    %662 = tpu.matmul %629, %2, %cst_157 {dimension_numbers = #tpu.dot_dimension_numbers<[1], [0], [0], [1], [0, 0, 1, 1], [], []>} : vector<2x32xf32>, vector<32x128xf32>, vector<2x128xf32> -> vector<2x128xf32>
    %663 = vector.broadcast %3 : vector<1x128xf32> to vector<2x128xf32>
    %664 = arith.addf %662, %663 : vector<2x128xf32>
    %665 = vector.extract_strided_slice %664 {offsets = [0, 0], sizes = [2, 32], strides = [1, 1]} : vector<2x128xf32> to vector<2x32xf32>
    %666 = vector.extract_strided_slice %664 {offsets = [0, 32], sizes = [2, 96], strides = [1, 1]} : vector<2x128xf32> to vector<2x96xf32>
    %667 = vector.shape_cast %665 : vector<2x32xf32> to vector<2x1x32xf32>
    %668 = vector.broadcast %667 : vector<2x1x32xf32> to vector<2x8x32xf32>
    %669 = arith.addf %668, %1 : vector<2x8x32xf32>
    %670 = math.tanh %669 : vector<2x8x32xf32>
    %671 = vector.shape_cast %4 : vector<1x32xf32> to vector<1x1x32xf32>
    %672 = vector.broadcast %671 : vector<1x1x32xf32> to vector<2x8x32xf32>
    %673 = arith.mulf %670, %672 : vector<2x8x32xf32>
    %cst_158 = arith.constant dense<0.000000e+00> : vector<2x8xf32>
    %674 = vector.multi_reduction <add>, %673, %cst_158 [2] : vector<2x8x32xf32> to vector<2x8xf32>
    %675 = vector.broadcast %6 : f32 to vector<2x8xf32>
    %676 = arith.addf %674, %675 : vector<2x8xf32>
    %cst_159 = arith.constant dense<0xFF800000> : vector<2xf32>
    %677 = vector.multi_reduction <maximumf>, %676, %cst_159 [1] : vector<2x8xf32> to vector<2xf32>
    %678 = vector.shape_cast %677 : vector<2xf32> to vector<2x1xf32>
    %679 = vector.broadcast %678 : vector<2x1xf32> to vector<2x8xf32>
    %680 = arith.subf %676, %679 : vector<2x8xf32>
    %681 = math.exp %680 : vector<2x8xf32>
    %cst_160 = arith.constant dense<0.000000e+00> : vector<2xf32>
    %682 = vector.multi_reduction <add>, %681, %cst_160 [1] : vector<2x8xf32> to vector<2xf32>
    %683 = vector.shape_cast %682 : vector<2xf32> to vector<2x1xf32>
    %684 = tpu.reciprocal %683 {approx = true} : vector<2x1xf32> -> vector<2x1xf32>
    %685 = vector.broadcast %684 : vector<2x1xf32> to vector<2x8xf32>
    %686 = arith.mulf %681, %685 : vector<2x8xf32>
    %687 = vector.shape_cast %686 : vector<2x8xf32> to vector<2x8x1xf32>
    %688 = vector.broadcast %687 : vector<2x8x1xf32> to vector<2x8x32xf32>
    %689 = arith.mulf %688, %0 : vector<2x8x32xf32>
    %cst_161 = arith.constant dense<0.000000e+00> : vector<2x32xf32>
    %690 = vector.multi_reduction <add>, %689, %cst_161 [1] : vector<2x8x32xf32> to vector<2x32xf32>
    %cst_162 = arith.constant dense<0.000000e+00> : vector<2x96xf32>
    %691 = tpu.matmul %661, %7, %cst_162 {dimension_numbers = #tpu.dot_dimension_numbers<[1], [0], [0], [1], [0, 0, 1, 1], [], []>} : vector<2x16xf32>, vector<16x96xf32>, vector<2x96xf32> -> vector<2x96xf32>
    %cst_163 = arith.constant dense<0.000000e+00> : vector<2x96xf32>
    %692 = tpu.matmul %690, %8, %cst_163 {dimension_numbers = #tpu.dot_dimension_numbers<[1], [0], [0], [1], [0, 0, 1, 1], [], []>} : vector<2x32xf32>, vector<32x96xf32>, vector<2x96xf32> -> vector<2x96xf32>
    %693 = arith.addf %691, %692 : vector<2x96xf32>
    %694 = vector.broadcast %9 : vector<1x96xf32> to vector<2x96xf32>
    %695 = arith.addf %693, %694 : vector<2x96xf32>
    %696 = vector.extract_strided_slice %695 {offsets = [0, 0], sizes = [2, 32], strides = [1, 1]} : vector<2x96xf32> to vector<2x32xf32>
    %697 = vector.extract_strided_slice %666 {offsets = [0, 0], sizes = [2, 32], strides = [1, 1]} : vector<2x96xf32> to vector<2x32xf32>
    %698 = arith.addf %696, %697 : vector<2x32xf32>
    %699 = arith.negf %698 : vector<2x32xf32>
    %700 = math.exp %699 : vector<2x32xf32>
    %cst_164 = arith.constant 1.000000e+00 : f32
    %701 = vector.broadcast %cst_164 : f32 to vector<2x32xf32>
    %702 = arith.addf %701, %700 : vector<2x32xf32>
    %703 = arith.divf %701, %702 : vector<2x32xf32>
    %704 = vector.extract_strided_slice %695 {offsets = [0, 32], sizes = [2, 32], strides = [1, 1]} : vector<2x96xf32> to vector<2x32xf32>
    %705 = vector.extract_strided_slice %666 {offsets = [0, 32], sizes = [2, 32], strides = [1, 1]} : vector<2x96xf32> to vector<2x32xf32>
    %706 = arith.addf %704, %705 : vector<2x32xf32>
    %707 = arith.negf %706 : vector<2x32xf32>
    %708 = math.exp %707 : vector<2x32xf32>
    %cst_165 = arith.constant 1.000000e+00 : f32
    %709 = vector.broadcast %cst_165 : f32 to vector<2x32xf32>
    %710 = arith.addf %709, %708 : vector<2x32xf32>
    %711 = arith.divf %709, %710 : vector<2x32xf32>
    %712 = vector.extract_strided_slice %695 {offsets = [0, 64], sizes = [2, 32], strides = [1, 1]} : vector<2x96xf32> to vector<2x32xf32>
    %713 = vector.extract_strided_slice %666 {offsets = [0, 64], sizes = [2, 32], strides = [1, 1]} : vector<2x96xf32> to vector<2x32xf32>
    %714 = arith.mulf %703, %713 : vector<2x32xf32>
    %715 = arith.addf %712, %714 : vector<2x32xf32>
    %716 = math.tanh %715 : vector<2x32xf32>
    %cst_166 = arith.constant 1.000000e+00 : f32
    %717 = vector.broadcast %cst_166 : f32 to vector<2x32xf32>
    %718 = arith.subf %717, %711 : vector<2x32xf32>
    %719 = arith.mulf %718, %716 : vector<2x32xf32>
    %720 = arith.mulf %711, %629 : vector<2x32xf32>
    %721 = arith.addf %719, %720 : vector<2x32xf32>
    %cst_167 = arith.constant dense<0.000000e+00> : vector<2x16xf32>
    %722 = tpu.matmul %721, %10, %cst_167 {dimension_numbers = #tpu.dot_dimension_numbers<[1], [0], [0], [1], [0, 0, 1, 1], [], []>} : vector<2x32xf32>, vector<32x16xf32>, vector<2x16xf32> -> vector<2x16xf32>
    %723 = vector.broadcast %11 : vector<1x16xf32> to vector<2x16xf32>
    %724 = arith.addf %722, %723 : vector<2x16xf32>
    %cst_168 = arith.constant dense<0xFF800000> : vector<2xf32>
    %725 = vector.multi_reduction <maximumf>, %724, %cst_168 [1] : vector<2x16xf32> to vector<2xf32>
    %726 = vector.shape_cast %725 : vector<2xf32> to vector<2x1xf32>
    %727 = vector.broadcast %726 : vector<2x1xf32> to vector<2x16xf32>
    %728 = arith.subf %724, %727 : vector<2x16xf32>
    %729 = math.exp %728 : vector<2x16xf32>
    %cst_169 = arith.constant dense<0.000000e+00> : vector<2xf32>
    %730 = vector.multi_reduction <add>, %729, %cst_169 [1] : vector<2x16xf32> to vector<2xf32>
    %731 = vector.shape_cast %730 : vector<2xf32> to vector<2x1xf32>
    %732 = math.log %731 : vector<2x1xf32>
    %733 = arith.addf %732, %726 : vector<2x1xf32>
    %734 = vector.broadcast %733 : vector<2x1xf32> to vector<2x16xf32>
    %735 = arith.subf %724, %734 : vector<2x16xf32>
    %736 = arith.index_cast %c7_i32 : i32 to index
    %c0_170 = arith.constant 0 : index
    %c0_171 = arith.constant 0 : index
    %737 = vector.load %arg13[%736, %c0_170, %c0_171] : memref<8x2x16xf32, #tpu.memory_space<vmem>>, vector<1x2x16xf32>
    %738 = vector.shape_cast %737 : vector<1x2x16xf32> to vector<2x16xf32>
    %739 = vector.shape_cast %735 : vector<2x16xf32> to vector<1x2x16xf32>
    tpu.vector_store %arg13[%736, %c0_170, %c0_171], %739 {strides = array<i32>} : memref<8x2x16xf32, #tpu.memory_space<vmem>>, vector<1x2x16xf32>,
    %740 = arith.index_cast %c7_i32 : i32 to index
    %c0_172 = arith.constant 0 : index
    %c0_173 = arith.constant 0 : index
    %741 = vector.load %arg14[%740, %c0_172, %c0_173] : memref<8x2x8xf32, #tpu.memory_space<vmem>>, vector<1x2x8xf32>
    %742 = vector.shape_cast %741 : vector<1x2x8xf32> to vector<2x8xf32>
    %743 = vector.shape_cast %686 : vector<2x8xf32> to vector<1x2x8xf32>
    tpu.vector_store %arg14[%740, %c0_172, %c0_173], %743 {strides = array<i32>} : memref<8x2x8xf32, #tpu.memory_space<vmem>>, vector<1x2x8xf32>,
    %744 = vector.broadcast %726 : vector<2x1xf32> to vector<2x16xf32>
    %745 = arith.cmpf oge, %724, %744 : vector<2x16xf32>
    %c16_i32_174 = arith.constant 16 : i32
    %746 = vector.broadcast %c16_i32_174 : i32 to vector<2x16xi32>
    %747 = arith.select %745, %12, %746 : vector<2x16xi1>, vector<2x16xi32>
    %cst_175 = arith.constant dense<2147483647> : vector<2xi32>
    %748 = vector.multi_reduction <minsi>, %747, %cst_175 [1] : vector<2x16xi32> to vector<2xi32>
    %749 = vector.shape_cast %748 : vector<2xi32> to vector<2x1xi32>
    %750 = vector.broadcast %749 : vector<2x1xi32> to vector<2x16xi32>
    %751 = arith.cmpi eq, %12, %750 : vector<2x16xi32>
    %752 = arith.extui %751 : vector<2x16xi1> to vector<2x16xi32>
    %753 = arith.sitofp %752 : vector<2x16xi32> to vector<2x16xf32>
    %c8_i32 = arith.constant 8 : i32
    %c0_176 = arith.constant 0 : index
    %c0_177 = arith.constant 0 : index
    %754 = vector.load %arg15[%c0_176, %c0_177] : memref<2x32xf32, #tpu.memory_space<vmem>>, vector<2x32xf32>
    tpu.vector_store %arg15[%c0_176, %c0_177], %721 {strides = array<i32>} : memref<2x32xf32, #tpu.memory_space<vmem>>, vector<2x32xf32>,
    return
  }
  func.func @transform_0(%arg0: i32) -> (i32, i32, i32) {
    %c0_i32 = arith.constant 0 : i32
    %c0_i32_0 = arith.constant 0 : i32
    %c0_i32_1 = arith.constant 0 : i32
    %c0_i32_2 = arith.constant 0 : i32
    return %c0_i32, %c0_i32_0, %c0_i32_1 : i32, i32, i32
  }
  func.func @transform_1(%arg0: i32) -> (i32, i32, i32) {
    %c0_i32 = arith.constant 0 : i32
    %c0_i32_0 = arith.constant 0 : i32
    %c0_i32_1 = arith.constant 0 : i32
    %c0_i32_2 = arith.constant 0 : i32
    return %c0_i32, %c0_i32_0, %c0_i32_1 : i32, i32, i32
  }
  func.func @transform_2(%arg0: i32) -> (i32, i32) {
    %c0_i32 = arith.constant 0 : i32
    %c0_i32_0 = arith.constant 0 : i32
    %c0_i32_1 = arith.constant 0 : i32
    return %c0_i32, %c0_i32_0 : i32, i32
  }
  func.func @transform_3(%arg0: i32) -> (i32, i32) {
    %c0_i32 = arith.constant 0 : i32
    %c0_i32_0 = arith.constant 0 : i32
    %c0_i32_1 = arith.constant 0 : i32
    return %c0_i32, %c0_i32_0 : i32, i32
  }
  func.func @transform_4(%arg0: i32) -> (i32, i32) {
    %c0_i32 = arith.constant 0 : i32
    %c0_i32_0 = arith.constant 0 : i32
    %c0_i32_1 = arith.constant 0 : i32
    return %c0_i32, %c0_i32_0 : i32, i32
  }
  func.func @transform_5(%arg0: i32) -> (i32, i32) {
    %c0_i32 = arith.constant 0 : i32
    %c0_i32_0 = arith.constant 0 : i32
    %c0_i32_1 = arith.constant 0 : i32
    return %c0_i32, %c0_i32_0 : i32, i32
  }
  func.func @transform_6(%arg0: i32) -> (i32, i32) {
    %c0_i32 = arith.constant 0 : i32
    %c0_i32_0 = arith.constant 0 : i32
    %c0_i32_1 = arith.constant 0 : i32
    return %c0_i32, %c0_i32_0 : i32, i32
  }
  func.func @transform_7(%arg0: i32) -> (i32, i32) {
    %c0_i32 = arith.constant 0 : i32
    %c0_i32_0 = arith.constant 0 : i32
    %c0_i32_1 = arith.constant 0 : i32
    return %c0_i32, %c0_i32_0 : i32, i32
  }
  func.func @transform_8(%arg0: i32) -> (i32, i32) {
    %c0_i32 = arith.constant 0 : i32
    %c0_i32_0 = arith.constant 0 : i32
    %c0_i32_1 = arith.constant 0 : i32
    return %c0_i32, %c0_i32_0 : i32, i32
  }
  func.func @transform_9(%arg0: i32) -> (i32, i32) {
    %c0_i32 = arith.constant 0 : i32
    %c0_i32_0 = arith.constant 0 : i32
    %c0_i32_1 = arith.constant 0 : i32
    return %c0_i32, %c0_i32_0 : i32, i32
  }
  func.func @transform_10(%arg0: i32) -> (i32, i32) {
    %c0_i32 = arith.constant 0 : i32
    %c0_i32_0 = arith.constant 0 : i32
    %c0_i32_1 = arith.constant 0 : i32
    return %c0_i32, %c0_i32_0 : i32, i32
  }
  func.func @transform_11(%arg0: i32) -> (i32, i32) {
    %c0_i32 = arith.constant 0 : i32
    %c0_i32_0 = arith.constant 0 : i32
    %c0_i32_1 = arith.constant 0 : i32
    return %c0_i32, %c0_i32_0 : i32, i32
  }
  func.func @transform_12(%arg0: i32) -> (i32, i32, i32) {
    %c0_i32 = arith.constant 0 : i32
    %c0_i32_0 = arith.constant 0 : i32
    %c0_i32_1 = arith.constant 0 : i32
    %c0_i32_2 = arith.constant 0 : i32
    return %c0_i32, %c0_i32_0, %c0_i32_1 : i32, i32, i32
  }
  func.func @transform_13(%arg0: i32) -> (i32, i32, i32) {
    %c0_i32 = arith.constant 0 : i32
    %c0_i32_0 = arith.constant 0 : i32
    %c0_i32_1 = arith.constant 0 : i32
    %c0_i32_2 = arith.constant 0 : i32
    return %c0_i32, %c0_i32_0, %c0_i32_1 : i32, i32, i32
  }
  func.func @transform_14(%arg0: i32) -> (i32, i32) {
    %c0_i32 = arith.constant 0 : i32
    %c0_i32_0 = arith.constant 0 : i32
    %c0_i32_1 = arith.constant 0 : i32
    return %c0_i32, %c0_i32_0 : i32, i32
  }
}

</mosaic_0001>

<bundles_post_ra>
// kernel: attention_decoder_forward.1
= control target key start
LH: loop header
LB: loop body
LE: loop exit
PB: predicated region body
PF: predicated region fallthrough
CT: control target
= control target key end

     0   :  { %s6128_s0 = inlined_call_operand.vmem [shape: f32[2,8,32], index: 0, kind: input, shape index: {}]   ;;  %s6129_s1 = inlined_call_operand.vmem [shape: f32[2,8,32], index: 1, kind: input, shape index: {}]   ;;  %s6130_s2 = inlined_call_operand.vmem [shape: f32[2,32], index: 2, kind: input, shape index: {}]   ;;  %s6131_s3 = inlined_call_operand.vmem [shape: f32[32,128], index: 3, kind: input, shape index: {}]   ;;  %s6132_s4 = inlined_call_operand.vmem [shape: f32[1,128], index: 4, kind: input, shape index: {}]   ;;  %s6133_s5 = inlined_call_operand.vmem [shape: f32[1,32], index: 5, kind: input, shape index: {}]   ;;  %s6134_s6 = inlined_call_operand.<no memory space> [shape: f32[1,1], index: 6, kind: input, shape index: {}]   ;;  %s6135_s7 = inlined_call_operand.vmem [shape: f32[16,96], index: 7, kind: input, shape index: {}]   ;;  %s6136_s8 = inlined_call_operand.vmem [shape: f32[32,96], index: 8, kind: input, shape index: {}]   ;;  %s6137_s9 = inlined_call_operand.vmem [shape: f32[1,96], index: 9, kind: input, shape index: {}]   ;;  %s6138_s10 = inlined_call_operand.vmem [shape: f32[32,16], index: 10, kind: input, shape index: {}]   ;;  %s6139_s11 = inlined_call_operand.vmem [shape: f32[1,16], index: 11, kind: input, shape index: {}]   ;;  %s6140_s12 = inlined_call_operand.vmem [shape: f32[8,2,16], index: 12, kind: output, shape index: {0}]   ;;  %s6141_s13 = inlined_call_operand.vmem [shape: f32[8,2,8], index: 13, kind: output, shape index: {1}]   ;;  %s6142_s14 = inlined_call_operand.hbm [shape: f32[2,32], index: 14, kind: output, shape index: {2}]  }
   0x1   :  { %v20_v0 = vstv %s6134_s6 }
   0x2   :  { %21 = vst [vmem:[#allocation2] sm:$0x1] %v20_v0 }
   0x3   :  { %v51_v1 = vld [vmem:[%s6131_s3] sm:$0xff]  ;;  %v52_v2 = vld [vmem:[%s6131_s3 + $0x8] sm:$0xff]  ;;  %v53_v3 = vld [vmem:[%s6131_s3 + $0x10] sm:$0xff]  ;;  %v5091_v4 = vmov 0.0|0.0   ;;  %vm5092_vm0 = vmmov 0   ;;  %v5093_v7 = vmov 0.0  }
   0x4   :  { %4718 = vmatprep.subr.bf16.mxu0 %v5091_v4  ;;  %v5188_v5 = vpack.c.bf16 %v52_v2, %v51_v1  ;;  %v54_v6 = vld [vmem:[%s6131_s3 + $0x18] sm:$0xff]  ;;  %4406 = vmatprep.mubr.msk.f32.mxu0 %vm5092_vm0, %v5093_v7 }
   0x5   :  { %4724 = vmatprep.subr.bf16.mxu1 %v5091_v4  ;;  %4417 = vmatprep.mubr.msk.f32.mxu1 %vm5092_vm0, %v5093_v7 }
   0x6   :  { %22 = vsyncpa [#allocation4], 0  ;;  %4720 = vmatpush3.bf16.msra.mxu0 %v5188_v5  ;;  %v5199_v8 = vpack.c.bf16 %v54_v6, %v53_v3  ;;  %v5206_v9 = vld [vmem:[%s6130_s2] sm:$0x3]  ;;  %vm83_vm1 = vcmask 261120   ;;  %v71_v11 = vlaneseq  ;;  %v5242_v28 = vld [vmem:[%s6129_s1 + $0x8] sm:$0xff] }
   0x7   :  { %4721 = vmatprep.subr.bf16.mxu0 %v5091_v4  ;;  %v5094_v12 = vmov 1966171168   ;;  %v5220_v16 = vld [vmem:[%s6132_s4] ss:$0 sm:$0xff]  ;;  %vm221_vm2 = vcmask 1041409   ;;  %vm224_vm3 = vcmask 58368  }
   0x8   :  { %v159_v13 = vunpack.c.l.s4 %v5094_v12  ;;  %v162_v15 = vshrl.u32 %v71_v11, 7  ;;  %v5235_v25 = vld [vmem:[%s6129_s1] sm:$0xff]  ;;  %v5256_v39 = vand.u32 127, %v71_v11  ;;  %v5095_v50 = vmov 0   ;;  %s5096_s15 = smov 96   ;;  %s5097_s16 = smov 32  }
   0x9   :  { %v57_v10 = vld [vmem:[#allocation2] sm:$0x1]  ;;  %4898 = vset.pattern.permute.xlu0 %v5095_v50  ;;  %4897 = vset.pattern.permute.xlu1 %v5095_v50  ;;  %v60_v50 = vld [vmem:[%s6135_s7 + $0x8] sm:$0xff]  ;;  %vm381_vm5 = vcmask 130048   ;;  %s5098_s18 = smov 64   ;;  %vm574_vm6 = vcmask 123904  }
   0xa   :  { %4723 = vmatpush3.bf16.msra.mxu0 %v5199_v8  ;;  %4886 = vpush %v57_v10  ;;  %v160_v14 = vunpack.c.0.s8 %v159_v13  ;;  %v5229_v22 = vsub.s32 0, %v162_v15  ;;  %v5250_v32 = vld [vmem:[%s6133_s5] ss:$0 sm:$0xff]  ;;  %v5261_v42 = vsub.s32 %v5256_v39, %v162_v15  ;;  %v5269_v51 = vsub.s32 1, %v162_v15 }
   0xb   :  { %4739 = vmatprep.subr.bf16.mxu0 %v5091_v4  ;;  %vm74_vm4 = vcmp.eq.s32.totalorder %v5256_v39, 0 }
   0xc   :  { %v5222_v17 = vsub.s32 %v160_v14, %v162_v15  ;;  %v61_v14 = vld [vmem:[%s6136_s8] sm:$0xff]  ;;  %v62_v15 = vld [vmem:[%s6136_s8 + $0x8] sm:$0xff] }
   0xd   :  { %4407 = vmatmul.mubr.msk.f32.vlgmr.msra.gmra.mrb[0].mxu0 %vm83_vm1, %v5206_v9 }
   0xe   :  { %4741 = vmatpush3.bf16.msra.mxu0 %v5188_v5  ;;  %4446 = vmatprep.mubr.msk.f32.mxu0 %vm5092_vm0, %v5093_v7 }
   0xf   :  { %4742 = vmatprep.subr.bf16.mxu0 %v5091_v4 }
  0x12   :  { %4744 = vmatpush3.bf16.msra.mxu0 %v5199_v8 }
  0x13   :  { %4751 = vmatprep.subr.bf16.mxu0 %v5091_v4 }
  0x3b   :  { %s4887_s30 = spop %4886 }
  0x3c   :  { %v5258_v40 = vstv %s4887_s30 }
  0xe0   :  { %v153_v18 = vpop.f32.mrb[0].mxu0 }
  0xe1   :  { %v5225_v19 = vadd.f32 %v5220_v16, %v153_v18  ;;  %v4408_v20 = vpop.f32.mrb[1].mxu0  ;;  %v5289_v18 = vpack.c.bf16 %v62_v15, %v61_v14 }
  0xe2   :  { %v63_v20 = vld [vmem:[%s6136_s8 + $0x10] sm:$0xff] }
  0xe3   :  { %v164_v21 = vrot.slane %v5225_v19, %v5222_v17  ;;  %4726 = vmatpush3.bf16.msra.mxu1 %v5289_v18 }
  0xe4   :  { %4727 = vmatprep.subr.bf16.mxu1 %v5091_v4 }
  0xe5   :  { %v165_v23 = vcombine.high %v164_v21, %v164_v21  ;;  %v172_v24 = vrot.slane %v164_v21, %v5222_v17 }
  0xe7   :  { %v179_v26 = vrot.slane %v165_v23, %v5222_v17  ;;  %v183_v27 = vrot.slane %v172_v24, %v5229_v22  ;;  %v5306_v23 = vld [vmem:[%s6128_s0] sm:$0xff] }
  0xe9   :  { %v187_v29 = vrot.slane %v179_v26, %v5229_v22  ;;  %v190_v30 = vadd.f32 %v183_v27, %v5235_v25  ;;  %v5312_v27 = vld [vmem:[%s6128_s0 + $0x8] sm:$0xff] }
  0xeb   :  { %v191_v31 = vadd.f32 %v187_v29, %v5242_v28  ;;  %4899 = vtanh.f32 %v190_v30 }
  0xed   :  { %4901 = vtanh.f32 %v191_v31 }
  0xf5   :  { %v4900_v33 = vpop.eup %4899 }
  0xf6   :  { %v200_v34 = vmul.f32 %v4900_v33, %v5250_v32 }
  0xf7   :  { %v4902_v35 = vpop.eup %4901 }
  0xf8   :  { %v202_v36 = vsel %vm83_vm1, %v200_v34, 0.0  ;;  %v201_v37 = vmul.f32 %v4902_v35, %v5250_v32 }
  0xf9   :  { %203 = vadd.xlane.f32.xlu0 %v202_v36 }
  0xfa   :  { %v205_v38 = vsel %vm83_vm1, %v201_v37, 0.0 }
  0xfd   :  { %206 = vadd.xlane.f32.xlu0 %v205_v38 }
 0x186   :  { %v204_v41 = vpop.xlane.xlu0 %203 }
 0x187   :  { %v209_v43 = vadd.f32 %v5258_v40, %v204_v41 }
 0x189   :  { %v216_v46 = vrot.slane %v209_v43, %v5261_v42 }
 0x18a   :  { %v207_v44 = vpop.xlane.xlu0 %206 }
 0x18b   :  { %v210_v45 = vadd.f32 %v5258_v40, %v207_v44 }
 0x18d   :  { %v220_v47 = vrot.slane %v210_v45, %v5261_v42 }
 0x18f   :  { %v222_v48 = vsel %vm221_vm2, %v220_v47, %v216_v46 }
 0x190   :  { %v225_v49 = vsel %vm224_vm3, %v222_v48, -inf }
 0x191   :  { %226 = vmax.xlane.f32.xlu1 %v225_v49  ;;  %v59_v49 = vld [vmem:[%s6135_s7] sm:$0xff] }
 0x21e   :  { %v227_v52 = vpop.xlane.xlu1 %226 }
 0x21f   :  { %v232_v53 = vrot.slane %v227_v52, %v5229_v22  ;;  %v236_v54 = vrot.slane %v227_v52, %v5269_v51 }
 0x221   :  { %v239_v55 = vsub.f32 %v209_v43, %v232_v53  ;;  %v240_v56 = vsub.f32 %v210_v45, %v236_v54 }
 0x223   :  { %v241_v57 = vmul.f32 1.442695, %v239_v55  ;;  %v243_v58 = vmul.f32 1.442695, %v240_v56  ;;  %v5330_v55 = vpack.c.bf16 %v60_v50, %v59_v49 }
 0x225   :  { %4903 = vpow2.f32 %v241_v57  ;;  %v4188_v57 = vsel %vm74_vm4, 1.0, %v5093_v7 }
 0x226   :  { %4905 = vpow2.f32 %v243_v58 }
 0x22f   :  { %v4904_v59 = vpop.eup %4903 }
 0x230   :  { %v4906_v60 = vpop.eup %4905  ;;  %248 = vperm.xlu1 %4897, %v4904_v59  }
 0x231   :  { %251 = vperm.xlu0 %4898, %v4906_v60  }
 0x2af   :  { %v249_v61 = vpop.permute.xlu1 %248 }
 0x2b0   :  { %v252_v62 = vpop.permute.xlu0 %251  ;;  %v256_v63 = vrot.slane %v249_v61, %v5261_v42 }
 0x2b1   :  { %v260_v0 = vrot.slane %v252_v62, %v5261_v42 }
 0x2b3   :  { %v261_v1 = vsel %vm221_vm2, %v260_v0, %v256_v63 }
 0x2b4   :  { %v263_v2 = vsel %vm224_vm3, %v261_v1, 0.0 }
 0x2b5   :  { %264 = vadd.xlane.f32.xlu1 %v263_v2 }
 0x2c6   :  { %462 = vrot.lane.b32.xlu1 %v5225_v19, %s5096_s15 }
 0x342   :  { %v265_v3 = vpop.xlane.xlu1 %264 }
 0x343   :  { %4907 = vrcp.f32 %v265_v3 }
 0x346   :  { %v463_v1 = vpop.permute.xlu1 %462 }
 0x34d   :  { %v4908_v6 = vpop.eup %4907 }
 0x34e   :  { %v271_v10 = vrot.slane %v4908_v6, %v5229_v22  ;;  %v275_v12 = vrot.slane %v4908_v6, %v5269_v51 }
 0x350   :  { %v278_v11 = vmul.f32 %v4904_v59, %v271_v10  ;;  %v279_v13 = vmul.f32 %v4906_v60, %v275_v12  ;;  %v5346_v60 = vld [vmem:[%s6137_s9] ss:$0 sm:$0xff] }
 0x352   :  { %282 = vperm.xlu0 %4898, %v278_v11  }
 0x356   :  { %287 = vperm.xlu0 %4898, %v279_v13  }
 0x35a   :  { %472 = vrot.lane.b32.xlu0 %v5225_v19, %s5097_s16  ;;  %v64_v19 = vld [vmem:[%s6136_s8 + $0x18] sm:$0xff] }
 0x35b   :  { %v5299_v21 = vpack.c.bf16 %v64_v19, %v63_v20  ;;  %v66_v20 = vld [vmem:[%s6138_s10] sm:$0xff]  ;;  %v67_v19 = vld [vmem:[%s6138_s10 + $0x8] sm:$0xff] }
 0x35d   :  { %4729 = vmatpush3.bf16.msra.mxu1 %v5299_v21 }
 0x35e   :  { %4730 = vmatprep.subr.bf16.mxu1 %v5091_v4 }
 0x3d1   :  { %v283_v24 = vpop.permute.xlu0 %282 }
 0x3d2   :  { %v290_v26 = vmul.f32 %v283_v24, %v5306_v23  ;;  %v592_v33 = vrot.slane %v283_v24, %v5261_v42  ;;  %v68_v24 = vld [vmem:[%s6138_s10 + $0x10] sm:$0xff] }
 0x3d4   :  { %v292_v29 = vsel %vm83_vm1, %v290_v26, 0.0  ;;  %v5359_v26 = vpack.c.bf16 %v67_v19, %v66_v20 }
 0x3d5   :  { %v293_v30 = vrot.slane %v292_v29, 4  ;;  %v288_v31 = vpop.permute.xlu0 %287 }
 0x3d6   :  { %v291_v34 = vmul.f32 %v288_v31, %v5312_v27  ;;  %v596_v35 = vrot.slane %v288_v31, %v5261_v42 }
 0x3d7   :  { %v294_v36 = vadd.f32 %v293_v30, %v292_v29  ;;  %v69_v29 = vld [vmem:[%s6138_s10 + $0x18] sm:$0xff] }
 0x3d8   :  { %v299_v37 = vsel %vm83_vm1, %v291_v34, 0.0  ;;  %v597_v38 = vsel %vm221_vm2, %v596_v35, %v592_v33  ;;  %v5365_v30 = vpack.c.bf16 %v69_v29, %v68_v24 }
 0x3d9   :  { %v295_v41 = vrot.slane %v294_v36, 2  ;;  %v300_v43 = vrot.slane %v299_v37, 4  ;;  %599 = vst.msk [vmem:[%s6141_s13] sm:$0x3] %vm224_vm3, %v597_v38  ;;  %v473_v12 = vpop.permute.xlu0 %472 }
 0x3db   :  { %v296_v44 = vadd.f32 %v295_v41, %v294_v36  ;;  %v301_v45 = vadd.f32 %v300_v43, %v299_v37 }
 0x3dd   :  { %v302_v46 = vrot.slane %v301_v45, 2  ;;  %v297_v48 = vrot.slane %v296_v44, 1 }
 0x3df   :  { %v303_v47 = vadd.f32 %v302_v46, %v301_v45  ;;  %v298_v53 = vadd.f32 %v297_v48, %v296_v44 }
 0x3e1   :  { %v304_v52 = vrot.slane %v303_v47, 1 }
 0x3e3   :  { %v305_v54 = vadd.f32 %v304_v52, %v303_v47 }
 0x3e5   :  { %v308_v56 = vsel %vm221_vm2, %v305_v54, %v298_v53 }
 0x3e6   :  { %4418 = vmatmul.mubr.msk.f32.vlgmr.msra.gmra.mrb[0].mxu1 %vm83_vm1, %v308_v56 }
 0x3e7   :  { %4732 = vmatpush3.bf16.msra.mxu1 %v5330_v55  ;;  %4424 = vmatprep.mubr.msk.f32.mxu1 %vm5092_vm0, %v5093_v7 }
 0x3e8   :  { %4733 = vmatprep.subr.bf16.mxu1 %v5091_v4 }
 0x3ea   :  { %4425 = vmatmul.mubr.msk.f32.vlgmr.msra.gmra.mrb[2].mxu1 %vm381_vm5, %v4188_v57 }
 0x3eb   :  { %4435 = vmatprep.mubr.msk.f32.mxu1 %vm5092_vm0, %v5093_v7  ;;  %4735 = vmatpush3.bf16.msra.mxu1 %v5359_v26 }
 0x3ec   :  { %4736 = vmatprep.subr.bf16.mxu1 %v5091_v4 }
 0x3ef   :  { %4738 = vmatpush3.bf16.msra.mxu1 %v5365_v30 }
 0x3f0   :  { %4745 = vmatprep.subr.bf16.mxu1 %v5091_v4 }
 0x4b9   :  { %v377_v58 = vpop.f32.mrb[0].mxu1 }
 0x4ba   :  { %v4419_v59 = vpop.f32.mrb[1].mxu1 }
 0x4bd   :  { %v451_v61 = vpop.f32.mrb[2].mxu1 }
 0x4be   :  { %v452_v62 = vadd.f32 %v451_v61, %v377_v58  ;;  %v4426_v63 = vpop.f32.mrb[3].mxu1 }
 0x4c0   :  { %v461_v0 = vadd.f32 %v5346_v60, %v452_v62 }
 0x4c2   :  { %v465_v2 = vadd.f32 %v463_v1, %v461_v0 }
 0x4c4   :  { %v4195_v3 = vmul.f32 -1.442695, %v465_v2 }
 0x4c6   :  { %4909 = vpow2.f32 %v4195_v3 }
 0x4d0   :  { %v4910_v6 = vpop.eup %4909 }
 0x4d1   :  { %v469_v10 = vadd.f32 1.0, %v4910_v6 }
 0x4d3   :  { %4911 = vrcp.f32 %v469_v10 }
 0x4dd   :  { %v4912_v11 = vpop.eup %4911 }
 0x4de   :  { %v475_v13 = vmul.f32 %v4912_v11, %v473_v12  ;;  %v482_v34 = vsub.f32 1.0, %v4912_v11 }
 0x4e0   :  { %477 = vrot.lane.b32.xlu0 %v475_v13, %s5098_s18 }
 0x552   :  { %v478_v14 = vpop.permute.xlu0 %477 }
 0x553   :  { %v480_v15 = vadd.f32 %v478_v14, %v461_v0 }
 0x555   :  { %4913 = vtanh.f32 %v480_v15 }
 0x55f   :  { %v4914_v31 = vpop.eup %4913 }
 0x560   :  { %484 = vrot.lane.b32.xlu0 %v4914_v31, %s5096_s15 }
 0x564   :  { %488 = vrot.lane.b32.xlu0 %v5206_v9, %s5097_s16 }
 0x5d2   :  { %v485_v33 = vpop.permute.xlu0 %484 }
 0x5d3   :  { %v487_v36 = vmul.f32 %v485_v33, %v482_v34  ;;  %v5415_v34 = vld [vmem:[%s6139_s11] ss:$0 sm:$0xff] }
 0x5d6   :  { %v489_v35 = vpop.permute.xlu0 %488 }
 0x5d7   :  { %v491_v37 = vmul.f32 %v4912_v11, %v489_v35 }
 0x5d9   :  { %v5373_v38 = vadd.f32 %v491_v37, %v487_v36 }
 0x5db   :  { %500 = vrot.lane.b32.xlu1 %v5373_v38, %s5096_s15 }
 0x64d   :  { %v501_v41 = vpop.permute.xlu1 %500 }
 0x64e   :  { %4436 = vmatmul.mubr.msk.f32.vlgmr.msra.gmra.mrb[4].mxu1 %vm83_vm1, %v501_v41  ;;  %4447 = vmatmul.mubr.msk.f32.vlgmr.msra.gmra.mrb[2].mxu0 %vm83_vm1, %v501_v41 }
 0x64f   :  { %4747 = vmatpush3.bf16.msra.mxu1 %v5289_v18  ;;  %4457 = vmatprep.mubr.msk.f32.mxu1 %vm5092_vm0, %v5093_v7 }
 0x650   :  { %4748 = vmatprep.subr.bf16.mxu1 %v5091_v4  ;;  %4753 = vmatpush3.bf16.msra.mxu0 %v5330_v55 }
 0x651   :  { %4464 = vmatprep.mubr.msk.f32.mxu0 %vm5092_vm0, %v5093_v7  ;;  %4754 = vmatprep.subr.bf16.mxu0 %v5091_v4 }
 0x653   :  { %4750 = vmatpush3.bf16.msra.mxu1 %v5299_v21 }
 0x654   :  { %4760 = vmatprep.subr.bf16.mxu1 %v5091_v4 }
 0x721   :  { %v570_v9 = vpop.f32.mrb[4].mxu1  ;;  %v686_v43 = vpop.f32.mrb[2].mxu0 }
 0x722   :  { %v5390_v44 = vadd.f32 %v5220_v16, %v686_v43  ;;  %v4437_v45 = vpop.f32.mrb[5].mxu1  ;;  %v4448_v46 = vpop.f32.mrb[3].mxu0  ;;  %v5418_v35 = vadd.f32 %v5415_v34, %v570_v9 }
 0x724   :  { %v697_v47 = vrot.slane %v5390_v44, %v5222_v17  ;;  %v575_v36 = vsel %vm574_vm6, %v5418_v35, -inf }
 0x726   :  { %v698_v48 = vcombine.high %v697_v47, %v697_v47  ;;  %v705_v49 = vrot.slane %v697_v47, %v5222_v17 }
 0x728   :  { %v712_v50 = vrot.slane %v698_v48, %v5222_v17  ;;  %v716_v52 = vrot.slane %v705_v49, %v5229_v22 }
 0x72a   :  { %v720_v53 = vrot.slane %v712_v50, %v5229_v22  ;;  %v723_v54 = vadd.f32 %v716_v52, %v5235_v25 }
 0x72c   :  { %v724_v56 = vadd.f32 %v720_v53, %v5242_v28  ;;  %4915 = vtanh.f32 %v723_v54 }
 0x72e   :  { %4917 = vtanh.f32 %v724_v56 }
 0x736   :  { %v4916_v57 = vpop.eup %4915 }
 0x737   :  { %v727_v58 = vmul.f32 %v4916_v57, %v5250_v32 }
 0x738   :  { %v4918_v59 = vpop.eup %4917 }
 0x739   :  { %v729_v61 = vsel %vm83_vm1, %v727_v58, 0.0  ;;  %v728_v62 = vmul.f32 %v4918_v59, %v5250_v32 }
 0x73a   :  { %730 = vadd.xlane.f32.xlu0 %v729_v61 }
 0x73b   :  { %v732_v63 = vsel %vm83_vm1, %v728_v62, 0.0 }
 0x73c   :  { %733 = vadd.xlane.f32.xlu1 %v732_v63 }
 0x7c7   :  { %v731_v0 = vpop.xlane.xlu0 %730 }
 0x7c8   :  { %v735_v1 = vadd.f32 %v731_v0, %v5258_v40 }
 0x7c9   :  { %v734_v2 = vpop.xlane.xlu1 %733 }
 0x7ca   :  { %v736_v3 = vadd.f32 %v734_v2, %v5258_v40  ;;  %v742_v6 = vrot.slane %v735_v1, %v5261_v42 }
 0x7cc   :  { %v746_v10 = vrot.slane %v736_v3, %v5261_v42 }
 0x7ce   :  { %v747_v11 = vsel %vm221_vm2, %v746_v10, %v742_v6 }
 0x7cf   :  { %v749_v12 = vsel %vm224_vm3, %v747_v11, -inf }
 0x7d0   :  { %750 = vmax.xlane.f32.xlu0 %v749_v12 }
 0x85d   :  { %v751_v13 = vpop.xlane.xlu0 %750 }
 0x85e   :  { %v756_v14 = vrot.slane %v751_v13, %v5229_v22  ;;  %v760_v15 = vrot.slane %v751_v13, %v5269_v51 }
 0x860   :  { %v763_v20 = vsub.f32 %v735_v1, %v756_v14  ;;  %v764_v19 = vsub.f32 %v736_v3, %v760_v15 }
 0x862   :  { %v765_v24 = vmul.f32 1.442695, %v763_v20  ;;  %v767_v29 = vmul.f32 1.442695, %v764_v19 }
 0x864   :  { %4919 = vpow2.f32 %v765_v24 }
 0x865   :  { %4921 = vpow2.f32 %v767_v29 }
 0x86e   :  { %v4920_v31 = vpop.eup %4919 }
 0x86f   :  { %v4922_v33 = vpop.eup %4921  ;;  %772 = vperm.xlu0 %4898, %v4920_v31  }
 0x870   :  { %775 = vperm.xlu1 %4897, %v4922_v33  }
 0x894   :  { %576 = vmax.xlane.f32.xlu1 %v575_v36 }
 0x8ee   :  { %v773_v37 = vpop.permute.xlu0 %772 }
 0x8ef   :  { %v776_v41 = vpop.permute.xlu1 %775  ;;  %v780_v43 = vrot.slane %v773_v37, %v5261_v42 }
 0x8f0   :  { %v784_v45 = vrot.slane %v776_v41, %v5261_v42 }
 0x8f2   :  { %v785_v46 = vsel %vm221_vm2, %v784_v45, %v780_v43 }
 0x8f3   :  { %v787_v47 = vsel %vm224_vm3, %v785_v46, 0.0 }
 0x8f4   :  { %788 = vadd.xlane.f32.xlu0 %v787_v47 }
 0x921   :  { %v5426_v48 = vpop.xlane.xlu1 %576 }
 0x922   :  { %vm600_vm7 = vcmp.ge.f32.partialorder %v5418_v35, %v5426_v48 }
 0x923   :  { %v601_v9 = vsel %vm600_vm7, %v5256_v39, 16 }
 0x924   :  { %v602_v49 = vsel %vm574_vm6, %v601_v9, 2147483647 }
 0x925   :  { %v604_v50 = vshra.s32 %v602_v49, 16  ;;  %v603_v61 = vand.u32 65535, %v602_v49 }
 0x927   :  { %v606_v52 = vcvt.s32.f32 %v604_v50  ;;  %v605_v63 = vcvt.s32.f32 %v603_v61 }
 0x929   :  { %607 = vmin.xlane.f32.xlu0 %v606_v52 }
 0x981   :  { %v789_v53 = vpop.xlane.xlu0 %788 }
 0x982   :  { %4923 = vrcp.f32 %v789_v53 }
 0x98c   :  { %v4924_v54 = vpop.eup %4923 }
 0x98d   :  { %v795_v56 = vrot.slane %v4924_v54, %v5229_v22  ;;  %v799_v57 = vrot.slane %v4924_v54, %v5269_v51 }
 0x98f   :  { %v802_v58 = vmul.f32 %v4920_v31, %v795_v56  ;;  %v803_v59 = vmul.f32 %v4922_v33, %v799_v57 }
 0x991   :  { %806 = vperm.xlu1 %4897, %v802_v58   ;;  %811 = vperm.xlu0 %4898, %v803_v59  }
 0x995   :  { %979 = vrot.lane.b32.xlu0 %v5390_v44, %s5096_s15 }
 0x999   :  { %989 = vrot.lane.b32.xlu0 %v5390_v44, %s5097_s16 }
 0x9b6   :  { %v608_v62 = vpop.xlane.xlu0 %607 }
 0x9b7   :  { %vm609_vm8 = vcmp.eq.f32.partialorder %v606_v52, %v608_v62  ;;  %v614_v46 = vcvt.f32.s32 %v608_v62 }
 0x9b8   :  { %v610_v0 = vsel %vm609_vm8, %v605_v63, inf }
 0x9b9   :  { %611 = vmin.xlane.f32.xlu1 %v610_v0  ;;  %v615_v9 = vshll.u32 %v614_v46, 16 }
 0xa10   :  { %v812_v1 = vpop.permute.xlu0 %811  ;;  %v807_v2 = vpop.permute.xlu1 %806 }
 0xa11   :  { %v815_v3 = vmul.f32 %v812_v1, %v5312_v27  ;;  %v1104_v6 = vrot.slane %v812_v1, %v5261_v42  ;;  %v814_v10 = vmul.f32 %v807_v2, %v5306_v23  ;;  %v1100_v11 = vrot.slane %v807_v2, %v5261_v42 }
 0xa13   :  { %v823_v12 = vsel %vm83_vm1, %v815_v3, 0.0  ;;  %v816_v44 = vsel %vm83_vm1, %v814_v10, 0.0  ;;  %v1105_v13 = vsel %vm221_vm2, %v1104_v6, %v1100_v11 }
 0xa14   :  { %v824_v14 = vrot.slane %v823_v12, 4  ;;  %v817_v15 = vrot.slane %v816_v44, 4  ;;  %4205 = vst.msk [vmem:[%s6141_s13 + $0x2] sm:$0x3] %vm224_vm3, %v1105_v13  ;;  %v980_v61 = vpop.permute.xlu0 %979 }
 0xa16   :  { %v825_v20 = vadd.f32 %v824_v14, %v823_v12  ;;  %v818_v19 = vadd.f32 %v817_v15, %v816_v44 }
 0xa18   :  { %v826_v24 = vrot.slane %v825_v20, 2  ;;  %v819_v29 = vrot.slane %v818_v19, 2  ;;  %v990_v3 = vpop.permute.xlu0 %989 }
 0xa1a   :  { %v827_v31 = vadd.f32 %v826_v24, %v825_v20  ;;  %v820_v33 = vadd.f32 %v819_v29, %v818_v19 }
 0xa1c   :  { %v828_v36 = vrot.slane %v827_v31, 1  ;;  %v821_v37 = vrot.slane %v820_v33, 1 }
 0xa1e   :  { %v822_v41 = vadd.f32 %v821_v37, %v820_v33  ;;  %v829_v43 = vadd.f32 %v828_v36, %v827_v31 }
 0xa20   :  { %v832_v45 = vsel %vm221_vm2, %v829_v43, %v822_v41 }
 0xa21   :  { %4458 = vmatmul.mubr.msk.f32.vlgmr.msra.gmra.mrb[6].mxu1 %vm83_vm1, %v832_v45 }
 0xa22   :  { %4762 = vmatpush3.bf16.msra.mxu1 %v5188_v5  ;;  %4486 = vmatprep.mubr.msk.f32.mxu1 %vm5092_vm0, %v5093_v7 }
 0xa23   :  { %4763 = vmatprep.subr.bf16.mxu1 %v5091_v4 }
 0xa26   :  { %4765 = vmatpush3.bf16.msra.mxu1 %v5199_v8 }
 0xa27   :  { %4772 = vmatprep.subr.bf16.mxu1 %v5091_v4 }
 0xa46   :  { %v612_v47 = vpop.xlane.xlu1 %611 }
 0xa47   :  { %v613_v49 = vcvt.f32.s32 %v612_v47 }
 0xa49   :  { %v616_v50 = vadd.s32 %v615_v9, %v613_v49 }
 0xa4b   :  { %vm617_vm9 = vcmp.eq.s32.totalorder %v5256_v39, %v616_v50 }
 0xa4c   :  { %v4198_v52 = vsel %vm617_vm9, 1.0, %v5093_v7 }
 0xa4d   :  { %4465 = vmatmul.mubr.msk.f32.vlgmr.msra.gmra.mrb[4].mxu0 %vm381_vm5, %v4198_v52 }
 0xa4e   :  { %4756 = vmatpush3.bf16.msra.mxu0 %v5359_v26  ;;  %4475 = vmatprep.mubr.msk.f32.mxu0 %vm5092_vm0, %v5093_v7 }
 0xa4f   :  { %4757 = vmatprep.subr.bf16.mxu0 %v5091_v4 }
 0xa52   :  { %4759 = vmatpush3.bf16.msra.mxu0 %v5365_v30 }
 0xa53   :  { %4766 = vmatprep.subr.bf16.mxu0 %v5091_v4 }
 0xaf4   :  { %v901_v53 = vpop.f32.mrb[6].mxu1 }
 0xaf5   :  { %v4459_v54 = vpop.f32.mrb[7].mxu1 }
 0xb20   :  { %v974_v56 = vpop.f32.mrb[4].mxu0 }
 0xb21   :  { %v975_v57 = vadd.f32 %v974_v56, %v901_v53  ;;  %v4466_v58 = vpop.f32.mrb[5].mxu0 }
 0xb23   :  { %v978_v59 = vadd.f32 %v5346_v60, %v975_v57 }
 0xb25   :  { %v982_v62 = vadd.f32 %v980_v61, %v978_v59 }
 0xb27   :  { %v4202_v63 = vmul.f32 -1.442695, %v982_v62 }
 0xb29   :  { %4925 = vpow2.f32 %v4202_v63 }
 0xb33   :  { %v4926_v0 = vpop.eup %4925 }
 0xb34   :  { %v986_v1 = vadd.f32 1.0, %v4926_v0 }
 0xb36   :  { %4927 = vrcp.f32 %v986_v1 }
 0xb40   :  { %v4928_v2 = vpop.eup %4927 }
 0xb41   :  { %v992_v6 = vmul.f32 %v4928_v2, %v990_v3  ;;  %v999_v44 = vsub.f32 1.0, %v4928_v2  ;;  %v1005_v14 = vmul.f32 %v4928_v2, %v5373_v38 }
 0xb43   :  { %994 = vrot.lane.b32.xlu0 %v992_v6, %s5098_s18 }
 0xbb5   :  { %v995_v10 = vpop.permute.xlu0 %994 }
 0xbb6   :  { %v997_v11 = vadd.f32 %v995_v10, %v978_v59 }
 0xbb8   :  { %4929 = vtanh.f32 %v997_v11 }
 0xbc2   :  { %v4930_v12 = vpop.eup %4929 }
 0xbc3   :  { %1001 = vrot.lane.b32.xlu0 %v4930_v12, %s5096_s15 }
 0xc35   :  { %v1002_v13 = vpop.permute.xlu0 %1001 }
 0xc36   :  { %v1004_v15 = vmul.f32 %v1002_v13, %v999_v44 }
 0xc38   :  { %v5470_v20 = vadd.f32 %v1005_v14, %v1004_v15 }
 0xc3a   :  { %1008 = vrot.lane.b32.xlu0 %v5470_v20, %s5096_s15 }
 0xcac   :  { %v1009_v19 = vpop.permute.xlu0 %1008 }
 0xcad   :  { %4476 = vmatmul.mubr.msk.f32.vlgmr.msra.gmra.mrb[6].mxu0 %vm83_vm1, %v1009_v19  ;;  %4487 = vmatmul.mubr.msk.f32.vlgmr.msra.gmra.mrb[8].mxu1 %vm83_vm1, %v1009_v19 }
 0xcae   :  { %4768 = vmatpush3.bf16.msra.mxu0 %v5289_v18  ;;  %4497 = vmatprep.mubr.msk.f32.mxu0 %vm5092_vm0, %v5093_v7 }
 0xcaf   :  { %4769 = vmatprep.subr.bf16.mxu0 %v5091_v4  ;;  %4774 = vmatpush3.bf16.msra.mxu1 %v5330_v55 }
 0xcb0   :  { %4504 = vmatprep.mubr.msk.f32.mxu1 %vm5092_vm0, %v5093_v7  ;;  %4775 = vmatprep.subr.bf16.mxu1 %v5091_v4 }
 0xcb2   :  { %4771 = vmatpush3.bf16.msra.mxu0 %v5299_v21 }
 0xcb3   :  { %4781 = vmatprep.subr.bf16.mxu0 %v5091_v4 }
 0xd80   :  { %v1078_v38 = vpop.f32.mrb[6].mxu0  ;;  %v1195_v24 = vpop.f32.mrb[8].mxu1 }
 0xd81   :  { %v5487_v29 = vadd.f32 %v5220_v16, %v1195_v24  ;;  %v4477_v31 = vpop.f32.mrb[7].mxu0  ;;  %v4488_v33 = vpop.f32.mrb[9].mxu1  ;;  %v5510_v15 = vadd.f32 %v5415_v34, %v1078_v38 }
 0xd83   :  { %v1206_v36 = vrot.slane %v5487_v29, %v5222_v17  ;;  %v1082_v19 = vsel %vm574_vm6, %v5510_v15, -inf }
 0xd85   :  { %v1207_v37 = vcombine.high %v1206_v36, %v1206_v36  ;;  %v1214_v41 = vrot.slane %v1206_v36, %v5222_v17 }
 0xd87   :  { %v1221_v43 = vrot.slane %v1207_v37, %v5222_v17  ;;  %v1225_v45 = vrot.slane %v1214_v41, %v5229_v22 }
 0xd89   :  { %v1229_v46 = vrot.slane %v1221_v43, %v5229_v22  ;;  %v1232_v47 = vadd.f32 %v1225_v45, %v5235_v25 }
 0xd8b   :  { %v1233_v9 = vadd.f32 %v1229_v46, %v5242_v28  ;;  %4931 = vtanh.f32 %v1232_v47 }
 0xd8d   :  { %4933 = vtanh.f32 %v1233_v9 }
 0xd95   :  { %v4932_v49 = vpop.eup %4931 }
 0xd96   :  { %v1236_v50 = vmul.f32 %v4932_v49, %v5250_v32 }
 0xd97   :  { %v4934_v52 = vpop.eup %4933 }
 0xd98   :  { %v1238_v53 = vsel %vm83_vm1, %v1236_v50, 0.0  ;;  %v1237_v54 = vmul.f32 %v4934_v52, %v5250_v32 }
 0xd99   :  { %1239 = vadd.xlane.f32.xlu0 %v1238_v53 }
 0xd9a   :  { %v1241_v56 = vsel %vm83_vm1, %v1237_v54, 0.0 }
 0xd9b   :  { %1242 = vadd.xlane.f32.xlu1 %v1241_v56 }
 0xe26   :  { %v1240_v57 = vpop.xlane.xlu0 %1239 }
 0xe27   :  { %v1244_v58 = vadd.f32 %v1240_v57, %v5258_v40 }
 0xe28   :  { %v1243_v59 = vpop.xlane.xlu1 %1242 }
 0xe29   :  { %v1245_v61 = vadd.f32 %v1243_v59, %v5258_v40  ;;  %v1251_v62 = vrot.slane %v1244_v58, %v5261_v42 }
 0xe2b   :  { %v1255_v63 = vrot.slane %v1245_v61, %v5261_v42 }
 0xe2d   :  { %v1256_v0 = vsel %vm221_vm2, %v1255_v63, %v1251_v62 }
 0xe2e   :  { %v1258_v1 = vsel %vm224_vm3, %v1256_v0, -inf }
 0xe2f   :  { %1259 = vmax.xlane.f32.xlu1 %v1258_v1 }
 0xebc   :  { %v1260_v2 = vpop.xlane.xlu1 %1259 }
 0xebd   :  { %v1265_v3 = vrot.slane %v1260_v2, %v5229_v22  ;;  %v1269_v6 = vrot.slane %v1260_v2, %v5269_v51 }
 0xebf   :  { %v1272_v10 = vsub.f32 %v1244_v58, %v1265_v3  ;;  %v1273_v11 = vsub.f32 %v1245_v61, %v1269_v6 }
 0xec1   :  { %v1274_v12 = vmul.f32 1.442695, %v1272_v10  ;;  %v1276_v44 = vmul.f32 1.442695, %v1273_v11 }
 0xec3   :  { %4935 = vpow2.f32 %v1274_v12 }
 0xec4   :  { %4937 = vpow2.f32 %v1276_v44 }
 0xecd   :  { %v4936_v13 = vpop.eup %4935 }
 0xece   :  { %v4938_v14 = vpop.eup %4937  ;;  %1281 = vperm.xlu1 %4897, %v4936_v13  }
 0xecf   :  { %1284 = vperm.xlu0 %4898, %v4938_v14  }
 0xef2   :  { %1083 = vmax.xlane.f32.xlu1 %v1082_v19 }
 0xf4d   :  { %v1282_v24 = vpop.permute.xlu1 %1281 }
 0xf4e   :  { %v1285_v31 = vpop.permute.xlu0 %1284  ;;  %v1289_v33 = vrot.slane %v1282_v24, %v5261_v42 }
 0xf4f   :  { %v1293_v36 = vrot.slane %v1285_v31, %v5261_v42 }
 0xf51   :  { %v1294_v37 = vsel %vm221_vm2, %v1293_v36, %v1289_v33 }
 0xf52   :  { %v1296_v41 = vsel %vm224_vm3, %v1294_v37, 0.0 }
 0xf53   :  { %1297 = vadd.xlane.f32.xlu0 %v1296_v41 }
 0xf7f   :  { %v5518_v43 = vpop.xlane.xlu1 %1083 }
 0xf80   :  { %vm1109_vm10 = vcmp.ge.f32.partialorder %v5510_v15, %v5518_v43 }
 0xf81   :  { %v1110_v38 = vsel %vm1109_vm10, %v5256_v39, 16 }
 0xf82   :  { %v1111_v45 = vsel %vm574_vm6, %v1110_v38, 2147483647 }
 0xf83   :  { %v1113_v46 = vshra.s32 %v1111_v45, 16  ;;  %v1112_v56 = vand.u32 65535, %v1111_v45 }
 0xf85   :  { %v1115_v47 = vcvt.s32.f32 %v1113_v46  ;;  %v1114_v58 = vcvt.s32.f32 %v1112_v56 }
 0xf87   :  { %1116 = vmin.xlane.f32.xlu1 %v1115_v47 }
 0xfe0   :  { %v1298_v9 = vpop.xlane.xlu0 %1297 }
 0xfe1   :  { %4939 = vrcp.f32 %v1298_v9 }
 0xfeb   :  { %v4940_v49 = vpop.eup %4939 }
 0xfec   :  { %v1308_v50 = vrot.slane %v4940_v49, %v5269_v51  ;;  %v1304_v52 = vrot.slane %v4940_v49, %v5229_v22 }
 0xfee   :  { %v1312_v53 = vmul.f32 %v4938_v14, %v1308_v50  ;;  %v1311_v54 = vmul.f32 %v4936_v13, %v1304_v52 }
 0xff0   :  { %1320 = vperm.xlu0 %4898, %v1312_v53   ;;  %1315 = vperm.xlu1 %4897, %v1311_v54  }
 0xff4   :  { %1488 = vrot.lane.b32.xlu0 %v5487_v29, %s5096_s15 }
 0xff8   :  { %1498 = vrot.lane.b32.xlu0 %v5487_v29, %s5097_s16 }
0x1014   :  { %v1117_v57 = vpop.xlane.xlu1 %1116 }
0x1015   :  { %vm1118_vm11 = vcmp.eq.f32.partialorder %v1115_v47, %v1117_v57  ;;  %v1123_v38 = vcvt.f32.s32 %v1117_v57 }
0x1016   :  { %v1119_v59 = vsel %vm1118_vm11, %v1114_v58, inf }
0x1017   :  { %1120 = vmin.xlane.f32.xlu1 %v1119_v59  ;;  %v1124_v46 = vshll.u32 %v1123_v38, 16 }
0x106f   :  { %v1321_v61 = vpop.permute.xlu0 %1320  ;;  %v1316_v62 = vpop.permute.xlu1 %1315 }
0x1070   :  { %v1324_v63 = vmul.f32 %v1321_v61, %v5312_v27  ;;  %v1613_v0 = vrot.slane %v1321_v61, %v5261_v42  ;;  %v1323_v1 = vmul.f32 %v1316_v62, %v5306_v23  ;;  %v1609_v2 = vrot.slane %v1316_v62, %v5261_v42 }
0x1072   :  { %v1332_v3 = vsel %vm83_vm1, %v1324_v63, 0.0  ;;  %v1325_v29 = vsel %vm83_vm1, %v1323_v1, 0.0  ;;  %v1614_v6 = vsel %vm221_vm2, %v1613_v0, %v1609_v2 }
0x1073   :  { %v1333_v10 = vrot.slane %v1332_v3, 4  ;;  %v1326_v11 = vrot.slane %v1325_v29, 4  ;;  %4213 = vst.msk [vmem:[%s6141_s13 + $0x4] sm:$0x3] %vm224_vm3, %v1614_v6  ;;  %v1489_v58 = vpop.permute.xlu0 %1488 }
0x1075   :  { %v1334_v12 = vadd.f32 %v1333_v10, %v1332_v3  ;;  %v1327_v44 = vadd.f32 %v1326_v11, %v1325_v29 }
0x1077   :  { %v1335_v13 = vrot.slane %v1334_v12, 2  ;;  %v1328_v14 = vrot.slane %v1327_v44, 2  ;;  %v1499_v1 = vpop.permute.xlu0 %1498 }
0x1079   :  { %v1336_v19 = vadd.f32 %v1335_v13, %v1334_v12  ;;  %v1329_v24 = vadd.f32 %v1328_v14, %v1327_v44 }
0x107b   :  { %v1337_v31 = vrot.slane %v1336_v19, 1  ;;  %v1330_v33 = vrot.slane %v1329_v24, 1 }
0x107d   :  { %v1338_v36 = vadd.f32 %v1337_v31, %v1336_v19  ;;  %v1331_v37 = vadd.f32 %v1330_v33, %v1329_v24 }
0x107f   :  { %v1341_v41 = vsel %vm221_vm2, %v1338_v36, %v1331_v37 }
0x1080   :  { %4498 = vmatmul.mubr.msk.f32.vlgmr.msra.gmra.mrb[8].mxu0 %vm83_vm1, %v1341_v41 }
0x1081   :  { %4783 = vmatpush3.bf16.msra.mxu0 %v5188_v5  ;;  %4526 = vmatprep.mubr.msk.f32.mxu0 %vm5092_vm0, %v5093_v7 }
0x1082   :  { %4784 = vmatprep.subr.bf16.mxu0 %v5091_v4 }
0x1085   :  { %4786 = vmatpush3.bf16.msra.mxu0 %v5199_v8 }
0x1086   :  { %4793 = vmatprep.subr.bf16.mxu0 %v5091_v4 }
0x10a4   :  { %v1121_v45 = vpop.xlane.xlu1 %1120 }
0x10a5   :  { %v1122_v47 = vcvt.f32.s32 %v1121_v45 }
0x10a7   :  { %v1125_v9 = vadd.s32 %v1124_v46, %v1122_v47 }
0x10a9   :  { %vm1126_vm12 = vcmp.eq.s32.totalorder %v5256_v39, %v1125_v9 }
0x10aa   :  { %v4206_v49 = vsel %vm1126_vm12, 1.0, %v5093_v7 }
0x10ab   :  { %4505 = vmatmul.mubr.msk.f32.vlgmr.msra.gmra.mrb[10].mxu1 %vm381_vm5, %v4206_v49 }
0x10ac   :  { %4777 = vmatpush3.bf16.msra.mxu1 %v5359_v26  ;;  %4515 = vmatprep.mubr.msk.f32.mxu1 %vm5092_vm0, %v5093_v7 }
0x10ad   :  { %4778 = vmatprep.subr.bf16.mxu1 %v5091_v4 }
0x10b0   :  { %4780 = vmatpush3.bf16.msra.mxu1 %v5365_v30 }
0x10b1   :  { %4787 = vmatprep.subr.bf16.mxu1 %v5091_v4 }
0x1153   :  { %v1410_v50 = vpop.f32.mrb[8].mxu0 }
0x1154   :  { %v4499_v52 = vpop.f32.mrb[9].mxu0 }
0x117e   :  { %v1483_v53 = vpop.f32.mrb[10].mxu1 }
0x117f   :  { %v1484_v54 = vadd.f32 %v1483_v53, %v1410_v50  ;;  %v4506_v56 = vpop.f32.mrb[11].mxu1 }
0x1181   :  { %v1487_v57 = vadd.f32 %v5346_v60, %v1484_v54 }
0x1183   :  { %v1491_v59 = vadd.f32 %v1489_v58, %v1487_v57 }
0x1185   :  { %v4210_v61 = vmul.f32 -1.442695, %v1491_v59 }
0x1187   :  { %4941 = vpow2.f32 %v4210_v61 }
0x1191   :  { %v4942_v62 = vpop.eup %4941 }
0x1192   :  { %v1495_v63 = vadd.f32 1.0, %v4942_v62 }
0x1194   :  { %4943 = vrcp.f32 %v1495_v63 }
0x119e   :  { %v4944_v0 = vpop.eup %4943 }
0x119f   :  { %v1501_v2 = vmul.f32 %v4944_v0, %v1499_v1  ;;  %v1508_v10 = vsub.f32 1.0, %v4944_v0  ;;  %v1514_v12 = vmul.f32 %v4944_v0, %v5470_v20 }
0x11a1   :  { %1503 = vrot.lane.b32.xlu0 %v1501_v2, %s5098_s18 }
0x1213   :  { %v1504_v3 = vpop.permute.xlu0 %1503 }
0x1214   :  { %v1506_v29 = vadd.f32 %v1504_v3, %v1487_v57 }
0x1216   :  { %4945 = vtanh.f32 %v1506_v29 }
0x1220   :  { %v4946_v6 = vpop.eup %4945 }
0x1221   :  { %1510 = vrot.lane.b32.xlu0 %v4946_v6, %s5096_s15 }
0x1293   :  { %v1511_v11 = vpop.permute.xlu0 %1510 }
0x1294   :  { %v1513_v44 = vmul.f32 %v1511_v11, %v1508_v10 }
0x1296   :  { %v5562_v13 = vadd.f32 %v1514_v12, %v1513_v44 }
0x1298   :  { %1517 = vrot.lane.b32.xlu0 %v5562_v13, %s5096_s15 }
0x130a   :  { %v1518_v14 = vpop.permute.xlu0 %1517 }
0x130b   :  { %4516 = vmatmul.mubr.msk.f32.vlgmr.msra.gmra.mrb[12].mxu1 %vm83_vm1, %v1518_v14  ;;  %4527 = vmatmul.mubr.msk.f32.vlgmr.msra.gmra.mrb[10].mxu0 %vm83_vm1, %v1518_v14 }
0x130c   :  { %4789 = vmatpush3.bf16.msra.mxu1 %v5289_v18  ;;  %4537 = vmatprep.mubr.msk.f32.mxu1 %vm5092_vm0, %v5093_v7 }
0x130d   :  { %4790 = vmatprep.subr.bf16.mxu1 %v5091_v4  ;;  %4795 = vmatpush3.bf16.msra.mxu0 %v5330_v55 }
0x130e   :  { %4544 = vmatprep.mubr.msk.f32.mxu0 %vm5092_vm0, %v5093_v7  ;;  %4796 = vmatprep.subr.bf16.mxu0 %v5091_v4 }
0x1310   :  { %4792 = vmatpush3.bf16.msra.mxu1 %v5299_v21 }
0x1311   :  { %4802 = vmatprep.subr.bf16.mxu1 %v5091_v4 }
0x13de   :  { %v1587_v20 = vpop.f32.mrb[12].mxu1  ;;  %v1704_v19 = vpop.f32.mrb[10].mxu0 }
0x13df   :  { %v1705_v24 = vadd.f32 %v5220_v16, %v1704_v19  ;;  %v4517_v31 = vpop.f32.mrb[13].mxu1  ;;  %v4528_v33 = vpop.f32.mrb[11].mxu0  ;;  %v5588_v52 = vadd.f32 %v5415_v34, %v1587_v20 }
0x13e1   :  { %v1715_v36 = vrot.slane %v1705_v24, %v5222_v17 }
0x13e3   :  { %v1716_v37 = vcombine.high %v1715_v36, %v1715_v36  ;;  %v1723_v41 = vrot.slane %v1715_v36, %v5222_v17 }
0x13e5   :  { %v1730_v38 = vrot.slane %v1716_v37, %v5222_v17  ;;  %v1734_v45 = vrot.slane %v1723_v41, %v5229_v22 }
0x13e7   :  { %v1738_v46 = vrot.slane %v1730_v38, %v5229_v22  ;;  %v1741_v47 = vadd.f32 %v1734_v45, %v5235_v25  ;;  %v1591_v25 = vsel %vm574_vm6, %v5588_v52, -inf }
0x13e9   :  { %v1742_v9 = vadd.f32 %v1738_v46, %v5242_v28  ;;  %4947 = vtanh.f32 %v1741_v47 }
0x13eb   :  { %4949 = vtanh.f32 %v1742_v9 }
0x13f3   :  { %v4948_v16 = vpop.eup %4947 }
0x13f4   :  { %v1745_v49 = vmul.f32 %v4948_v16, %v5250_v32 }
0x13f5   :  { %v4950_v50 = vpop.eup %4949 }
0x13f6   :  { %v1747_v53 = vsel %vm83_vm1, %v1745_v49, 0.0  ;;  %v1746_v54 = vmul.f32 %v4950_v50, %v5250_v32 }
0x13f7   :  { %1748 = vadd.xlane.f32.xlu0 %v1747_v53 }
0x13f8   :  { %v1750_v56 = vsel %vm83_vm1, %v1746_v54, 0.0 }
0x13f9   :  { %1751 = vadd.xlane.f32.xlu1 %v1750_v56 }
0x13fb   :  { %1592 = vmax.xlane.f32.xlu0 %v1591_v25 }
0x1484   :  { %v1749_v28 = vpop.xlane.xlu0 %1748 }
0x1485   :  { %v1753_v57 = vadd.f32 %v1749_v28, %v5258_v40 }
0x1486   :  { %v1752_v58 = vpop.xlane.xlu1 %1751 }
0x1487   :  { %v1754_v59 = vadd.f32 %v1752_v58, %v5258_v40  ;;  %v1760_v62 = vrot.slane %v1753_v57, %v5261_v42 }
0x1488   :  { %v5597_v61 = vpop.xlane.xlu0 %1592 }
0x1489   :  { %v1764_v32 = vrot.slane %v1754_v59, %v5261_v42  ;;  %vm1618_vm13 = vcmp.ge.f32.partialorder %v5588_v52, %v5597_v61 }
0x148a   :  { %v1619_v63 = vsel %vm1618_vm13, %v5256_v39, 16 }
0x148b   :  { %v1765_v0 = vsel %vm221_vm2, %v1764_v32, %v1760_v62  ;;  %v1620_v1 = vsel %vm574_vm6, %v1619_v63, 2147483647 }
0x148c   :  { %v1767_v2 = vsel %vm224_vm3, %v1765_v0, -inf  ;;  %v1622_v3 = vshra.s32 %v1620_v1, 16  ;;  %v1621_v54 = vand.u32 65535, %v1620_v1 }
0x148d   :  { %1768 = vmax.xlane.f32.xlu1 %v1767_v2 }
0x148e   :  { %v1624_v29 = vcvt.s32.f32 %v1622_v3  ;;  %v1623_v56 = vcvt.s32.f32 %v1621_v54 }
0x1490   :  { %1625 = vmin.xlane.f32.xlu0 %v1624_v29 }
0x151a   :  { %v1769_v6 = vpop.xlane.xlu1 %1768 }
0x151b   :  { %v1774_v10 = vrot.slane %v1769_v6, %v5229_v22  ;;  %v1778_v11 = vrot.slane %v1769_v6, %v5269_v51 }
0x151d   :  { %v1781_v12 = vsub.f32 %v1753_v57, %v1774_v10  ;;  %v1782_v44 = vsub.f32 %v1754_v59, %v1778_v11  ;;  %v1626_v53 = vpop.xlane.xlu0 %1625 }
0x151e   :  { %vm1627_vm14 = vcmp.eq.f32.partialorder %v1624_v29, %v1626_v53 }
0x151f   :  { %v1783_v14 = vmul.f32 1.442695, %v1781_v12  ;;  %v1785_v20 = vmul.f32 1.442695, %v1782_v44  ;;  %v1628_v25 = vsel %vm1627_vm14, %v1623_v56, inf }
0x1521   :  { %4951 = vpow2.f32 %v1783_v14 }
0x1522   :  { %4953 = vpow2.f32 %v1785_v20 }
0x152b   :  { %v4952_v19 = vpop.eup %4951 }
0x152c   :  { %1790 = vperm.xlu1 %4897, %v4952_v19   ;;  %v4954_v31 = vpop.eup %4953 }
0x1530   :  { %1793 = vperm.xlu1 %4897, %v4954_v31  }
0x15ab   :  { %v1791_v33 = vpop.permute.xlu1 %1790 }
0x15ac   :  { %v1798_v37 = vrot.slane %v1791_v33, %v5261_v42 }
0x15af   :  { %v1794_v36 = vpop.permute.xlu1 %1793 }
0x15b0   :  { %v1802_v41 = vrot.slane %v1794_v36, %v5261_v42 }
0x15b2   :  { %v1803_v38 = vsel %vm221_vm2, %v1802_v41, %v1798_v37 }
0x15b3   :  { %v1805_v45 = vsel %vm224_vm3, %v1803_v38, 0.0 }
0x15b4   :  { %1806 = vadd.xlane.f32.xlu1 %v1805_v45 }
0x15c5   :  { %1997 = vrot.lane.b32.xlu1 %v1705_v24, %s5096_s15 }
0x15c9   :  { %2007 = vrot.lane.b32.xlu1 %v1705_v24, %s5097_s16 }
0x1641   :  { %v1807_v46 = vpop.xlane.xlu1 %1806 }
0x1642   :  { %4955 = vrcp.f32 %v1807_v46 }
0x164c   :  { %v4956_v47 = vpop.eup %4955 }
0x164d   :  { %v1813_v9 = vrot.slane %v4956_v47, %v5229_v22  ;;  %v1817_v49 = vrot.slane %v4956_v47, %v5269_v51 }
0x164f   :  { %v1820_v16 = vmul.f32 %v4952_v19, %v1813_v9  ;;  %v1821_v50 = vmul.f32 %v4954_v31, %v1817_v49  ;;  %v1632_v19 = vcvt.f32.s32 %v1626_v53  ;;  %v1998_v49 = vpop.permute.xlu1 %1997 }
0x1651   :  { %1824 = vperm.xlu0 %4898, %v1820_v16   ;;  %v1633_v33 = vshll.u32 %v1632_v19, 16 }
0x1655   :  { %1829 = vperm.xlu0 %4898, %v1821_v50  }
0x1674   :  { %1629 = vmin.xlane.f32.xlu0 %v1628_v25 }
0x16d0   :  { %v1825_v28 = vpop.permute.xlu0 %1824 }
0x16d1   :  { %v1832_v24 = vmul.f32 %v1825_v28, %v5306_v23  ;;  %v2118_v62 = vrot.slane %v1825_v28, %v5261_v42  ;;  %v2008_v28 = vpop.permute.xlu1 %2007 }
0x16d3   :  { %v1834_v57 = vsel %vm83_vm1, %v1832_v24, 0.0 }
0x16d4   :  { %v1835_v58 = vrot.slane %v1834_v57, 4  ;;  %v1830_v59 = vpop.permute.xlu0 %1829 }
0x16d5   :  { %v1833_v32 = vmul.f32 %v1830_v59, %v5312_v27  ;;  %v2122_v63 = vrot.slane %v1830_v59, %v5261_v42 }
0x16d6   :  { %v1836_v0 = vadd.f32 %v1835_v58, %v1834_v57 }
0x16d7   :  { %v1841_v1 = vsel %vm83_vm1, %v1833_v32, 0.0  ;;  %v2123_v2 = vsel %vm221_vm2, %v2122_v63, %v2118_v62 }
0x16d8   :  { %v1837_v3 = vrot.slane %v1836_v0, 2  ;;  %v1842_v29 = vrot.slane %v1841_v1, 4  ;;  %4221 = vst.msk [vmem:[%s6141_s13 + $0x6] sm:$0x3] %vm224_vm3, %v2123_v2 }
0x16da   :  { %v1838_v23 = vadd.f32 %v1837_v3, %v1836_v0  ;;  %v1843_v6 = vadd.f32 %v1842_v29, %v1841_v1  ;;  %v5668_v3 = vld [vmem:[%s6132_s4] ss:$0 sm:$0xff] }
0x16dc   :  { %v1844_v10 = vrot.slane %v1843_v6, 2  ;;  %v1839_v11 = vrot.slane %v1838_v23, 1 }
0x16de   :  { %v1845_v12 = vadd.f32 %v1844_v10, %v1843_v6  ;;  %v1840_v44 = vadd.f32 %v1839_v11, %v1838_v23 }
0x16e0   :  { %v1846_v27 = vrot.slane %v1845_v12, 1 }
0x16e2   :  { %v1847_v14 = vadd.f32 %v1846_v27, %v1845_v12 }
0x16e4   :  { %v1850_v20 = vsel %vm221_vm2, %v1847_v14, %v1840_v44 }
0x16e5   :  { %4538 = vmatmul.mubr.msk.f32.vlgmr.msra.gmra.mrb[14].mxu1 %vm83_vm1, %v1850_v20  ;;  %v5682_v20 = vld [vmem:[%s6129_s1] sm:$0xff] }
0x16e6   :  { %4804 = vmatpush3.bf16.msra.mxu1 %v5188_v5  ;;  %4566 = vmatprep.mubr.msk.f32.mxu1 %vm5092_vm0, %v5093_v7 }
0x16e7   :  { %4805 = vmatprep.subr.bf16.mxu1 %v5091_v4 }
0x16ea   :  { %4807 = vmatpush3.bf16.msra.mxu1 %v5199_v8 }
0x16eb   :  { %4814 = vmatprep.subr.bf16.mxu1 %v5091_v4 }
0x1701   :  { %v1630_v31 = vpop.xlane.xlu0 %1629 }
0x1702   :  { %v1631_v36 = vcvt.f32.s32 %v1630_v31  ;;  %v5688_v31 = vld [vmem:[%s6129_s1 + $0x8] sm:$0xff] }
0x1704   :  { %v1634_v37 = vadd.s32 %v1633_v33, %v1631_v36 }
0x1706   :  { %vm1635_vm15 = vcmp.eq.s32.totalorder %v5256_v39, %v1634_v37  ;;  %v5694_v37 = vld [vmem:[%s6133_s5] ss:$0 sm:$0xff]  ;;  %s5099_s5 = smov [#allocation3]  }
0x1707   :  { %v4214_v41 = vsel %vm1635_vm15, 1.0, %v5093_v7  ;;  %s4176_s3 = sshll.u32 %s5099_s5, 4  ;;  %s4177_s3 = int_to_ptr.vmem [resolvable:$true] %s4176_s3 }
0x1708   :  { %4545 = vmatmul.mubr.msk.f32.vlgmr.msra.gmra.mrb[12].mxu0 %vm381_vm5, %v4214_v41  ;;  %s5067_s22 = scalar_lea.vmem %s4177_s3, 32  ;;  %p5072_p1 = scmp.lt.s32.totalorder %s4177_s3, %s4177_s3 }
0x1709   :  { %4798 = vmatpush3.bf16.msra.mxu0 %v5359_v26  ;;  %4555 = vmatprep.mubr.msk.f32.mxu0 %vm5092_vm0, %v5093_v7  ;;  %p5068_p0 = scmp.ne.s32.totalorder %s4177_s3, %s5067_s22  ;;  %p5073_p2 = scmp.lt.s32.totalorder %s5067_s22, %s5067_s22 }
0x170a   :  { %4799 = vmatprep.subr.bf16.mxu0 %v5091_v4 }
0x170b   :  { %p5074_p3 = por %p5073_p2, %p5072_p1 }
0x170d   :  { %4801 = vmatpush3.bf16.msra.mxu0 %v5365_v30  ;;  %p5075_p4 = pnand %p5074_p3, %p5068_p0 }
0x170e   :  { %4808 = vmatprep.subr.bf16.mxu0 %v5091_v4 }
0x17b8   :  { %v1919_v38 = vpop.f32.mrb[14].mxu1 }
0x17b9   :  { %v4539_v45 = vpop.f32.mrb[15].mxu1 }
0x17db   :  { %v1992_v46 = vpop.f32.mrb[12].mxu0 }
0x17dc   :  { %v1993_v47 = vadd.f32 %v1992_v46, %v1919_v38  ;;  %v4546_v9 = vpop.f32.mrb[13].mxu0 }
0x17de   :  { %v1996_v16 = vadd.f32 %v5346_v60, %v1993_v47 }
0x17e0   :  { %v2000_v50 = vadd.f32 %v1998_v49, %v1996_v16 }
0x17e2   :  { %v4218_v53 = vmul.f32 -1.442695, %v2000_v50 }
0x17e4   :  { %4957 = vpow2.f32 %v4218_v53 }
0x17ee   :  { %v4958_v54 = vpop.eup %4957 }
0x17ef   :  { %v2004_v56 = vadd.f32 1.0, %v4958_v54 }
0x17f1   :  { %4959 = vrcp.f32 %v2004_v56 }
0x17fb   :  { %v4960_v25 = vpop.eup %4959 }
0x17fc   :  { %v2010_v24 = vmul.f32 %v4960_v25, %v2008_v28  ;;  %v2017_v62 = vsub.f32 1.0, %v4960_v25  ;;  %v2023_v32 = vmul.f32 %v4960_v25, %v5562_v13 }
0x17fe   :  { %2012 = vrot.lane.b32.xlu1 %v2010_v24, %s5098_s18 }
0x1870   :  { %v2013_v57 = vpop.permute.xlu1 %2012 }
0x1871   :  { %v2015_v58 = vadd.f32 %v2013_v57, %v1996_v16 }
0x1873   :  { %4961 = vtanh.f32 %v2015_v58 }
0x187d   :  { %v4962_v59 = vpop.eup %4961 }
0x187e   :  { %2019 = vrot.lane.b32.xlu1 %v4962_v59, %s5096_s15 }
0x18f0   :  { %v2020_v60 = vpop.permute.xlu1 %2019 }
0x18f1   :  { %v2022_v63 = vmul.f32 %v2020_v60, %v2017_v62 }
0x18f3   :  { %v5649_v0 = vadd.f32 %v2023_v32, %v2022_v63 }
0x18f5   :  { %2026 = vrot.lane.b32.xlu0 %v5649_v0, %s5096_s15 }
0x1967   :  { %v2027_v1 = vpop.permute.xlu0 %2026 }
0x1968   :  { %4556 = vmatmul.mubr.msk.f32.vlgmr.msra.gmra.mrb[14].mxu0 %vm83_vm1, %v2027_v1  ;;  %4567 = vmatmul.mubr.msk.f32.vlgmr.msra.gmra.mrb[16].mxu1 %vm83_vm1, %v2027_v1 }
0x1969   :  { %4810 = vmatpush3.bf16.msra.mxu0 %v5289_v18  ;;  %4577 = vmatprep.mubr.msk.f32.mxu0 %vm5092_vm0, %v5093_v7 }
0x196a   :  { %4811 = vmatprep.subr.bf16.mxu0 %v5091_v4  ;;  %4816 = vmatpush3.bf16.msra.mxu1 %v5330_v55 }
0x196b   :  { %4584 = vmatprep.mubr.msk.f32.mxu1 %vm5092_vm0, %v5093_v7  ;;  %4817 = vmatprep.subr.bf16.mxu1 %v5091_v4 }
0x196d   :  { %4813 = vmatpush3.bf16.msra.mxu0 %v5299_v21 }
0x196e   :  { %4823 = vmatprep.subr.bf16.mxu0 %v5091_v4 }
0x1a3b   :  { %v2096_v13 = vpop.f32.mrb[14].mxu0  ;;  %v2213_v2 = vpop.f32.mrb[16].mxu1 }
0x1a3c   :  { %v5671_v29 = vadd.f32 %v5668_v3, %v2213_v2  ;;  %v4557_v23 = vpop.f32.mrb[15].mxu0  ;;  %v4568_v6 = vpop.f32.mrb[17].mxu1  ;;  %v5709_v1 = vadd.f32 %v5415_v34, %v2096_v13 }
0x1a3e   :  { %v2224_v10 = vrot.slane %v5671_v29, %v5222_v17  ;;  %v2100_v2 = vsel %vm574_vm6, %v5709_v1, -inf }
0x1a40   :  { %v2225_v11 = vcombine.high %v2224_v10, %v2224_v10  ;;  %v2232_v12 = vrot.slane %v2224_v10, %v5222_v17 }
0x1a42   :  { %v2239_v27 = vrot.slane %v2225_v11, %v5222_v17  ;;  %v2243_v44 = vrot.slane %v2232_v12, %v5229_v22 }
0x1a44   :  { %v2247_v14 = vrot.slane %v2239_v27, %v5229_v22  ;;  %v2250_v19 = vadd.f32 %v5682_v20, %v2243_v44 }
0x1a46   :  { %v2251_v33 = vadd.f32 %v5688_v31, %v2247_v14  ;;  %4963 = vtanh.f32 %v2250_v19 }
0x1a48   :  { %4965 = vtanh.f32 %v2251_v33 }
0x1a50   :  { %v4964_v36 = vpop.eup %4963 }
0x1a51   :  { %v2254_v41 = vmul.f32 %v5694_v37, %v4964_v36 }
0x1a52   :  { %v4966_v38 = vpop.eup %4965 }
0x1a53   :  { %v2256_v45 = vsel %vm83_vm1, %v2254_v41, 0.0  ;;  %v2255_v46 = vmul.f32 %v5694_v37, %v4966_v38 }
0x1a54   :  { %2257 = vadd.xlane.f32.xlu1 %v2256_v45 }
0x1a55   :  { %v2259_v47 = vsel %vm83_vm1, %v2255_v46, 0.0 }
0x1a56   :  { %2260 = vadd.xlane.f32.xlu0 %v2259_v47 }
0x1ae1   :  { %v2258_v9 = vpop.xlane.xlu1 %2257 }
0x1ae2   :  { %v2262_v16 = vadd.f32 %v2258_v9, %v5258_v40 }
0x1ae3   :  { %v2261_v49 = vpop.xlane.xlu0 %2260 }
0x1ae4   :  { %v2263_v50 = vadd.f32 %v2261_v49, %v5258_v40  ;;  %v2269_v53 = vrot.slane %v2262_v16, %v5261_v42 }
0x1ae6   :  { %v2273_v54 = vrot.slane %v2263_v50, %v5261_v42 }
0x1ae8   :  { %v2274_v56 = vsel %vm221_vm2, %v2273_v54, %v2269_v53  ;;  %v5732_v54 = vld [vmem:[%s6128_s0 + $0x8] sm:$0xff] }
0x1ae9   :  { %v2276_v25 = vsel %vm224_vm3, %v2274_v56, -inf }
0x1aea   :  { %2277 = vmax.xlane.f32.xlu1 %v2276_v25 }
0x1b77   :  { %v2278_v28 = vpop.xlane.xlu1 %2277 }
0x1b78   :  { %v2283_v24 = vrot.slane %v2278_v28, %v5229_v22  ;;  %v2287_v57 = vrot.slane %v2278_v28, %v5269_v51 }
0x1b7a   :  { %v2290_v58 = vsub.f32 %v2262_v16, %v2283_v24  ;;  %v2291_v59 = vsub.f32 %v2263_v50, %v2287_v57 }
0x1b7c   :  { %v2292_v62 = vmul.f32 1.442695, %v2290_v58  ;;  %v2294_v60 = vmul.f32 1.442695, %v2291_v59 }
0x1b7e   :  { %4967 = vpow2.f32 %v2292_v62 }
0x1b7f   :  { %4969 = vpow2.f32 %v2294_v60 }
0x1b88   :  { %v4968_v32 = vpop.eup %4967 }
0x1b89   :  { %v4970_v63 = vpop.eup %4969  ;;  %2299 = vperm.xlu1 %4897, %v4968_v32  }
0x1b8a   :  { %2302 = vperm.xlu0 %4898, %v4970_v63  }
0x1bad   :  { %2101 = vmax.xlane.f32.xlu1 %v2100_v2 }
0x1c08   :  { %v2300_v23 = vpop.permute.xlu1 %2299 }
0x1c09   :  { %v2303_v6 = vpop.permute.xlu0 %2302  ;;  %v2307_v10 = vrot.slane %v2300_v23, %v5261_v42 }
0x1c0a   :  { %v2311_v11 = vrot.slane %v2303_v6, %v5261_v42 }
0x1c0c   :  { %v2312_v12 = vsel %vm221_vm2, %v2311_v11, %v2307_v10 }
0x1c0d   :  { %v2314_v27 = vsel %vm224_vm3, %v2312_v12, 0.0 }
0x1c0e   :  { %2315 = vadd.xlane.f32.xlu0 %v2314_v27 }
0x1c3a   :  { %v5717_v44 = vpop.xlane.xlu1 %2101 }
0x1c3b   :  { %vm2127_vm4 = vcmp.ge.f32.partialorder %v5709_v1, %v5717_v44 }
0x1c3c   :  { %v2128_v34 = vsel %vm2127_vm4, %v5256_v39, 16 }
0x1c3d   :  { %v2129_v13 = vsel %vm574_vm6, %v2128_v34, 2147483647 }
0x1c3e   :  { %v2131_v14 = vshra.s32 %v2129_v13, 16  ;;  %v2130_v47 = vand.u32 65535, %v2129_v13 }
0x1c40   :  { %v2133_v19 = vcvt.s32.f32 %v2131_v14  ;;  %v2132_v16 = vcvt.s32.f32 %v2130_v47 }
0x1c42   :  { %2134 = vmin.xlane.f32.xlu1 %v2133_v19 }
0x1c9b   :  { %v2316_v33 = vpop.xlane.xlu0 %2315 }
0x1c9c   :  { %4971 = vrcp.f32 %v2316_v33 }
0x1ca6   :  { %v4972_v36 = vpop.eup %4971 }
0x1ca7   :  { %v2326_v41 = vrot.slane %v4972_v36, %v5269_v51  ;;  %v2322_v38 = vrot.slane %v4972_v36, %v5229_v22 }
0x1ca9   :  { %v2330_v45 = vmul.f32 %v4970_v63, %v2326_v41  ;;  %v2329_v46 = vmul.f32 %v4968_v32, %v2322_v38 }
0x1cab   :  { %2338 = vperm.xlu0 %4898, %v2330_v45   ;;  %2333 = vperm.xlu1 %4897, %v2329_v46  }
0x1caf   :  { %2506 = vrot.lane.b32.xlu0 %v5671_v29, %s5096_s15 }
0x1cb3   :  { %2516 = vrot.lane.b32.xlu0 %v5671_v29, %s5097_s16  ;;  %v5739_v29 = vld [vmem:[%s6128_s0] sm:$0xff] }
0x1ccf   :  { %v2135_v9 = vpop.xlane.xlu1 %2134 }
0x1cd0   :  { %vm2136_vm7 = vcmp.eq.f32.partialorder %v2133_v19, %v2135_v9  ;;  %v2141_v14 = vcvt.f32.s32 %v2135_v9 }
0x1cd1   :  { %v2137_v49 = vsel %vm2136_vm7, %v2132_v16, inf }
0x1cd2   :  { %2138 = vmin.xlane.f32.xlu1 %v2137_v49  ;;  %v2142_v33 = vshll.u32 %v2141_v14, 16  ;;  %v5770_v49 = vld [vmem:[%s6137_s9] ss:$0 sm:$0xff] }
0x1d2a   :  { %v2339_v50 = vpop.permute.xlu0 %2338  ;;  %v2334_v53 = vpop.permute.xlu1 %2333 }
0x1d2b   :  { %v2342_v56 = vmul.f32 %v5732_v54, %v2339_v50  ;;  %v2631_v25 = vrot.slane %v2339_v50, %v5261_v42  ;;  %v2341_v28 = vmul.f32 %v5739_v29, %v2334_v53  ;;  %v2627_v24 = vrot.slane %v2334_v53, %v5261_v42 }
0x1d2d   :  { %v2350_v57 = vsel %vm83_vm1, %v2342_v56, 0.0  ;;  %v2343_v58 = vsel %vm83_vm1, %v2341_v28, 0.0  ;;  %v2632_v59 = vsel %vm221_vm2, %v2631_v25, %v2627_v24 }
0x1d2e   :  { %v2351_v62 = vrot.slane %v2350_v57, 4  ;;  %v2344_v60 = vrot.slane %v2343_v58, 4  ;;  %4229 = vst.msk [vmem:[%s6141_s13 + $0x8] sm:$0x3] %vm224_vm3, %v2632_v59  ;;  %v2507_v53 = vpop.permute.xlu0 %2506 }
0x1d30   :  { %v2352_v32 = vadd.f32 %v2351_v62, %v2350_v57  ;;  %v2345_v63 = vadd.f32 %v2344_v60, %v2343_v58 }
0x1d32   :  { %v2353_v2 = vrot.slane %v2352_v32, 2  ;;  %v2346_v23 = vrot.slane %v2345_v63, 2  ;;  %v2517_v58 = vpop.permute.xlu0 %2516 }
0x1d34   :  { %v2354_v6 = vadd.f32 %v2353_v2, %v2352_v32  ;;  %v2347_v10 = vadd.f32 %v2346_v23, %v2345_v63 }
0x1d36   :  { %v2355_v11 = vrot.slane %v2354_v6, 1  ;;  %v2348_v12 = vrot.slane %v2347_v10, 1 }
0x1d38   :  { %v2356_v27 = vadd.f32 %v2355_v11, %v2354_v6  ;;  %v2349_v34 = vadd.f32 %v2348_v12, %v2347_v10 }
0x1d3a   :  { %v2359_v13 = vsel %vm221_vm2, %v2356_v27, %v2349_v34 }
0x1d3b   :  { %4578 = vmatmul.mubr.msk.f32.vlgmr.msra.gmra.mrb[16].mxu0 %vm83_vm1, %v2359_v13 }
0x1d3c   :  { %4825 = vmatpush3.bf16.msra.mxu0 %v5188_v5  ;;  %4606 = vmatprep.mubr.msk.f32.mxu0 %vm5092_vm0, %v5093_v7 }
0x1d3d   :  { %4826 = vmatprep.subr.bf16.mxu0 %v5091_v4 }
0x1d40   :  { %4828 = vmatpush3.bf16.msra.mxu0 %v5199_v8 }
0x1d41   :  { %4835 = vmatprep.subr.bf16.mxu0 %v5091_v4 }
0x1d5f   :  { %v2139_v19 = vpop.xlane.xlu1 %2138 }
0x1d60   :  { %v2140_v36 = vcvt.f32.s32 %v2139_v19 }
0x1d62   :  { %v2143_v41 = vadd.s32 %v2142_v33, %v2140_v36 }
0x1d64   :  { %vm2144_vm8 = vcmp.eq.s32.totalorder %v5256_v39, %v2143_v41 }
0x1d65   :  { %v4222_v38 = vsel %vm2144_vm8, 1.0, %v5093_v7 }
0x1d66   :  { %4585 = vmatmul.mubr.msk.f32.vlgmr.msra.gmra.mrb[18].mxu1 %vm381_vm5, %v4222_v38 }
0x1d67   :  { %4819 = vmatpush3.bf16.msra.mxu1 %v5359_v26  ;;  %4595 = vmatprep.mubr.msk.f32.mxu1 %vm5092_vm0, %v5093_v7 }
0x1d68   :  { %4820 = vmatprep.subr.bf16.mxu1 %v5091_v4 }
0x1d6b   :  { %4822 = vmatpush3.bf16.msra.mxu1 %v5365_v30 }
0x1d6c   :  { %4829 = vmatprep.subr.bf16.mxu1 %v5091_v4 }
0x1e0e   :  { %v2428_v45 = vpop.f32.mrb[16].mxu0 }
0x1e0f   :  { %v4579_v46 = vpop.f32.mrb[17].mxu0 }
0x1e39   :  { %v2501_v47 = vpop.f32.mrb[18].mxu1 }
0x1e3a   :  { %v2502_v9 = vadd.f32 %v2501_v47, %v2428_v45  ;;  %v4586_v16 = vpop.f32.mrb[19].mxu1 }
0x1e3c   :  { %v2505_v50 = vadd.f32 %v5770_v49, %v2502_v9 }
0x1e3e   :  { %v2509_v56 = vadd.f32 %v2507_v53, %v2505_v50 }
0x1e40   :  { %v4226_v25 = vmul.f32 -1.442695, %v2509_v56 }
0x1e42   :  { %4973 = vpow2.f32 %v4226_v25 }
0x1e4c   :  { %v4974_v28 = vpop.eup %4973 }
0x1e4d   :  { %v2513_v24 = vadd.f32 1.0, %v4974_v28 }
0x1e4f   :  { %4975 = vrcp.f32 %v2513_v24 }
0x1e59   :  { %v4976_v57 = vpop.eup %4975 }
0x1e5a   :  { %v2519_v59 = vmul.f32 %v4976_v57, %v2517_v58  ;;  %v2526_v63 = vsub.f32 1.0, %v4976_v57  ;;  %v2532_v23 = vmul.f32 %v4976_v57, %v5649_v0 }
0x1e5c   :  { %2521 = vrot.lane.b32.xlu0 %v2519_v59, %s5098_s18 }
0x1ece   :  { %v2522_v62 = vpop.permute.xlu0 %2521 }
0x1ecf   :  { %v2524_v60 = vadd.f32 %v2522_v62, %v2505_v50  ;;  %v5804_v50 = vld [vmem:[%s6139_s11] ss:$0 sm:$0xff] }
0x1ed1   :  { %4977 = vtanh.f32 %v2524_v60 }
0x1edb   :  { %v4978_v32 = vpop.eup %4977 }
0x1edc   :  { %2528 = vrot.lane.b32.xlu0 %v4978_v32, %s5096_s15 }
0x1f4e   :  { %v2529_v2 = vpop.permute.xlu0 %2528 }
0x1f4f   :  { %v2531_v6 = vmul.f32 %v2529_v2, %v2526_v63 }
0x1f51   :  { %v5776_v10 = vadd.f32 %v2532_v23, %v2531_v6 }
0x1f53   :  { %2535 = vrot.lane.b32.xlu0 %v5776_v10, %s5096_s15 }
0x1fc5   :  { %v2536_v11 = vpop.permute.xlu0 %2535 }
0x1fc6   :  { %4596 = vmatmul.mubr.msk.f32.vlgmr.msra.gmra.mrb[20].mxu1 %vm83_vm1, %v2536_v11  ;;  %4607 = vmatmul.mubr.msk.f32.vlgmr.msra.gmra.mrb[18].mxu0 %vm83_vm1, %v2536_v11 }
0x1fc7   :  { %4831 = vmatpush3.bf16.msra.mxu1 %v5289_v18  ;;  %4617 = vmatprep.mubr.msk.f32.mxu1 %vm5092_vm0, %v5093_v7 }
0x1fc8   :  { %4832 = vmatprep.subr.bf16.mxu1 %v5091_v4  ;;  %4837 = vmatpush3.bf16.msra.mxu0 %v5330_v55 }
0x1fc9   :  { %4624 = vmatprep.mubr.msk.f32.mxu0 %vm5092_vm0, %v5093_v7  ;;  %4838 = vmatprep.subr.bf16.mxu0 %v5091_v4 }
0x1fcb   :  { %4834 = vmatpush3.bf16.msra.mxu1 %v5299_v21 }
0x1fcc   :  { %4844 = vmatprep.subr.bf16.mxu1 %v5091_v4 }
0x2099   :  { %v2605_v0 = vpop.f32.mrb[20].mxu1  ;;  %v2722_v12 = vpop.f32.mrb[18].mxu0 }
0x209a   :  { %v2723_v27 = vadd.f32 %v5668_v3, %v2722_v12  ;;  %v4597_v34 = vpop.f32.mrb[21].mxu1  ;;  %v4608_v13 = vpop.f32.mrb[19].mxu0  ;;  %v5807_v53 = vadd.f32 %v5804_v50, %v2605_v0 }
0x209c   :  { %v2733_v14 = vrot.slane %v2723_v27, %v5222_v17  ;;  %v2609_v24 = vsel %vm574_vm6, %v5807_v53, -inf }
0x209e   :  { %v2734_v19 = vcombine.high %v2733_v14, %v2733_v14  ;;  %v2741_v33 = vrot.slane %v2733_v14, %v5222_v17 }
0x20a0   :  { %v2748_v36 = vrot.slane %v2734_v19, %v5222_v17  ;;  %v2752_v41 = vrot.slane %v2741_v33, %v5229_v22 }
0x20a2   :  { %v2756_v38 = vrot.slane %v2748_v36, %v5229_v22  ;;  %v2759_v45 = vadd.f32 %v5682_v20, %v2752_v41 }
0x20a4   :  { %v2760_v46 = vadd.f32 %v5688_v31, %v2756_v38  ;;  %4979 = vtanh.f32 %v2759_v45 }
0x20a6   :  { %4981 = vtanh.f32 %v2760_v46 }
0x20ae   :  { %v4980_v47 = vpop.eup %4979 }
0x20af   :  { %v2763_v9 = vmul.f32 %v5694_v37, %v4980_v47 }
0x20b0   :  { %v4982_v16 = vpop.eup %4981 }
0x20b1   :  { %v2765_v56 = vsel %vm83_vm1, %v2763_v9, 0.0  ;;  %v2764_v25 = vmul.f32 %v5694_v37, %v4982_v16 }
0x20b2   :  { %2766 = vadd.xlane.f32.xlu0 %v2765_v56 }
0x20b3   :  { %v2768_v28 = vsel %vm83_vm1, %v2764_v25, 0.0 }
0x20b4   :  { %2769 = vadd.xlane.f32.xlu1 %v2768_v28 }
0x20b6   :  { %2610 = vmax.xlane.f32.xlu0 %v2609_v24 }
0x213f   :  { %v2767_v57 = vpop.xlane.xlu0 %2766 }
0x2140   :  { %v2771_v58 = vadd.f32 %v2767_v57, %v5258_v40 }
0x2141   :  { %v2770_v59 = vpop.xlane.xlu1 %2769 }
0x2142   :  { %v2772_v62 = vadd.f32 %v2770_v59, %v5258_v40  ;;  %v2778_v32 = vrot.slane %v2771_v58, %v5261_v42 }
0x2143   :  { %v5816_v60 = vpop.xlane.xlu0 %2610 }
0x2144   :  { %v2782_v63 = vrot.slane %v2772_v62, %v5261_v42  ;;  %vm2636_vm9 = vcmp.ge.f32.partialorder %v5807_v53, %v5816_v60 }
0x2145   :  { %v2637_v2 = vsel %vm2636_vm9, %v5256_v39, 16 }
0x2146   :  { %v2783_v23 = vsel %vm221_vm2, %v2782_v63, %v2778_v32  ;;  %v2638_v6 = vsel %vm574_vm6, %v2637_v2, 2147483647 }
0x2147   :  { %v2785_v11 = vsel %vm224_vm3, %v2783_v23, -inf  ;;  %v2640_v0 = vshra.s32 %v2638_v6, 16  ;;  %v2639_v32 = vand.u32 65535, %v2638_v6 }
0x2148   :  { %2786 = vmax.xlane.f32.xlu1 %v2785_v11 }
0x2149   :  { %v2642_v12 = vcvt.s32.f32 %v2640_v0  ;;  %v2641_v2 = vcvt.s32.f32 %v2639_v32 }
0x214b   :  { %2643 = vmin.xlane.f32.xlu0 %v2642_v12 }
0x21d5   :  { %v2787_v34 = vpop.xlane.xlu1 %2786 }
0x21d6   :  { %v2792_v13 = vrot.slane %v2787_v34, %v5229_v22  ;;  %v2796_v14 = vrot.slane %v2787_v34, %v5269_v51 }
0x21d8   :  { %v2799_v19 = vsub.f32 %v2771_v58, %v2792_v13  ;;  %v2800_v33 = vsub.f32 %v2772_v62, %v2796_v14  ;;  %v2644_v63 = vpop.xlane.xlu0 %2643 }
0x21d9   :  { %vm2645_vm10 = vcmp.eq.f32.partialorder %v2642_v12, %v2644_v63 }
0x21da   :  { %v2801_v36 = vmul.f32 1.442695, %v2799_v19  ;;  %v2803_v41 = vmul.f32 1.442695, %v2800_v33  ;;  %v2646_v23 = vsel %vm2645_vm10, %v2641_v2, inf }
0x21dc   :  { %4983 = vpow2.f32 %v2801_v36 }
0x21dd   :  { %4985 = vpow2.f32 %v2803_v41 }
0x21e6   :  { %v4984_v38 = vpop.eup %4983 }
0x21e7   :  { %2808 = vperm.xlu1 %4897, %v4984_v38   ;;  %v4986_v45 = vpop.eup %4985 }
0x21eb   :  { %2811 = vperm.xlu1 %4897, %v4986_v45  }
0x2266   :  { %v2809_v46 = vpop.permute.xlu1 %2808 }
0x2267   :  { %v2816_v9 = vrot.slane %v2809_v46, %v5261_v42 }
0x226a   :  { %v2812_v47 = vpop.permute.xlu1 %2811 }
0x226b   :  { %v2820_v16 = vrot.slane %v2812_v47, %v5261_v42 }
0x226d   :  { %v2821_v56 = vsel %vm221_vm2, %v2820_v16, %v2816_v9 }
0x226e   :  { %v2823_v25 = vsel %vm224_vm3, %v2821_v56, 0.0 }
0x226f   :  { %2824 = vadd.xlane.f32.xlu1 %v2823_v25 }
0x2280   :  { %3015 = vrot.lane.b32.xlu1 %v2723_v27, %s5096_s15 }
0x2284   :  { %3025 = vrot.lane.b32.xlu1 %v2723_v27, %s5097_s16 }
0x22fc   :  { %v2825_v28 = vpop.xlane.xlu1 %2824 }
0x22fd   :  { %4987 = vrcp.f32 %v2825_v28 }
0x2307   :  { %v4988_v24 = vpop.eup %4987 }
0x2308   :  { %v2831_v57 = vrot.slane %v4988_v24, %v5229_v22  ;;  %v2835_v59 = vrot.slane %v4988_v24, %v5269_v51 }
0x230a   :  { %v2838_v58 = vmul.f32 %v4984_v38, %v2831_v57  ;;  %v2839_v62 = vmul.f32 %v4986_v45, %v2835_v59  ;;  %v2650_v57 = vcvt.f32.s32 %v2644_v63 }
0x230c   :  { %2842 = vperm.xlu0 %4898, %v2838_v58   ;;  %v2651_v59 = vshll.u32 %v2650_v57, 16 }
0x2310   :  { %2847 = vperm.xlu0 %4898, %v2839_v62  }
0x232f   :  { %2647 = vmin.xlane.f32.xlu0 %v2646_v23 }
0x238b   :  { %v2843_v11 = vpop.permute.xlu0 %2842 }
0x238c   :  { %v2850_v27 = vmul.f32 %v5739_v29, %v2843_v11  ;;  %v3136_v14 = vrot.slane %v2843_v11, %v5261_v42 }
0x238e   :  { %v2852_v0 = vsel %vm83_vm1, %v2850_v27, 0.0 }
0x238f   :  { %v2853_v34 = vrot.slane %v2852_v0, 4  ;;  %v2848_v13 = vpop.permute.xlu0 %2847 }
0x2390   :  { %v2851_v19 = vmul.f32 %v5732_v54, %v2848_v13  ;;  %v3140_v33 = vrot.slane %v2848_v13, %v5261_v42  ;;  %v3016_v13 = vpop.permute.xlu1 %3015 }
0x2391   :  { %v2854_v36 = vadd.f32 %v2853_v34, %v2852_v0 }
0x2392   :  { %v2859_v6 = vsel %vm83_vm1, %v2851_v19, 0.0  ;;  %v3141_v12 = vsel %vm221_vm2, %v3140_v33, %v3136_v14 }
0x2393   :  { %v2855_v41 = vrot.slane %v2854_v36, 2  ;;  %v2860_v38 = vrot.slane %v2859_v6, 4  ;;  %4237 = vst.msk [vmem:[%s6141_s13 + $0xa] sm:$0x3] %vm224_vm3, %v3141_v12 }
0x2394   :  { %v3026_v12 = vpop.permute.xlu1 %3025 }
0x2395   :  { %v2856_v45 = vadd.f32 %v2855_v41, %v2854_v36  ;;  %v2861_v46 = vadd.f32 %v2860_v38, %v2859_v6 }
0x2397   :  { %v2862_v47 = vrot.slane %v2861_v46, 2  ;;  %v2857_v9 = vrot.slane %v2856_v45, 1 }
0x2399   :  { %v2863_v16 = vadd.f32 %v2862_v47, %v2861_v46  ;;  %v2858_v25 = vadd.f32 %v2857_v9, %v2856_v45 }
0x239b   :  { %v2864_v56 = vrot.slane %v2863_v16, 1 }
0x239d   :  { %v2865_v28 = vadd.f32 %v2864_v56, %v2863_v16 }
0x239f   :  { %v2868_v24 = vsel %vm221_vm2, %v2865_v28, %v2858_v25 }
0x23a0   :  { %4618 = vmatmul.mubr.msk.f32.vlgmr.msra.gmra.mrb[22].mxu1 %vm83_vm1, %v2868_v24 }
0x23a1   :  { %4846 = vmatpush3.bf16.msra.mxu1 %v5188_v5  ;;  %4646 = vmatprep.mubr.msk.f32.mxu1 %vm5092_vm0, %v5093_v7 }
0x23a2   :  { %4847 = vmatprep.subr.bf16.mxu1 %v5091_v4 }
0x23a5   :  { %4849 = vmatpush3.bf16.msra.mxu1 %v5199_v8 }
0x23a6   :  { %4856 = vmatprep.subr.bf16.mxu1 %v5091_v4 }
0x23bc   :  { %v2648_v58 = vpop.xlane.xlu0 %2647 }
0x23bd   :  { %v2649_v62 = vcvt.f32.s32 %v2648_v58 }
0x23bf   :  { %v2652_v32 = vadd.s32 %v2651_v59, %v2649_v62 }
0x23c1   :  { %vm2653_vm11 = vcmp.eq.s32.totalorder %v5256_v39, %v2652_v32 }
0x23c2   :  { %v4230_v2 = vsel %vm2653_vm11, 1.0, %v5093_v7 }
0x23c3   :  { %4625 = vmatmul.mubr.msk.f32.vlgmr.msra.gmra.mrb[20].mxu0 %vm381_vm5, %v4230_v2 }
0x23c4   :  { %4840 = vmatpush3.bf16.msra.mxu0 %v5359_v26  ;;  %4635 = vmatprep.mubr.msk.f32.mxu0 %vm5092_vm0, %v5093_v7 }
0x23c5   :  { %4841 = vmatprep.subr.bf16.mxu0 %v5091_v4 }
0x23c8   :  { %4843 = vmatpush3.bf16.msra.mxu0 %v5365_v30 }
0x23c9   :  { %4850 = vmatprep.subr.bf16.mxu0 %v5091_v4 }
0x2473   :  { %v2937_v63 = vpop.f32.mrb[22].mxu1 }
0x2474   :  { %v4619_v23 = vpop.f32.mrb[23].mxu1 }
0x2496   :  { %v3010_v11 = vpop.f32.mrb[20].mxu0 }
0x2497   :  { %v3011_v27 = vadd.f32 %v3010_v11, %v2937_v63  ;;  %v4626_v0 = vpop.f32.mrb[21].mxu0 }
0x2499   :  { %v3014_v34 = vadd.f32 %v5770_v49, %v3011_v27 }
0x249b   :  { %v3018_v14 = vadd.f32 %v3016_v13, %v3014_v34 }
0x249d   :  { %v4234_v19 = vmul.f32 -1.442695, %v3018_v14 }
0x249f   :  { %4989 = vpow2.f32 %v4234_v19 }
0x24a9   :  { %v4990_v33 = vpop.eup %4989 }
0x24aa   :  { %v3022_v36 = vadd.f32 1.0, %v4990_v33 }
0x24ac   :  { %4991 = vrcp.f32 %v3022_v36 }
0x24b6   :  { %v4992_v6 = vpop.eup %4991 }
0x24b7   :  { %v3028_v41 = vmul.f32 %v4992_v6, %v3026_v12  ;;  %v3035_v47 = vsub.f32 1.0, %v4992_v6  ;;  %v3041_v16 = vmul.f32 %v4992_v6, %v5776_v10 }
0x24b9   :  { %3030 = vrot.lane.b32.xlu1 %v3028_v41, %s5098_s18 }
0x252b   :  { %v3031_v38 = vpop.permute.xlu1 %3030 }
0x252c   :  { %v3033_v45 = vadd.f32 %v3031_v38, %v3014_v34 }
0x252e   :  { %4993 = vtanh.f32 %v3033_v45 }
0x2538   :  { %v4994_v46 = vpop.eup %4993 }
0x2539   :  { %3037 = vrot.lane.b32.xlu1 %v4994_v46, %s5096_s15 }
0x25ab   :  { %v3038_v9 = vpop.permute.xlu1 %3037 }
0x25ac   :  { %v3040_v56 = vmul.f32 %v3038_v9, %v3035_v47 }
0x25ae   :  { %v5868_v25 = vadd.f32 %v3041_v16, %v3040_v56 }
0x25b0   :  { %3044 = vrot.lane.b32.xlu0 %v5868_v25, %s5096_s15 }
0x2622   :  { %v3045_v28 = vpop.permute.xlu0 %3044 }
0x2623   :  { %4636 = vmatmul.mubr.msk.f32.vlgmr.msra.gmra.mrb[22].mxu0 %vm83_vm1, %v3045_v28  ;;  %4647 = vmatmul.mubr.msk.f32.vlgmr.msra.gmra.mrb[24].mxu1 %vm83_vm1, %v3045_v28 }
0x2624   :  { %4852 = vmatpush3.bf16.msra.mxu0 %v5289_v18  ;;  %4657 = vmatprep.mubr.msk.f32.mxu0 %vm5092_vm0, %v5093_v7 }
0x2625   :  { %4853 = vmatprep.subr.bf16.mxu0 %v5091_v4  ;;  %4858 = vmatpush3.bf16.msra.mxu1 %v5330_v55 }
0x2626   :  { %4664 = vmatprep.mubr.msk.f32.mxu1 %vm5092_vm0, %v5093_v7  ;;  %4859 = vmatprep.subr.bf16.mxu1 %v5091_v4 }
0x2628   :  { %4855 = vmatpush3.bf16.msra.mxu0 %v5299_v21 }
0x2629   :  { %4865 = vmatprep.subr.bf16.mxu0 %v5091_v4 }
0x26f6   :  { %v3114_v10 = vpop.f32.mrb[22].mxu0  ;;  %v3231_v24 = vpop.f32.mrb[24].mxu1 }
0x26f7   :  { %v5885_v57 = vadd.f32 %v5668_v3, %v3231_v24  ;;  %v4637_v58 = vpop.f32.mrb[23].mxu0  ;;  %v4648_v59 = vpop.f32.mrb[25].mxu1 }
0x26f9   :  { %v3242_v62 = vrot.slane %v5885_v57, %v5222_v17 }
0x26fb   :  { %v3243_v32 = vcombine.high %v3242_v62, %v3242_v62  ;;  %v3250_v2 = vrot.slane %v3242_v62, %v5222_v17 }
0x26fd   :  { %v3257_v63 = vrot.slane %v3243_v32, %v5222_v17  ;;  %v3261_v23 = vrot.slane %v3250_v2, %v5229_v22 }
0x26ff   :  { %v3265_v11 = vrot.slane %v3257_v63, %v5229_v22  ;;  %v3268_v27 = vadd.f32 %v5682_v20, %v3261_v23  ;;  %v5908_v63 = vadd.f32 %v5804_v50, %v3114_v10 }
0x2701   :  { %v3269_v0 = vadd.f32 %v5688_v31, %v3265_v11  ;;  %4995 = vtanh.f32 %v3268_v27  ;;  %v3118_v23 = vsel %vm574_vm6, %v5908_v63, -inf }
0x2703   :  { %4997 = vtanh.f32 %v3269_v0 }
0x270b   :  { %v4996_v34 = vpop.eup %4995 }
0x270c   :  { %v3272_v13 = vmul.f32 %v5694_v37, %v4996_v34 }
0x270d   :  { %v4998_v14 = vpop.eup %4997 }
0x270e   :  { %v3274_v19 = vsel %vm83_vm1, %v3272_v13, 0.0  ;;  %v3273_v33 = vmul.f32 %v5694_v37, %v4998_v14 }
0x270f   :  { %3275 = vadd.xlane.f32.xlu1 %v3274_v19 }
0x2710   :  { %v3277_v36 = vsel %vm83_vm1, %v3273_v33, 0.0 }
0x2711   :  { %3278 = vadd.xlane.f32.xlu0 %v3277_v36 }
0x279c   :  { %v3276_v6 = vpop.xlane.xlu1 %3275 }
0x279d   :  { %v3280_v12 = vadd.f32 %v3276_v6, %v5258_v40 }
0x279e   :  { %v3279_v41 = vpop.xlane.xlu0 %3278 }
0x279f   :  { %v3281_v38 = vadd.f32 %v3279_v41, %v5258_v40  ;;  %v3287_v45 = vrot.slane %v3280_v12, %v5261_v42 }
0x27a1   :  { %v3291_v46 = vrot.slane %v3281_v38, %v5261_v42 }
0x27a3   :  { %v3292_v47 = vsel %vm221_vm2, %v3291_v46, %v3287_v45 }
0x27a4   :  { %v3294_v9 = vsel %vm224_vm3, %v3292_v47, -inf }
0x27a5   :  { %3295 = vmax.xlane.f32.xlu1 %v3294_v9 }
0x2832   :  { %v3296_v16 = vpop.xlane.xlu1 %3295 }
0x2833   :  { %v3301_v56 = vrot.slane %v3296_v16, %v5229_v22  ;;  %v3305_v28 = vrot.slane %v3296_v16, %v5269_v51 }
0x2835   :  { %v3308_v24 = vsub.f32 %v3280_v12, %v3301_v56  ;;  %v3309_v58 = vsub.f32 %v3281_v38, %v3305_v28 }
0x2837   :  { %v3310_v59 = vmul.f32 1.442695, %v3308_v24  ;;  %v3312_v62 = vmul.f32 1.442695, %v3309_v58 }
0x2839   :  { %4999 = vpow2.f32 %v3310_v59 }
0x283a   :  { %5001 = vpow2.f32 %v3312_v62 }
0x2843   :  { %v5000_v32 = vpop.eup %4999 }
0x2844   :  { %v5002_v2 = vpop.eup %5001  ;;  %3317 = vperm.xlu1 %4897, %v5000_v32  }
0x2845   :  { %3320 = vperm.xlu0 %4898, %v5002_v2  }
0x2868   :  { %3119 = vmax.xlane.f32.xlu1 %v3118_v23 }
0x28c3   :  { %v3318_v11 = vpop.permute.xlu1 %3317 }
0x28c4   :  { %v3321_v27 = vpop.permute.xlu0 %3320  ;;  %v3325_v0 = vrot.slane %v3318_v11, %v5261_v42 }
0x28c5   :  { %v3329_v34 = vrot.slane %v3321_v27, %v5261_v42 }
0x28c7   :  { %v3330_v13 = vsel %vm221_vm2, %v3329_v34, %v3325_v0 }
0x28c8   :  { %v3332_v14 = vsel %vm224_vm3, %v3330_v13, 0.0 }
0x28c9   :  { %3333 = vadd.xlane.f32.xlu0 %v3332_v14 }
0x28f5   :  { %v5916_v19 = vpop.xlane.xlu1 %3119 }
0x28f6   :  { %vm3145_vm12 = vcmp.ge.f32.partialorder %v5908_v63, %v5916_v19 }
0x28f7   :  { %v3146_v10 = vsel %vm3145_vm12, %v5256_v39, 16 }
0x28f8   :  { %v3147_v33 = vsel %vm574_vm6, %v3146_v10, 2147483647 }
0x28f9   :  { %v3149_v36 = vshra.s32 %v3147_v33, 16  ;;  %v3148_v9 = vand.u32 65535, %v3147_v33 }
0x28fb   :  { %v3151_v6 = vcvt.s32.f32 %v3149_v36  ;;  %v3150_v56 = vcvt.s32.f32 %v3148_v9 }
0x28fd   :  { %3152 = vmin.xlane.f32.xlu1 %v3151_v6 }
0x2956   :  { %v3334_v12 = vpop.xlane.xlu0 %3333 }
0x2957   :  { %5003 = vrcp.f32 %v3334_v12 }
0x2961   :  { %v5004_v41 = vpop.eup %5003 }
0x2962   :  { %v3344_v38 = vrot.slane %v5004_v41, %v5269_v51  ;;  %v3340_v45 = vrot.slane %v5004_v41, %v5229_v22 }
0x2964   :  { %v3348_v46 = vmul.f32 %v5002_v2, %v3344_v38  ;;  %v3347_v47 = vmul.f32 %v5000_v32, %v3340_v45 }
0x2966   :  { %3356 = vperm.xlu0 %4898, %v3348_v46   ;;  %3351 = vperm.xlu1 %4897, %v3347_v47  }
0x296a   :  { %3524 = vrot.lane.b32.xlu0 %v5885_v57, %s5096_s15 }
0x296e   :  { %3534 = vrot.lane.b32.xlu0 %v5885_v57, %s5097_s16 }
0x298a   :  { %v3153_v16 = vpop.xlane.xlu1 %3152 }
0x298b   :  { %vm3154_vm13 = vcmp.eq.f32.partialorder %v3151_v6, %v3153_v16  ;;  %v3159_v46 = vcvt.f32.s32 %v3153_v16 }
0x298c   :  { %v3155_v28 = vsel %vm3154_vm13, %v3150_v56, inf }
0x298d   :  { %3156 = vmin.xlane.f32.xlu1 %v3155_v28  ;;  %v3160_v9 = vshll.u32 %v3159_v46, 16 }
0x29e5   :  { %v3357_v24 = vpop.permute.xlu0 %3356  ;;  %v3352_v58 = vpop.permute.xlu1 %3351 }
0x29e6   :  { %v3360_v59 = vmul.f32 %v5732_v54, %v3357_v24  ;;  %v3649_v62 = vrot.slane %v3357_v24, %v5261_v42  ;;  %v3359_v32 = vmul.f32 %v5739_v29, %v3352_v58  ;;  %v3645_v2 = vrot.slane %v3352_v58, %v5261_v42 }
0x29e8   :  { %v3368_v23 = vsel %vm83_vm1, %v3360_v59, 0.0  ;;  %v3361_v57 = vsel %vm83_vm1, %v3359_v32, 0.0  ;;  %v3650_v11 = vsel %vm221_vm2, %v3649_v62, %v3645_v2 }
0x29e9   :  { %v3369_v27 = vrot.slane %v3368_v23, 4  ;;  %v3362_v0 = vrot.slane %v3361_v57, 4  ;;  %4245 = vst.msk [vmem:[%s6141_s13 + $0xc] sm:$0x3] %vm224_vm3, %v3650_v11  ;;  %v3525_v32 = vpop.permute.xlu0 %3524 }
0x29eb   :  { %v3370_v34 = vadd.f32 %v3369_v27, %v3368_v23  ;;  %v3363_v13 = vadd.f32 %v3362_v0, %v3361_v57 }
0x29ed   :  { %v3371_v14 = vrot.slane %v3370_v34, 2  ;;  %v3364_v10 = vrot.slane %v3363_v13, 2  ;;  %v3535_v0 = vpop.permute.xlu0 %3534 }
0x29ef   :  { %v3372_v33 = vadd.f32 %v3371_v14, %v3370_v34  ;;  %v3365_v36 = vadd.f32 %v3364_v10, %v3363_v13 }
0x29f1   :  { %v3373_v6 = vrot.slane %v3372_v33, 1  ;;  %v3366_v12 = vrot.slane %v3365_v36, 1 }
0x29f3   :  { %v3374_v41 = vadd.f32 %v3373_v6, %v3372_v33  ;;  %v3367_v38 = vadd.f32 %v3366_v12, %v3365_v36 }
0x29f5   :  { %v3377_v45 = vsel %vm221_vm2, %v3374_v41, %v3367_v38 }
0x29f6   :  { %4658 = vmatmul.mubr.msk.f32.vlgmr.msra.gmra.mrb[24].mxu0 %vm83_vm1, %v3377_v45 }
0x29f7   :  { %4867 = vmatpush3.bf16.msra.mxu0 %v5188_v5  ;;  %4686 = vmatprep.mubr.msk.f32.mxu0 %vm5092_vm0, %v5093_v7 }
0x29f8   :  { %4868 = vmatprep.subr.bf16.mxu0 %v5091_v4 }
0x29fb   :  { %4870 = vmatpush3.bf16.msra.mxu0 %v5199_v8 }
0x29fc   :  { %4877 = vmatprep.subr.bf16.mxu0 %v5091_v4 }
0x2a1a   :  { %v3157_v47 = vpop.xlane.xlu1 %3156 }
0x2a1b   :  { %v3158_v56 = vcvt.f32.s32 %v3157_v47 }
0x2a1d   :  { %v3161_v28 = vadd.s32 %v3160_v9, %v3158_v56 }
0x2a1f   :  { %vm3162_vm14 = vcmp.eq.s32.totalorder %v5256_v39, %v3161_v28 }
0x2a20   :  { %v4238_v24 = vsel %vm3162_vm14, 1.0, %v5093_v7 }
0x2a21   :  { %4665 = vmatmul.mubr.msk.f32.vlgmr.msra.gmra.mrb[26].mxu1 %vm381_vm5, %v4238_v24 }
0x2a22   :  { %4861 = vmatpush3.bf16.msra.mxu1 %v5359_v26  ;;  %4675 = vmatprep.mubr.msk.f32.mxu1 %vm5092_vm0, %v5093_v7 }
0x2a23   :  { %4862 = vmatprep.subr.bf16.mxu1 %v5091_v4 }
0x2a26   :  { %4864 = vmatpush3.bf16.msra.mxu1 %v5365_v30 }
0x2a27   :  { %4871 = vmatprep.subr.bf16.mxu1 %v5091_v4 }
0x2ac9   :  { %v3446_v5 = vpop.f32.mrb[24].mxu0 }
0x2aca   :  { %v4659_v8 = vpop.f32.mrb[25].mxu0 }
0x2af4   :  { %v3519_v16 = vpop.f32.mrb[26].mxu1 }
0x2af5   :  { %v3520_v58 = vadd.f32 %v3519_v16, %v3446_v5  ;;  %v4666_v59 = vpop.f32.mrb[27].mxu1 }
0x2af7   :  { %v3523_v62 = vadd.f32 %v5770_v49, %v3520_v58 }
0x2af9   :  { %v3527_v2 = vadd.f32 %v3525_v32, %v3523_v62 }
0x2afb   :  { %v4242_v23 = vmul.f32 -1.442695, %v3527_v2 }
0x2afd   :  { %5005 = vpow2.f32 %v4242_v23 }
0x2b07   :  { %v5006_v57 = vpop.eup %5005 }
0x2b08   :  { %v3531_v11 = vadd.f32 1.0, %v5006_v57 }
0x2b0a   :  { %5007 = vrcp.f32 %v3531_v11 }
0x2b14   :  { %v5008_v27 = vpop.eup %5007 }
0x2b15   :  { %v3537_v34 = vmul.f32 %v5008_v27, %v3535_v0  ;;  %v3544_v33 = vsub.f32 1.0, %v5008_v27  ;;  %v3550_v6 = vmul.f32 %v5008_v27, %v5868_v25 }
0x2b17   :  { %3539 = vrot.lane.b32.xlu0 %v3537_v34, %s5098_s18 }
0x2b89   :  { %v3540_v13 = vpop.permute.xlu0 %3539 }
0x2b8a   :  { %v3542_v14 = vadd.f32 %v3540_v13, %v3523_v62 }
0x2b8c   :  { %5009 = vtanh.f32 %v3542_v14 }
0x2b96   :  { %v5010_v10 = vpop.eup %5009 }
0x2b97   :  { %3546 = vrot.lane.b32.xlu0 %v5010_v10, %s5096_s15 }
0x2c09   :  { %v3547_v36 = vpop.permute.xlu0 %3546 }
0x2c0a   :  { %v3549_v12 = vmul.f32 %v3547_v36, %v3544_v33 }
0x2c0c   :  { %v5960_v41 = vadd.f32 %v3550_v6, %v3549_v12 }
0x2c0e   :  { %3553 = vrot.lane.b32.xlu0 %v5960_v41, %s5096_s15 }
0x2c80   :  { %v3554_v38 = vpop.permute.xlu0 %3553 }
0x2c81   :  { %4676 = vmatmul.mubr.msk.f32.vlgmr.msra.gmra.mrb[28].mxu1 %vm83_vm1, %v3554_v38  ;;  %4687 = vmatmul.mubr.msk.f32.vlgmr.msra.gmra.mrb[26].mxu0 %vm83_vm1, %v3554_v38 }
0x2c82   :  { %4873 = vmatpush3.bf16.msra.mxu1 %v5289_v18  ;;  %4697 = vmatprep.mubr.msk.f32.mxu1 %vm5092_vm0, %v5093_v7 }
0x2c83   :  { %4874 = vmatprep.subr.bf16.mxu1 %v5091_v4  ;;  %4879 = vmatpush3.bf16.msra.mxu0 %v5330_v55 }
0x2c84   :  { %4704 = vmatprep.mubr.msk.f32.mxu0 %vm5092_vm0, %v5093_v7  ;;  %4880 = vmatprep.subr.bf16.mxu0 %v5091_v4 }
0x2c86   :  { %4876 = vmatpush3.bf16.msra.mxu1 %v5299_v21 }
0x2d54   :  { %v3623_v25 = vpop.f32.mrb[28].mxu1  ;;  %v3740_v45 = vpop.f32.mrb[26].mxu0 }
0x2d55   :  { %v3741_v46 = vadd.f32 %v5668_v3, %v3740_v45  ;;  %v4677_v47 = vpop.f32.mrb[29].mxu1  ;;  %v4688_v18 = vpop.f32.mrb[27].mxu0  ;;  %v5985_v59 = vadd.f32 %v5804_v50, %v3623_v25 }
0x2d57   :  { %v3751_v9 = vrot.slane %v3741_v46, %v5222_v17 }
0x2d59   :  { %v3752_v56 = vcombine.high %v3751_v9, %v3751_v9  ;;  %v3759_v28 = vrot.slane %v3751_v9, %v5222_v17 }
0x2d5b   :  { %v3766_v55 = vrot.slane %v3752_v56, %v5222_v17  ;;  %v3770_v24 = vrot.slane %v3759_v28, %v5229_v22 }
0x2d5d   :  { %v3774_v5 = vrot.slane %v3766_v55, %v5229_v22  ;;  %v3777_v8 = vadd.f32 %v5682_v20, %v3770_v24  ;;  %v3627_v20 = vsel %vm574_vm6, %v5985_v59, -inf }
0x2d5f   :  { %v3778_v21 = vadd.f32 %v5688_v31, %v3774_v5  ;;  %5011 = vtanh.f32 %v3777_v8 }
0x2d61   :  { %5013 = vtanh.f32 %v3778_v21 }
0x2d69   :  { %v5012_v3 = vpop.eup %5011 }
0x2d6a   :  { %v3781_v16 = vmul.f32 %v5694_v37, %v5012_v3 }
0x2d6b   :  { %v5014_v58 = vpop.eup %5013 }
0x2d6c   :  { %v3783_v62 = vsel %vm83_vm1, %v3781_v16, 0.0  ;;  %v3782_v17 = vmul.f32 %v5694_v37, %v5014_v58 }
0x2d6d   :  { %3784 = vadd.xlane.f32.xlu0 %v3783_v62 }
0x2d6e   :  { %v3786_v32 = vsel %vm83_vm1, %v3782_v17, 0.0 }
0x2d6f   :  { %3787 = vadd.xlane.f32.xlu1 %v3786_v32 }
0x2d71   :  { %3628 = vmax.xlane.f32.xlu0 %v3627_v20 }
0x2dfa   :  { %v3785_v31 = vpop.xlane.xlu0 %3784 }
0x2dfb   :  { %v3789_v2 = vadd.f32 %v3785_v31, %v5258_v40 }
0x2dfc   :  { %v3788_v23 = vpop.xlane.xlu1 %3787 }
0x2dfd   :  { %v3790_v57 = vadd.f32 %v3788_v23, %v5258_v40  ;;  %v3796_v27 = vrot.slane %v3789_v2, %v5261_v42 }
0x2dfe   :  { %v5994_v11 = vpop.xlane.xlu0 %3628 }
0x2dff   :  { %v3800_v37 = vrot.slane %v3790_v57, %v5261_v42  ;;  %vm3654_vm15 = vcmp.ge.f32.partialorder %v5985_v59, %v5994_v11 }
0x2e00   :  { %v3655_v0 = vsel %vm3654_vm15, %v5256_v39, 16 }
0x2e01   :  { %v3801_v34 = vsel %vm221_vm2, %v3800_v37, %v3796_v27  ;;  %v3656_v13 = vsel %vm574_vm6, %v3655_v0, 2147483647 }
0x2e02   :  { %v3803_v14 = vsel %vm224_vm3, %v3801_v34, -inf  ;;  %v3658_v10 = vshra.s32 %v3656_v13, 16  ;;  %v3657_v32 = vand.u32 65535, %v3656_v13 }
0x2e03   :  { %3804 = vmax.xlane.f32.xlu1 %v3803_v14 }
0x2e04   :  { %v3660_v40 = vcvt.s32.f32 %v3658_v10  ;;  %v3659_v20 = vcvt.s32.f32 %v3657_v32 }
0x2e06   :  { %3661 = vmin.xlane.f32.xlu0 %v3660_v40 }
0x2e90   :  { %v3805_v33 = vpop.xlane.xlu1 %3804 }
0x2e91   :  { %v3810_v36 = vrot.slane %v3805_v33, %v5229_v22  ;;  %v3814_v6 = vrot.slane %v3805_v33, %v5269_v51 }
0x2e93   :  { %v3817_v12 = vsub.f32 %v3789_v2, %v3810_v36  ;;  %v3818_v38 = vsub.f32 %v3790_v57, %v3814_v6  ;;  %v3662_v17 = vpop.xlane.xlu0 %3661 }
0x2e94   :  { %vm3663_vm4 = vcmp.eq.f32.partialorder %v3660_v40, %v3662_v17 }
0x2e95   :  { %v3819_v25 = vmul.f32 1.442695, %v3817_v12  ;;  %v3821_v45 = vmul.f32 1.442695, %v3818_v38  ;;  %v3664_v31 = vsel %vm3663_vm4, %v3659_v20, inf }
0x2e97   :  { %5015 = vpow2.f32 %v3819_v25  ;;  %v3668_v25 = vcvt.f32.s32 %v3662_v17 }
0x2e98   :  { %5017 = vpow2.f32 %v3821_v45 }
0x2ea1   :  { %v5016_v47 = vpop.eup %5015 }
0x2ea2   :  { %3826 = vperm.xlu1 %4897, %v5016_v47   ;;  %v5018_v18 = vpop.eup %5017 }
0x2ea6   :  { %3829 = vperm.xlu1 %4897, %v5018_v18  }
0x2f21   :  { %v3827_v9 = vpop.permute.xlu1 %3826 }
0x2f22   :  { %v3834_v28 = vrot.slane %v3827_v9, %v5261_v42 }
0x2f25   :  { %v3830_v56 = vpop.permute.xlu1 %3829 }
0x2f26   :  { %v3838_v55 = vrot.slane %v3830_v56, %v5261_v42 }
0x2f28   :  { %v3839_v24 = vsel %vm221_vm2, %v3838_v55, %v3834_v28 }
0x2f29   :  { %v3841_v5 = vsel %vm224_vm3, %v3839_v24, 0.0 }
0x2f2a   :  { %3842 = vadd.xlane.f32.xlu1 %v3841_v5 }
0x2f3b   :  { %4033 = vrot.lane.b32.xlu1 %v3741_v46, %s5096_s15 }
0x2f3f   :  { %4043 = vrot.lane.b32.xlu1 %v3741_v46, %s5097_s16 }
0x2fb7   :  { %v3843_v8 = vpop.xlane.xlu1 %3842 }
0x2fb8   :  { %5019 = vrcp.f32 %v3843_v8 }
0x2fc2   :  { %v5020_v21 = vpop.eup %5019 }
0x2fc3   :  { %v3849_v3 = vrot.slane %v5020_v21, %v5229_v22  ;;  %v3853_v58 = vrot.slane %v5020_v21, %v5269_v51  ;;  %v4034_v21 = vpop.permute.xlu1 %4033 }
0x2fc5   :  { %v3856_v16 = vmul.f32 %v5016_v47, %v3849_v3  ;;  %v3857_v62 = vmul.f32 %v5018_v18, %v3853_v58  ;;  %v3669_v47 = vshll.u32 %v3668_v25, 16  ;;  %v2103_v25 = vsub.f32 %v5709_v1, %v5717_v44 }
0x2fc7   :  { %3860 = vperm.xlu0 %4898, %v3856_v16  }
0x2fcb   :  { %3865 = vperm.xlu0 %4898, %v3857_v62  }
0x2fea   :  { %3665 = vmin.xlane.f32.xlu0 %v3664_v31 }
0x3046   :  { %v3861_v2 = vpop.permute.xlu0 %3860 }
0x3047   :  { %v3868_v46 = vmul.f32 %v5739_v29, %v3861_v2  ;;  %v4154_v22 = vrot.slane %v3861_v2, %v5261_v42 }
0x3049   :  { %v3870_v23 = vsel %vm83_vm1, %v3868_v46, 0.0 }
0x304a   :  { %v3871_v57 = vrot.slane %v3870_v23, 4  ;;  %v3866_v27 = vpop.permute.xlu0 %3865 }
0x304b   :  { %v3869_v51 = vmul.f32 %v5732_v54, %v3866_v27  ;;  %v4158_v37 = vrot.slane %v3866_v27, %v5261_v42  ;;  %v3630_v27 = vsub.f32 %v5985_v59, %v5994_v11 }
0x304c   :  { %v3872_v0 = vadd.f32 %v3871_v57, %v3870_v23  ;;  %v578_v23 = vsub.f32 %v5418_v35, %v5426_v48 }
0x304d   :  { %v3877_v34 = vsel %vm83_vm1, %v3869_v51, 0.0  ;;  %v4159_v13 = vsel %vm221_vm2, %v4158_v37, %v4154_v22  ;;  %v3631_v22 = vmul.f32 1.442695, %v3630_v27 }
0x304e   :  { %v3873_v14 = vrot.slane %v3872_v0, 2  ;;  %v3878_v10 = vrot.slane %v3877_v34, 4  ;;  %4253 = vst.msk [vmem:[%s6141_s13 + $0xe] sm:$0x3] %vm224_vm3, %v4159_v13  ;;  %v579_v57 = vmul.f32 1.442695, %v578_v23 }
0x3050   :  { %v3874_v29 = vadd.f32 %v3873_v14, %v3872_v0  ;;  %v3879_v40 = vadd.f32 %v3878_v10, %v3877_v34 }
0x3052   :  { %v3880_v33 = vrot.slane %v3879_v40, 2  ;;  %v3875_v36 = vrot.slane %v3874_v29, 1 }
0x3054   :  { %v3881_v6 = vadd.f32 %v3880_v33, %v3879_v40  ;;  %v3876_v12 = vadd.f32 %v3875_v36, %v3874_v29 }
0x3056   :  { %v3882_v54 = vrot.slane %v3881_v6, 1 }
0x3058   :  { %v3883_v42 = vadd.f32 %v3882_v54, %v3881_v6 }
0x305a   :  { %v3886_v38 = vsel %vm221_vm2, %v3883_v42, %v3876_v12 }
0x305b   :  { %4698 = vmatmul.mubr.msk.f32.vlgmr.msra.gmra.mrb[30].mxu1 %vm83_vm1, %v3886_v38 }
0x3077   :  { %v3666_v45 = vpop.xlane.xlu0 %3665 }
0x3078   :  { %v3667_v18 = vcvt.f32.s32 %v3666_v45 }
0x307a   :  { %v3670_v9 = vadd.s32 %v3669_v47, %v3667_v18 }
0x307c   :  { %vm3671_vm7 = vcmp.eq.s32.totalorder %v5256_v39, %v3670_v9 }
0x307d   :  { %v4246_v56 = vsel %vm3671_vm7, 1.0, %v5093_v7 }
0x307e   :  { %4705 = vmatmul.mubr.msk.f32.vlgmr.msra.gmra.mrb[28].mxu0 %vm381_vm5, %v4246_v56  ;;  %v3121_v56 = vsub.f32 %v5908_v63, %v5916_v19 }
0x307f   :  { %4882 = vmatpush3.bf16.msra.mxu0 %v5359_v26  ;;  %4715 = vmatprep.mubr.msk.f32.mxu0 %vm5092_vm0, %v5093_v7  ;;  %v4044_v7 = vpop.permute.xlu1 %4043  ;;  %vm4164_vm0 = vcmask 254976  }
0x3080   :  { %4883 = vmatprep.subr.bf16.mxu0 %v5091_v4 }
0x3083   :  { %4885 = vmatpush3.bf16.msra.mxu0 %v5365_v30 }
0x312e   :  { %v3955_v28 = vpop.f32.mrb[30].mxu1 }
0x312f   :  { %v4699_v55 = vpop.f32.mrb[31].mxu1 }
0x3151   :  { %v4028_v24 = vpop.f32.mrb[28].mxu0 }
0x3152   :  { %v4029_v5 = vadd.f32 %v4028_v24, %v3955_v28  ;;  %v4706_v8 = vpop.f32.mrb[29].mxu0  ;;  %v3122_v24 = vmul.f32 1.442695, %v3121_v56 }
0x3154   :  { %v4032_v39 = vadd.f32 %v5770_v49, %v4029_v5 }
0x3156   :  { %v4036_v3 = vadd.f32 %v4034_v21, %v4032_v39 }
0x3158   :  { %v4250_v16 = vmul.f32 -1.442695, %v4036_v3 }
0x315a   :  { %5021 = vpow2.f32 %v4250_v16 }
0x3164   :  { %v5022_v58 = vpop.eup %5021 }
0x3165   :  { %v4040_v26 = vadd.f32 1.0, %v5022_v58 }
0x3167   :  { %5023 = vrcp.f32 %v4040_v26 }
0x3171   :  { %v5024_v62 = vpop.eup %5023 }
0x3172   :  { %v4046_v17 = vmul.f32 %v5024_v62, %v4044_v7  ;;  %v4053_v20 = vsub.f32 1.0, %v5024_v62  ;;  %v4059_v31 = vmul.f32 %v5024_v62, %v5960_v41 }
0x3174   :  { %4048 = vrot.lane.b32.xlu1 %v4046_v17, %s5098_s18 }
0x31e6   :  { %v4049_v4 = vpop.permute.xlu1 %4048 }
0x31e7   :  { %v4051_v30 = vadd.f32 %v4049_v4, %v4032_v39 }
0x31e9   :  { %5025 = vtanh.f32 %v4051_v30 }
0x31ea   :  { %5027 = vpow2.f32 %v579_v57 }
0x31eb   :  { %5029 = vpow2.f32 %v3631_v22 }
0x31f3   :  { %v5026_v32 = vpop.eup %5025 }
0x31f4   :  { %4055 = vrot.lane.b32.xlu1 %v5026_v32, %s5096_s15  ;;  %v5028_v51 = vpop.eup %5027 }
0x31f5   :  { %v581_v37 = vsel %vm574_vm6, %v5028_v51, 0.0  ;;  %v5030_v0 = vpop.eup %5029 }
0x31f6   :  { %v3633_v41 = vsel %vm574_vm6, %v5030_v0, 0.0 }
0x3266   :  { %v4056_v49 = vpop.permute.xlu1 %4055 }
0x3267   :  { %v4058_v2 = vmul.f32 %v4056_v49, %v4053_v20 }
0x3269   :  { %v4060_v46 = vadd.f32 %v4059_v31, %v4058_v2 }
0x326b   :  { %4062 = vrot.lane.b32.xlu0 %v4060_v46, %s5096_s15 }
0x328a   :  { %582 = vadd.xlane.f32.xlu0 %v581_v37 }
0x328e   :  { %3634 = vadd.xlane.f32.xlu0 %v3633_v41 }
0x32dd   :  { %v4063_v34 = vpop.permute.xlu0 %4062 }
0x32de   :  { %4716 = vmatmul.mubr.msk.f32.vlgmr.msra.gmra.mrb[30].mxu0 %vm83_vm1, %v4063_v34  ;;  %4165 = vst.msk [vmem:[#allocation3] sm:$0x3] %vm4164_vm0, %v4063_v34 }
0x3317   :  { %v583_v13 = vpop.xlane.xlu0 %582 }
0x3318   :  { %5031 = vlog2.f32 %v583_v13 }
0x331b   :  { %v3635_v14 = vpop.xlane.xlu0 %3634 }
0x331c   :  { %5033 = vlog2.f32 %v3635_v14 }
0x3322   :  { %v5032_v10 = vpop.eup %5031 }
0x3323   :  { %v585_v29 = vmul.f32 0.6931472, %v5032_v10 }
0x3325   :  { %v586_v40 = vadd.f32 %v585_v29, %v5426_v48  ;;  %v1085_v48 = vsub.f32 %v5510_v15, %v5518_v43 }
0x3326   :  { %v5034_v33 = vpop.eup %5033 }
0x3327   :  { %v587_v36 = vsub.f32 %v5418_v35, %v586_v40  ;;  %v3637_v6 = vmul.f32 0.6931472, %v5034_v33  ;;  %v1086_v42 = vmul.f32 1.442695, %v1085_v48  ;;  %v1594_v35 = vsub.f32 %v5588_v52, %v5597_v61 }
0x3329   :  { %588 = vst.msk [vmem:[%s6140_s12] sm:$0x3] %vm574_vm6, %v587_v36  ;;  %v3638_v54 = vadd.f32 %v3637_v6, %v5994_v11  ;;  %5035 = vpow2.f32 %v1086_v42  ;;  %v1595_v38 = vmul.f32 1.442695, %v1594_v35  ;;  %v2104_v11 = vmul.f32 1.442695, %v2103_v25 }
0x332b   :  { %v3639_v12 = vsub.f32 %v5985_v59, %v3638_v54  ;;  %5037 = vpow2.f32 %v1595_v38  ;;  %v2612_v59 = vsub.f32 %v5807_v53, %v5816_v60 }
0x332c   :  { %5039 = vpow2.f32 %v2104_v11 }
0x332d   :  { %4244 = vst.msk [vmem:[%s6140_s12 + $0xc] sm:$0x3] %vm574_vm6, %v3639_v12  ;;  %v2613_v9 = vmul.f32 1.442695, %v2612_v59 }
0x332f   :  { %5041 = vpow2.f32 %v2613_v9 }
0x3330   :  { %5043 = vpow2.f32 %v3122_v24 }
0x3333   :  { %v5036_v55 = vpop.eup %5035 }
0x3334   :  { %v1088_v5 = vsel %vm574_vm6, %v5036_v55, 0.0 }
0x3335   :  { %v5038_v8 = vpop.eup %5037 }
0x3336   :  { %v5040_v39 = vpop.eup %5039 }
0x3337   :  { %v2106_v21 = vsel %vm574_vm6, %v5040_v39, 0.0 }
0x3339   :  { %v5042_v3 = vpop.eup %5041 }
0x333a   :  { %v2615_v16 = vsel %vm574_vm6, %v5042_v3, 0.0  ;;  %v5044_v58 = vpop.eup %5043 }
0x333b   :  { %v3124_v26 = vsel %vm574_vm6, %v5044_v58, 0.0 }
0x33b1   :  { %v4132_v45 = vpop.f32.mrb[30].mxu0 }
0x33b2   :  { %v6068_v47 = vadd.f32 %v5804_v50, %v4132_v45  ;;  %v4717_v18 = vpop.f32.mrb[31].mxu0  ;;  %v1597_v50 = vsel %vm574_vm6, %v5038_v8, 0.0 }
0x33b4   :  { %v4136_v28 = vsel %vm574_vm6, %v6068_v47, -inf }
0x33b5   :  { %4137 = vmax.xlane.f32.xlu1 %v4136_v28 }
0x33b9   :  { %1089 = vadd.xlane.f32.xlu1 %v1088_v5 }
0x33bd   :  { %1598 = vadd.xlane.f32.xlu1 %v1597_v50 }
0x33c1   :  { %2107 = vadd.xlane.f32.xlu1 %v2106_v21 }
0x33c5   :  { %2616 = vadd.xlane.f32.xlu1 %v2615_v16 }
0x33c9   :  { %3125 = vadd.xlane.f32.xlu1 %v3124_v26 }
0x3442   :  { %v4138_v62 = vpop.xlane.xlu1 %4137 }
0x3443   :  { %v4139_v7 = vsub.f32 %v6068_v47, %v4138_v62 }
0x3445   :  { %v4140_v17 = vmul.f32 1.442695, %v4139_v7 }
0x3446   :  { %v1090_v4 = vpop.xlane.xlu1 %1089 }
0x3447   :  { %5045 = vpow2.f32 %v4140_v17 }
0x3448   :  { %5047 = vlog2.f32 %v1090_v4 }
0x344a   :  { %v1599_v30 = vpop.xlane.xlu1 %1598 }
0x344b   :  { %5049 = vlog2.f32 %v1599_v30 }
0x344e   :  { %v2108_v32 = vpop.xlane.xlu1 %2107 }
0x344f   :  { %5051 = vlog2.f32 %v2108_v32 }
0x3451   :  { %v5046_v20 = vpop.eup %5045 }
0x3452   :  { %v5048_v49 = vpop.eup %5047  ;;  %v2617_v31 = vpop.xlane.xlu1 %2616  ;;  %v4142_v2 = vsel %vm574_vm6, %v5046_v20, 0.0 }
0x3453   :  { %v1092_v46 = vmul.f32 0.6931472, %v5048_v49  ;;  %5053 = vlog2.f32 %v2617_v31  ;;  %4143 = vadd.xlane.f32.xlu1 %v4142_v2 }
0x3455   :  { %v5050_v23 = vpop.eup %5049  ;;  %v1093_v57 = vadd.f32 %v1092_v46, %v5518_v43 }
0x3456   :  { %v1601_v27 = vmul.f32 0.6931472, %v5050_v23  ;;  %v3126_v22 = vpop.xlane.xlu1 %3125 }
0x3457   :  { %v1094_v51 = vsub.f32 %v5510_v15, %v1093_v57  ;;  %5055 = vlog2.f32 %v3126_v22 }
0x3458   :  { %v1602_v37 = vadd.f32 %v1601_v27, %v5597_v61 }
0x3459   :  { %v5052_v0 = vpop.eup %5051  ;;  %4204 = vst.msk [vmem:[%s6140_s12 + $0x2] sm:$0x3] %vm574_vm6, %v1094_v51 }
0x345a   :  { %v1603_v41 = vsub.f32 %v5588_v52, %v1602_v37  ;;  %v2110_v34 = vmul.f32 0.6931472, %v5052_v0 }
0x345c   :  { %4212 = vst.msk [vmem:[%s6140_s12 + $0x4] sm:$0x3] %vm574_vm6, %v1603_v41  ;;  %v2111_v43 = vadd.f32 %v2110_v34, %v5717_v44 }
0x345d   :  { %v5054_v15 = vpop.eup %5053 }
0x345e   :  { %v2112_v13 = vsub.f32 %v5709_v1, %v2111_v43  ;;  %v2619_v61 = vmul.f32 0.6931472, %v5054_v15 }
0x3460   :  { %4220 = vst.msk [vmem:[%s6140_s12 + $0x6] sm:$0x3] %vm574_vm6, %v2112_v13  ;;  %v2620_v14 = vadd.f32 %v2619_v61, %v5816_v60 }
0x3461   :  { %v5056_v52 = vpop.eup %5055 }
0x3462   :  { %v2621_v10 = vsub.f32 %v5807_v53, %v2620_v14  ;;  %v3128_v29 = vmul.f32 0.6931472, %v5056_v52 }
0x3464   :  { %4228 = vst.msk [vmem:[%s6140_s12 + $0x8] sm:$0x3] %vm574_vm6, %v2621_v10  ;;  %v3129_v44 = vadd.f32 %v3128_v29, %v5916_v19 }
0x3466   :  { %v3130_v1 = vsub.f32 %v5908_v63, %v3129_v44 }
0x3468   :  { %4236 = vst.msk [vmem:[%s6140_s12 + $0xa] sm:$0x3] %vm574_vm6, %v3130_v1 }
0x3469   :  { %5078 = shalt.err (!%p5075_p4)
}
0x346a   :  { %s5079_s0 = scalar_lea.hbm %s6142_s14, 32 }
0x346b   :  { %p5080_p5 = scmp.ne.s32.totalorder %s6142_s14, %s5079_s0  ;;  %p5083_p6 = scmp.lt.u32.totalorder %s5079_s0, %s6142_s14 }
0x346d   :  { %p5085_p7 = pnand %p5083_p6, %p5080_p5 }
0x346f   :  { %5088 = shalt.err (!%p5085_p7)
}
0x3470   :  { %4179 = dma.vmem_to_hbm [thread:$0]  %s4177_s3, 32, %s6142_s14, [#allocation4]  }
0x34e0   :  { %v4144_v53 = vpop.xlane.xlu1 %4143 }
0x34e1   :  { %5057 = vlog2.f32 %v4144_v53 }
0x34eb   :  { %v5058_v60 = vpop.eup %5057 }
0x34ec   :  { %v4146_v63 = vmul.f32 0.6931472, %v5058_v60 }
0x34ee   :  { %v4147_v19 = vadd.f32 %v4146_v63, %v4138_v62 }
0x34f0   :  { %v4148_v40 = vsub.f32 %v6068_v47, %v4147_v19 }
0x34f2   :  { %4252 = vst.msk [vmem:[%s6140_s12 + $0xe] sm:$0x3] %vm574_vm6, %v4148_v40 }
0x34f3   :  { %5089 = dma.done.wait [#allocation4], 32  }
0x34f4   :  { %5090 = vsyncadd [#allocation4], 4294967264 }
0x34f5   :  { %4187 = vsyncpa [#allocation4], 1 }

</bundles_post_ra>
